<compile_context>
chip_gen: v7x
topology: tpu7x:2x2x1
jax: 0.10.0
libtpu: 0.0.40
codegen_flags: <defaults>
</compile_context>

<pallas_src>
import jax
import jax.numpy as jnp
import numpy as np
from jax import lax
from jax.experimental import pallas as pl
from jax.experimental.pallas import tpu as pltpu


_VMEM = pl.BlockSpec(memory_space=pltpu.MemorySpace.VMEM)
_REFS_PER_LAYER = 10  # wih_{r,z,n}, whh_{r,z,n}, b_r, b_z, bin_n, bhn_n


# ----------------------------------------------------------------------------
# Fused Pallas kernel: GRU stack + ReLU + output projection in one call
# ----------------------------------------------------------------------------

def make_fused_gru_kernel(num_layers: int):
    """Build a kernel computing the whole GRUWrapper forward in one pallas_call.

    Ref order (inputs):
      seq_ref (B, T, Din), h0_ref (L, B, H),
      per layer: wih_r (Din_l, H), wih_z, wih_n,
                 whh_r (H, H),    whh_z, whh_n,
                 b_r (1, H), b_z (1, H), bin_n (1, H), bhn_n (1, H),
      then wout (H, O), bout (1, O).
    Outputs: logits_ref (B, T, O), hlast_ref (L, B, H).
    """

    def kernel(*refs):
        seq_ref, h0_ref = refs[0], refs[1]
        p = 2
        layers = []
        for _ in range(num_layers):
            layers.append(refs[p:p + _REFS_PER_LAYER])
            p += _REFS_PER_LAYER
        wout_ref, bout_ref = refs[p], refs[p + 1]
        logits_ref, hlast_ref = refs[p + 2], refs[p + 3]

        B, T, _ = seq_ref.shape
        H = h0_ref.shape[-1]

        # Layer input as a flat (B*T, Din) slab (row = b*T + t). No host transposes.
        x_flat = seq_ref[...].reshape(B * T, seq_ref.shape[-1])

        for l in range(num_layers):
            (wih_r_ref, wih_z_ref, wih_n_ref,
             whh_r_ref, whh_z_ref, whh_n_ref,
             b_r_ref, b_z_ref, bin_ref, bhn_ref) = layers[l]

            # Hoist hidden-gate weight/bias loads out of the time loop.
            whh_r = whh_r_ref[...]
            whh_z = whh_z_ref[...]
            whh_n = whh_n_ref[...]
            bhn = bhn_ref[...]

            # Batched input-gate projections for the whole sequence:
            # one (B*T, Din) x (Din, H) matmul per gate, outside the recurrence.
            gi_r = (jnp.dot(x_flat, wih_r_ref[...],
                            preferred_element_type=jnp.float32)
                    + b_r_ref[...]).reshape(B, T, H)
            gi_z = (jnp.dot(x_flat, wih_z_ref[...],
                            preferred_element_type=jnp.float32)
                    + b_z_ref[...]).reshape(B, T, H)
            gi_n = (jnp.dot(x_flat, wih_n_ref[...],
                            preferred_element_type=jnp.float32)
                    + bin_ref[...]).reshape(B, T, H)

            h = h0_ref[l]                       # (B, H)
            outs = []
            # T is small and static -> fully unrolled recurrence.
            for t in range(T):
                gh_r = jnp.dot(h, whh_r, preferred_element_type=jnp.float32)
                gh_z = jnp.dot(h, whh_z, preferred_element_type=jnp.float32)
                gh_n = jnp.dot(h, whh_n, preferred_element_type=jnp.float32) + bhn
                r = jax.nn.sigmoid(gi_r[:, t, :] + gh_r)
                z = jax.nn.sigmoid(gi_z[:, t, :] + gh_z)
                n = jnp.tanh(gi_n[:, t, :] + r * gh_n)
                h = (1.0 - z) * n + z * h
                outs.append(h)

            hlast_ref[l] = h                    # one bulk (B, H) store per layer
            # (nn.GRU inter-layer dropout is a no-op in inference mode.)
            rnn_out = jnp.stack(outs, axis=1)   # (B, T, H), stays in VMEM/vregs
            x_flat = rnn_out.reshape(B * T, H)  # input to the next layer

        # ReLU + output projection: one bulk matmul + one bulk store.
        y = jnp.maximum(x_flat, 0.0)                                     # (B*T, H)
        logits = jnp.dot(y, wout_ref[...],
                         preferred_element_type=jnp.float32) + bout_ref[...]
        logits_ref[...] = logits.reshape(B, T, logits.shape[-1])

    return kernel


# ----------------------------------------------------------------------------
# Wrapper around pallas_call
# ----------------------------------------------------------------------------

def gru_wrapper_forward(params, seq, h_init):
    """seq: (B, T, in_feats), h_init: (num_layers, B, hid) -> (logits, h_last)."""
    B, T, _ = seq.shape
    layers = params["layers"]
    L = len(layers)
    H = h_init.shape[-1]
    O = params["out_wT"].shape[-1]

    args = [seq, h_init]
    for p in layers:
        args += [p["wih_r"], p["wih_z"], p["wih_n"],
                 p["whh_r"], p["whh_z"], p["whh_n"],
                 p["b_r"], p["b_z"], p["bin_n"], p["bhn_n"]]
    args += [params["out_wT"], params["out_b"]]

    logits, h_last = pl.pallas_call(
        make_fused_gru_kernel(L),
        out_shape=(jax.ShapeDtypeStruct((B, T, O), jnp.float32),
                   jax.ShapeDtypeStruct((L, B, H), jnp.float32)),
        in_specs=[_VMEM] * len(args),
        out_specs=(_VMEM, _VMEM),
    )(*args)
    return logits, h_last


# ----------------------------------------------------------------------------
# Parameter init (deterministic, PyTorch-style uniform init, split per gate)
# ----------------------------------------------------------------------------

def init_params(key, in_feats, hid_feats, out_feats, num_layers, embed_size=0):
    params = {"layers": []}
    keys = jax.random.split(key, 4 * num_layers + 2)
    ki = 0

    gru_input = embed_size if embed_size > 0 else in_feats
    H = hid_feats
    k_gru = 1.0 / np.sqrt(H)
    for layer in range(num_layers):
        d_in = gru_input if layer == 0 else H
        wih = jax.random.uniform(keys[ki], (3 * H, d_in), minval=-k_gru, maxval=k_gru); ki += 1
        whh = jax.random.uniform(keys[ki], (3 * H, H), minval=-k_gru, maxval=k_gru); ki += 1
        bih = jax.random.uniform(keys[ki], (3 * H,), minval=-k_gru, maxval=k_gru); ki += 1
        bhh = jax.random.uniform(keys[ki], (3 * H,), minval=-k_gru, maxval=k_gru); ki += 1

        def gate(a, i):
            return a[i * H:(i + 1) * H]

        # PyTorch gate order along the 3H axis is (r, z, n).  Transpose so the kernel
        # does x @ W; fold the r/z biases (they are only ever added together); keep the
        # n-gate hidden bias separate (it sits inside the r * (...) term).
        params["layers"].append({
            "wih_r": jnp.asarray(gate(wih, 0).T, jnp.float32),
            "wih_z": jnp.asarray(gate(wih, 1).T, jnp.float32),
            "wih_n": jnp.asarray(gate(wih, 2).T, jnp.float32),
            "whh_r": jnp.asarray(gate(whh, 0).T, jnp.float32),
            "whh_z": jnp.asarray(gate(whh, 1).T, jnp.float32),
            "whh_n": jnp.asarray(gate(whh, 2).T, jnp.float32),
            "b_r": jnp.asarray((gate(bih, 0) + gate(bhh, 0)).reshape(1, H), jnp.float32),
            "b_z": jnp.asarray((gate(bih, 1) + gate(bhh, 1)).reshape(1, H), jnp.float32),
            "bin_n": jnp.asarray(gate(bih, 2).reshape(1, H), jnp.float32),
            "bhn_n": jnp.asarray(gate(bhh, 2).reshape(1, H), jnp.float32),
        })

    k_out = 1.0 / np.sqrt(H)
    w_out = jax.random.uniform(keys[ki], (out_feats, H), minval=-k_out, maxval=k_out); ki += 1
    b_out = jax.random.uniform(keys[ki], (1, out_feats), minval=-k_out, maxval=k_out); ki += 1
    params["out_wT"] = jnp.asarray(w_out.T, jnp.float32)
    params["out_b"] = jnp.asarray(b_out, jnp.float32)
    return params


# ----------------------------------------------------------------------------
# Pure-JAX reference (matches PyTorch nn.GRU semantics)
# ----------------------------------------------------------------------------

def gru_wrapper_reference(params, seq, h_init):
    x = jnp.transpose(seq, (1, 0, 2))  # (T, B, Din)
    h_lasts = []
    for l, p in enumerate(params["layers"]):
        def step(h, x_t, p=p):
            r = jax.nn.sigmoid(x_t @ p["wih_r"] + h @ p["whh_r"] + p["b_r"])
            z = jax.nn.sigmoid(x_t @ p["wih_z"] + h @ p["whh_z"] + p["b_z"])
            n = jnp.tanh(x_t @ p["wih_n"] + p["bin_n"]
                         + r * (h @ p["whh_n"] + p["bhn_n"]))
            h_new = (1.0 - z) * n + z * h
            return h_new, h_new

        h_last, outs = lax.scan(step, h_init[l], x)
        x = outs
        h_lasts.append(h_last)
    rnn_out = jnp.transpose(x, (1, 0, 2))
    logits = jnp.maximum(rnn_out, 0.0) @ params["out_wT"] + params["out_b"]
    return logits, jnp.stack(h_lasts, axis=0)


# ----------------------------------------------------------------------------
# Main
# ----------------------------------------------------------------------------

if __name__ == "__main__":
    in_feats, hid_feats, out_feats, num_layers = 16, 32, 8, 2
    B, T = 2, 8

    key = jax.random.PRNGKey(0)
    k_params, k_seq = jax.random.split(key)

    params = init_params(k_params, in_feats, hid_feats, out_feats, num_layers)
    seq = jax.random.normal(k_seq, (B, T, in_feats), dtype=jnp.float32)
    h_init = jnp.zeros((num_layers, B, hid_feats), dtype=jnp.float32)

    fwd = jax.jit(gru_wrapper_forward)
    logits, h_last = fwd(params, seq, h_init)
    logits = jax.block_until_ready(logits)
    h_last = jax.block_until_ready(h_last)

    # Numerical sanity check against a pure-JAX reference.
    ref_logits, ref_h = gru_wrapper_reference(params, seq, h_init)
    np.testing.assert_allclose(np.asarray(logits), np.asarray(ref_logits),
                               rtol=1e-2, atol=1e-2)
    np.testing.assert_allclose(np.asarray(h_last), np.asarray(ref_h),
                               rtol=1e-2, atol=1e-2)

    assert logits.shape == (B, T, out_feats)
    assert h_last.shape == (num_layers, B, hid_feats)
    print("KERNEL_OK")
</pallas_src>

<mosaic_0001>
module attributes {stable_mosaic.version = 11 : i64} {
  func.func @kernel(%arg0: memref<2x8x16xf32, #tpu.memory_space<vmem>>, %arg1: memref<2x2x32xf32, #tpu.memory_space<vmem>>, %arg2: memref<16x32xf32, #tpu.memory_space<vmem>>, %arg3: memref<16x32xf32, #tpu.memory_space<vmem>>, %arg4: memref<16x32xf32, #tpu.memory_space<vmem>>, %arg5: memref<32x32xf32, #tpu.memory_space<vmem>>, %arg6: memref<32x32xf32, #tpu.memory_space<vmem>>, %arg7: memref<32x32xf32, #tpu.memory_space<vmem>>, %arg8: memref<1x32xf32, #tpu.memory_space<vmem>>, %arg9: memref<1x32xf32, #tpu.memory_space<vmem>>, %arg10: memref<1x32xf32, #tpu.memory_space<vmem>>, %arg11: memref<1x32xf32, #tpu.memory_space<vmem>>, %arg12: memref<32x32xf32, #tpu.memory_space<vmem>>, %arg13: memref<32x32xf32, #tpu.memory_space<vmem>>, %arg14: memref<32x32xf32, #tpu.memory_space<vmem>>, %arg15: memref<32x32xf32, #tpu.memory_space<vmem>>, %arg16: memref<32x32xf32, #tpu.memory_space<vmem>>, %arg17: memref<32x32xf32, #tpu.memory_space<vmem>>, %arg18: memref<1x32xf32, #tpu.memory_space<vmem>>, %arg19: memref<1x32xf32, #tpu.memory_space<vmem>>, %arg20: memref<1x32xf32, #tpu.memory_space<vmem>>, %arg21: memref<1x32xf32, #tpu.memory_space<vmem>>, %arg22: memref<32x8xf32, #tpu.memory_space<vmem>>, %arg23: memref<1x8xf32, #tpu.memory_space<vmem>>, %arg24: memref<2x8x8xf32, #tpu.memory_space<vmem>>, %arg25: memref<2x2x32xf32, #tpu.memory_space<vmem>>) attributes {dimension_semantics = [], scalar_prefetch = 0 : i64, scratch_operands = 0 : i64, tpu.core_type = #tpu.core_type<tc>} {
    %c0 = arith.constant 0 : index
    %c0_0 = arith.constant 0 : index
    %c0_1 = arith.constant 0 : index
    %0 = vector.load %arg0[%c0, %c0_0, %c0_1] : memref<2x8x16xf32, #tpu.memory_space<vmem>>, vector<2x8x16xf32>
    %1 = vector.shape_cast %0 : vector<2x8x16xf32> to vector<16x16xf32>
    %c0_2 = arith.constant 0 : index
    %c0_3 = arith.constant 0 : index
    %2 = vector.load %arg5[%c0_2, %c0_3] : memref<32x32xf32, #tpu.memory_space<vmem>>, vector<32x32xf32>
    %c0_4 = arith.constant 0 : index
    %c0_5 = arith.constant 0 : index
    %3 = vector.load %arg6[%c0_4, %c0_5] : memref<32x32xf32, #tpu.memory_space<vmem>>, vector<32x32xf32>
    %c0_6 = arith.constant 0 : index
    %c0_7 = arith.constant 0 : index
    %4 = vector.load %arg7[%c0_6, %c0_7] : memref<32x32xf32, #tpu.memory_space<vmem>>, vector<32x32xf32>
    %c0_8 = arith.constant 0 : index
    %c0_9 = arith.constant 0 : index
    %5 = vector.load %arg11[%c0_8, %c0_9] : memref<1x32xf32, #tpu.memory_space<vmem>>, vector<1x32xf32>
    %c0_10 = arith.constant 0 : index
    %c0_11 = arith.constant 0 : index
    %6 = vector.load %arg2[%c0_10, %c0_11] : memref<16x32xf32, #tpu.memory_space<vmem>>, vector<16x32xf32>
    %cst = arith.constant dense<0.000000e+00> : vector<16x32xf32>
    %7 = tpu.matmul %1, %6, %cst {dimension_numbers = #tpu.dot_dimension_numbers<[1], [0], [0], [1], [0, 0, 1, 1], [], []>} : vector<16x16xf32>, vector<16x32xf32>, vector<16x32xf32> -> vector<16x32xf32>
    %c0_12 = arith.constant 0 : index
    %c0_13 = arith.constant 0 : index
    %8 = vector.load %arg8[%c0_12, %c0_13] : memref<1x32xf32, #tpu.memory_space<vmem>>, vector<1x32xf32>
    %9 = vector.broadcast %8 : vector<1x32xf32> to vector<16x32xf32>
    %10 = arith.addf %7, %9 : vector<16x32xf32>
    %11 = vector.shape_cast %10 : vector<16x32xf32> to vector<2x8x32xf32>
    %c0_14 = arith.constant 0 : index
    %c0_15 = arith.constant 0 : index
    %12 = vector.load %arg3[%c0_14, %c0_15] : memref<16x32xf32, #tpu.memory_space<vmem>>, vector<16x32xf32>
    %cst_16 = arith.constant dense<0.000000e+00> : vector<16x32xf32>
    %13 = tpu.matmul %1, %12, %cst_16 {dimension_numbers = #tpu.dot_dimension_numbers<[1], [0], [0], [1], [0, 0, 1, 1], [], []>} : vector<16x16xf32>, vector<16x32xf32>, vector<16x32xf32> -> vector<16x32xf32>
    %c0_17 = arith.constant 0 : index
    %c0_18 = arith.constant 0 : index
    %14 = vector.load %arg9[%c0_17, %c0_18] : memref<1x32xf32, #tpu.memory_space<vmem>>, vector<1x32xf32>
    %15 = vector.broadcast %14 : vector<1x32xf32> to vector<16x32xf32>
    %16 = arith.addf %13, %15 : vector<16x32xf32>
    %17 = vector.shape_cast %16 : vector<16x32xf32> to vector<2x8x32xf32>
    %c0_19 = arith.constant 0 : index
    %c0_20 = arith.constant 0 : index
    %18 = vector.load %arg4[%c0_19, %c0_20] : memref<16x32xf32, #tpu.memory_space<vmem>>, vector<16x32xf32>
    %cst_21 = arith.constant dense<0.000000e+00> : vector<16x32xf32>
    %19 = tpu.matmul %1, %18, %cst_21 {dimension_numbers = #tpu.dot_dimension_numbers<[1], [0], [0], [1], [0, 0, 1, 1], [], []>} : vector<16x16xf32>, vector<16x32xf32>, vector<16x32xf32> -> vector<16x32xf32>
    %c0_22 = arith.constant 0 : index
    %c0_23 = arith.constant 0 : index
    %20 = vector.load %arg10[%c0_22, %c0_23] : memref<1x32xf32, #tpu.memory_space<vmem>>, vector<1x32xf32>
    %21 = vector.broadcast %20 : vector<1x32xf32> to vector<16x32xf32>
    %22 = arith.addf %19, %21 : vector<16x32xf32>
    %23 = vector.shape_cast %22 : vector<16x32xf32> to vector<2x8x32xf32>
    %c0_24 = arith.constant 0 : index
    %c0_25 = arith.constant 0 : index
    %c0_26 = arith.constant 0 : index
    %24 = vector.load %arg1[%c0_24, %c0_25, %c0_26] : memref<2x2x32xf32, #tpu.memory_space<vmem>>, vector<1x2x32xf32>
    %25 = vector.shape_cast %24 : vector<1x2x32xf32> to vector<2x32xf32>
    %cst_27 = arith.constant dense<0.000000e+00> : vector<2x32xf32>
    %26 = tpu.matmul %25, %2, %cst_27 {dimension_numbers = #tpu.dot_dimension_numbers<[1], [0], [0], [1], [0, 0, 1, 1], [], []>} : vector<2x32xf32>, vector<32x32xf32>, vector<2x32xf32> -> vector<2x32xf32>
    %cst_28 = arith.constant dense<0.000000e+00> : vector<2x32xf32>
    %27 = tpu.matmul %25, %3, %cst_28 {dimension_numbers = #tpu.dot_dimension_numbers<[1], [0], [0], [1], [0, 0, 1, 1], [], []>} : vector<2x32xf32>, vector<32x32xf32>, vector<2x32xf32> -> vector<2x32xf32>
    %cst_29 = arith.constant dense<0.000000e+00> : vector<2x32xf32>
    %28 = tpu.matmul %25, %4, %cst_29 {dimension_numbers = #tpu.dot_dimension_numbers<[1], [0], [0], [1], [0, 0, 1, 1], [], []>} : vector<2x32xf32>, vector<32x32xf32>, vector<2x32xf32> -> vector<2x32xf32>
    %29 = vector.broadcast %5 : vector<1x32xf32> to vector<2x32xf32>
    %30 = arith.addf %28, %29 : vector<2x32xf32>
    %31 = vector.extract_strided_slice %11 {offsets = [0, 0, 0], sizes = [2, 1, 32], strides = [1, 1, 1]} : vector<2x8x32xf32> to vector<2x1x32xf32>
    %32 = vector.shape_cast %31 : vector<2x1x32xf32> to vector<2x32xf32>
    %33 = arith.addf %32, %26 : vector<2x32xf32>
    %34 = arith.negf %33 : vector<2x32xf32>
    %35 = math.exp %34 : vector<2x32xf32>
    %cst_30 = arith.constant 1.000000e+00 : f32
    %36 = vector.broadcast %cst_30 : f32 to vector<2x32xf32>
    %37 = arith.addf %36, %35 : vector<2x32xf32>
    %38 = arith.divf %36, %37 : vector<2x32xf32>
    %39 = vector.extract_strided_slice %17 {offsets = [0, 0, 0], sizes = [2, 1, 32], strides = [1, 1, 1]} : vector<2x8x32xf32> to vector<2x1x32xf32>
    %40 = vector.shape_cast %39 : vector<2x1x32xf32> to vector<2x32xf32>
    %41 = arith.addf %40, %27 : vector<2x32xf32>
    %42 = arith.negf %41 : vector<2x32xf32>
    %43 = math.exp %42 : vector<2x32xf32>
    %cst_31 = arith.constant 1.000000e+00 : f32
    %44 = vector.broadcast %cst_31 : f32 to vector<2x32xf32>
    %45 = arith.addf %44, %43 : vector<2x32xf32>
    %46 = arith.divf %44, %45 : vector<2x32xf32>
    %47 = vector.extract_strided_slice %23 {offsets = [0, 0, 0], sizes = [2, 1, 32], strides = [1, 1, 1]} : vector<2x8x32xf32> to vector<2x1x32xf32>
    %48 = vector.shape_cast %47 : vector<2x1x32xf32> to vector<2x32xf32>
    %49 = arith.mulf %38, %30 : vector<2x32xf32>
    %50 = arith.addf %48, %49 : vector<2x32xf32>
    %51 = math.tanh %50 : vector<2x32xf32>
    %cst_32 = arith.constant 1.000000e+00 : f32
    %52 = vector.broadcast %cst_32 : f32 to vector<2x32xf32>
    %53 = arith.subf %52, %46 : vector<2x32xf32>
    %54 = arith.mulf %53, %51 : vector<2x32xf32>
    %55 = arith.mulf %46, %25 : vector<2x32xf32>
    %56 = arith.addf %54, %55 : vector<2x32xf32>
    %cst_33 = arith.constant dense<0.000000e+00> : vector<2x32xf32>
    %57 = tpu.matmul %56, %2, %cst_33 {dimension_numbers = #tpu.dot_dimension_numbers<[1], [0], [0], [1], [0, 0, 1, 1], [], []>} : vector<2x32xf32>, vector<32x32xf32>, vector<2x32xf32> -> vector<2x32xf32>
    %cst_34 = arith.constant dense<0.000000e+00> : vector<2x32xf32>
    %58 = tpu.matmul %56, %3, %cst_34 {dimension_numbers = #tpu.dot_dimension_numbers<[1], [0], [0], [1], [0, 0, 1, 1], [], []>} : vector<2x32xf32>, vector<32x32xf32>, vector<2x32xf32> -> vector<2x32xf32>
    %cst_35 = arith.constant dense<0.000000e+00> : vector<2x32xf32>
    %59 = tpu.matmul %56, %4, %cst_35 {dimension_numbers = #tpu.dot_dimension_numbers<[1], [0], [0], [1], [0, 0, 1, 1], [], []>} : vector<2x32xf32>, vector<32x32xf32>, vector<2x32xf32> -> vector<2x32xf32>
    %60 = vector.broadcast %5 : vector<1x32xf32> to vector<2x32xf32>
    %61 = arith.addf %59, %60 : vector<2x32xf32>
    %62 = vector.extract_strided_slice %11 {offsets = [0, 1, 0], sizes = [2, 1, 32], strides = [1, 1, 1]} : vector<2x8x32xf32> to vector<2x1x32xf32>
    %63 = vector.shape_cast %62 : vector<2x1x32xf32> to vector<2x32xf32>
    %64 = arith.addf %63, %57 : vector<2x32xf32>
    %65 = arith.negf %64 : vector<2x32xf32>
    %66 = math.exp %65 : vector<2x32xf32>
    %cst_36 = arith.constant 1.000000e+00 : f32
    %67 = vector.broadcast %cst_36 : f32 to vector<2x32xf32>
    %68 = arith.addf %67, %66 : vector<2x32xf32>
    %69 = arith.divf %67, %68 : vector<2x32xf32>
    %70 = vector.extract_strided_slice %17 {offsets = [0, 1, 0], sizes = [2, 1, 32], strides = [1, 1, 1]} : vector<2x8x32xf32> to vector<2x1x32xf32>
    %71 = vector.shape_cast %70 : vector<2x1x32xf32> to vector<2x32xf32>
    %72 = arith.addf %71, %58 : vector<2x32xf32>
    %73 = arith.negf %72 : vector<2x32xf32>
    %74 = math.exp %73 : vector<2x32xf32>
    %cst_37 = arith.constant 1.000000e+00 : f32
    %75 = vector.broadcast %cst_37 : f32 to vector<2x32xf32>
    %76 = arith.addf %75, %74 : vector<2x32xf32>
    %77 = arith.divf %75, %76 : vector<2x32xf32>
    %78 = vector.extract_strided_slice %23 {offsets = [0, 1, 0], sizes = [2, 1, 32], strides = [1, 1, 1]} : vector<2x8x32xf32> to vector<2x1x32xf32>
    %79 = vector.shape_cast %78 : vector<2x1x32xf32> to vector<2x32xf32>
    %80 = arith.mulf %69, %61 : vector<2x32xf32>
    %81 = arith.addf %79, %80 : vector<2x32xf32>
    %82 = math.tanh %81 : vector<2x32xf32>
    %cst_38 = arith.constant 1.000000e+00 : f32
    %83 = vector.broadcast %cst_38 : f32 to vector<2x32xf32>
    %84 = arith.subf %83, %77 : vector<2x32xf32>
    %85 = arith.mulf %84, %82 : vector<2x32xf32>
    %86 = arith.mulf %77, %56 : vector<2x32xf32>
    %87 = arith.addf %85, %86 : vector<2x32xf32>
    %cst_39 = arith.constant dense<0.000000e+00> : vector<2x32xf32>
    %88 = tpu.matmul %87, %2, %cst_39 {dimension_numbers = #tpu.dot_dimension_numbers<[1], [0], [0], [1], [0, 0, 1, 1], [], []>} : vector<2x32xf32>, vector<32x32xf32>, vector<2x32xf32> -> vector<2x32xf32>
    %cst_40 = arith.constant dense<0.000000e+00> : vector<2x32xf32>
    %89 = tpu.matmul %87, %3, %cst_40 {dimension_numbers = #tpu.dot_dimension_numbers<[1], [0], [0], [1], [0, 0, 1, 1], [], []>} : vector<2x32xf32>, vector<32x32xf32>, vector<2x32xf32> -> vector<2x32xf32>
    %cst_41 = arith.constant dense<0.000000e+00> : vector<2x32xf32>
    %90 = tpu.matmul %87, %4, %cst_41 {dimension_numbers = #tpu.dot_dimension_numbers<[1], [0], [0], [1], [0, 0, 1, 1], [], []>} : vector<2x32xf32>, vector<32x32xf32>, vector<2x32xf32> -> vector<2x32xf32>
    %91 = vector.broadcast %5 : vector<1x32xf32> to vector<2x32xf32>
    %92 = arith.addf %90, %91 : vector<2x32xf32>
    %93 = vector.extract_strided_slice %11 {offsets = [0, 2, 0], sizes = [2, 1, 32], strides = [1, 1, 1]} : vector<2x8x32xf32> to vector<2x1x32xf32>
    %94 = vector.shape_cast %93 : vector<2x1x32xf32> to vector<2x32xf32>
    %95 = arith.addf %94, %88 : vector<2x32xf32>
    %96 = arith.negf %95 : vector<2x32xf32>
    %97 = math.exp %96 : vector<2x32xf32>
    %cst_42 = arith.constant 1.000000e+00 : f32
    %98 = vector.broadcast %cst_42 : f32 to vector<2x32xf32>
    %99 = arith.addf %98, %97 : vector<2x32xf32>
    %100 = arith.divf %98, %99 : vector<2x32xf32>
    %101 = vector.extract_strided_slice %17 {offsets = [0, 2, 0], sizes = [2, 1, 32], strides = [1, 1, 1]} : vector<2x8x32xf32> to vector<2x1x32xf32>
    %102 = vector.shape_cast %101 : vector<2x1x32xf32> to vector<2x32xf32>
    %103 = arith.addf %102, %89 : vector<2x32xf32>
    %104 = arith.negf %103 : vector<2x32xf32>
    %105 = math.exp %104 : vector<2x32xf32>
    %cst_43 = arith.constant 1.000000e+00 : f32
    %106 = vector.broadcast %cst_43 : f32 to vector<2x32xf32>
    %107 = arith.addf %106, %105 : vector<2x32xf32>
    %108 = arith.divf %106, %107 : vector<2x32xf32>
    %109 = vector.extract_strided_slice %23 {offsets = [0, 2, 0], sizes = [2, 1, 32], strides = [1, 1, 1]} : vector<2x8x32xf32> to vector<2x1x32xf32>
    %110 = vector.shape_cast %109 : vector<2x1x32xf32> to vector<2x32xf32>
    %111 = arith.mulf %100, %92 : vector<2x32xf32>
    %112 = arith.addf %110, %111 : vector<2x32xf32>
    %113 = math.tanh %112 : vector<2x32xf32>
    %cst_44 = arith.constant 1.000000e+00 : f32
    %114 = vector.broadcast %cst_44 : f32 to vector<2x32xf32>
    %115 = arith.subf %114, %108 : vector<2x32xf32>
    %116 = arith.mulf %115, %113 : vector<2x32xf32>
    %117 = arith.mulf %108, %87 : vector<2x32xf32>
    %118 = arith.addf %116, %117 : vector<2x32xf32>
    %cst_45 = arith.constant dense<0.000000e+00> : vector<2x32xf32>
    %119 = tpu.matmul %118, %2, %cst_45 {dimension_numbers = #tpu.dot_dimension_numbers<[1], [0], [0], [1], [0, 0, 1, 1], [], []>} : vector<2x32xf32>, vector<32x32xf32>, vector<2x32xf32> -> vector<2x32xf32>
    %cst_46 = arith.constant dense<0.000000e+00> : vector<2x32xf32>
    %120 = tpu.matmul %118, %3, %cst_46 {dimension_numbers = #tpu.dot_dimension_numbers<[1], [0], [0], [1], [0, 0, 1, 1], [], []>} : vector<2x32xf32>, vector<32x32xf32>, vector<2x32xf32> -> vector<2x32xf32>
    %cst_47 = arith.constant dense<0.000000e+00> : vector<2x32xf32>
    %121 = tpu.matmul %118, %4, %cst_47 {dimension_numbers = #tpu.dot_dimension_numbers<[1], [0], [0], [1], [0, 0, 1, 1], [], []>} : vector<2x32xf32>, vector<32x32xf32>, vector<2x32xf32> -> vector<2x32xf32>
    %122 = vector.broadcast %5 : vector<1x32xf32> to vector<2x32xf32>
    %123 = arith.addf %121, %122 : vector<2x32xf32>
    %124 = vector.extract_strided_slice %11 {offsets = [0, 3, 0], sizes = [2, 1, 32], strides = [1, 1, 1]} : vector<2x8x32xf32> to vector<2x1x32xf32>
    %125 = vector.shape_cast %124 : vector<2x1x32xf32> to vector<2x32xf32>
    %126 = arith.addf %125, %119 : vector<2x32xf32>
    %127 = arith.negf %126 : vector<2x32xf32>
    %128 = math.exp %127 : vector<2x32xf32>
    %cst_48 = arith.constant 1.000000e+00 : f32
    %129 = vector.broadcast %cst_48 : f32 to vector<2x32xf32>
    %130 = arith.addf %129, %128 : vector<2x32xf32>
    %131 = arith.divf %129, %130 : vector<2x32xf32>
    %132 = vector.extract_strided_slice %17 {offsets = [0, 3, 0], sizes = [2, 1, 32], strides = [1, 1, 1]} : vector<2x8x32xf32> to vector<2x1x32xf32>
    %133 = vector.shape_cast %132 : vector<2x1x32xf32> to vector<2x32xf32>
    %134 = arith.addf %133, %120 : vector<2x32xf32>
    %135 = arith.negf %134 : vector<2x32xf32>
    %136 = math.exp %135 : vector<2x32xf32>
    %cst_49 = arith.constant 1.000000e+00 : f32
    %137 = vector.broadcast %cst_49 : f32 to vector<2x32xf32>
    %138 = arith.addf %137, %136 : vector<2x32xf32>
    %139 = arith.divf %137, %138 : vector<2x32xf32>
    %140 = vector.extract_strided_slice %23 {offsets = [0, 3, 0], sizes = [2, 1, 32], strides = [1, 1, 1]} : vector<2x8x32xf32> to vector<2x1x32xf32>
    %141 = vector.shape_cast %140 : vector<2x1x32xf32> to vector<2x32xf32>
    %142 = arith.mulf %131, %123 : vector<2x32xf32>
    %143 = arith.addf %141, %142 : vector<2x32xf32>
    %144 = math.tanh %143 : vector<2x32xf32>
    %cst_50 = arith.constant 1.000000e+00 : f32
    %145 = vector.broadcast %cst_50 : f32 to vector<2x32xf32>
    %146 = arith.subf %145, %139 : vector<2x32xf32>
    %147 = arith.mulf %146, %144 : vector<2x32xf32>
    %148 = arith.mulf %139, %118 : vector<2x32xf32>
    %149 = arith.addf %147, %148 : vector<2x32xf32>
    %cst_51 = arith.constant dense<0.000000e+00> : vector<2x32xf32>
    %150 = tpu.matmul %149, %2, %cst_51 {dimension_numbers = #tpu.dot_dimension_numbers<[1], [0], [0], [1], [0, 0, 1, 1], [], []>} : vector<2x32xf32>, vector<32x32xf32>, vector<2x32xf32> -> vector<2x32xf32>
    %cst_52 = arith.constant dense<0.000000e+00> : vector<2x32xf32>
    %151 = tpu.matmul %149, %3, %cst_52 {dimension_numbers = #tpu.dot_dimension_numbers<[1], [0], [0], [1], [0, 0, 1, 1], [], []>} : vector<2x32xf32>, vector<32x32xf32>, vector<2x32xf32> -> vector<2x32xf32>
    %cst_53 = arith.constant dense<0.000000e+00> : vector<2x32xf32>
    %152 = tpu.matmul %149, %4, %cst_53 {dimension_numbers = #tpu.dot_dimension_numbers<[1], [0], [0], [1], [0, 0, 1, 1], [], []>} : vector<2x32xf32>, vector<32x32xf32>, vector<2x32xf32> -> vector<2x32xf32>
    %153 = vector.broadcast %5 : vector<1x32xf32> to vector<2x32xf32>
    %154 = arith.addf %152, %153 : vector<2x32xf32>
    %155 = vector.extract_strided_slice %11 {offsets = [0, 4, 0], sizes = [2, 1, 32], strides = [1, 1, 1]} : vector<2x8x32xf32> to vector<2x1x32xf32>
    %156 = vector.shape_cast %155 : vector<2x1x32xf32> to vector<2x32xf32>
    %157 = arith.addf %156, %150 : vector<2x32xf32>
    %158 = arith.negf %157 : vector<2x32xf32>
    %159 = math.exp %158 : vector<2x32xf32>
    %cst_54 = arith.constant 1.000000e+00 : f32
    %160 = vector.broadcast %cst_54 : f32 to vector<2x32xf32>
    %161 = arith.addf %160, %159 : vector<2x32xf32>
    %162 = arith.divf %160, %161 : vector<2x32xf32>
    %163 = vector.extract_strided_slice %17 {offsets = [0, 4, 0], sizes = [2, 1, 32], strides = [1, 1, 1]} : vector<2x8x32xf32> to vector<2x1x32xf32>
    %164 = vector.shape_cast %163 : vector<2x1x32xf32> to vector<2x32xf32>
    %165 = arith.addf %164, %151 : vector<2x32xf32>
    %166 = arith.negf %165 : vector<2x32xf32>
    %167 = math.exp %166 : vector<2x32xf32>
    %cst_55 = arith.constant 1.000000e+00 : f32
    %168 = vector.broadcast %cst_55 : f32 to vector<2x32xf32>
    %169 = arith.addf %168, %167 : vector<2x32xf32>
    %170 = arith.divf %168, %169 : vector<2x32xf32>
    %171 = vector.extract_strided_slice %23 {offsets = [0, 4, 0], sizes = [2, 1, 32], strides = [1, 1, 1]} : vector<2x8x32xf32> to vector<2x1x32xf32>
    %172 = vector.shape_cast %171 : vector<2x1x32xf32> to vector<2x32xf32>
    %173 = arith.mulf %162, %154 : vector<2x32xf32>
    %174 = arith.addf %172, %173 : vector<2x32xf32>
    %175 = math.tanh %174 : vector<2x32xf32>
    %cst_56 = arith.constant 1.000000e+00 : f32
    %176 = vector.broadcast %cst_56 : f32 to vector<2x32xf32>
    %177 = arith.subf %176, %170 : vector<2x32xf32>
    %178 = arith.mulf %177, %175 : vector<2x32xf32>
    %179 = arith.mulf %170, %149 : vector<2x32xf32>
    %180 = arith.addf %178, %179 : vector<2x32xf32>
    %cst_57 = arith.constant dense<0.000000e+00> : vector<2x32xf32>
    %181 = tpu.matmul %180, %2, %cst_57 {dimension_numbers = #tpu.dot_dimension_numbers<[1], [0], [0], [1], [0, 0, 1, 1], [], []>} : vector<2x32xf32>, vector<32x32xf32>, vector<2x32xf32> -> vector<2x32xf32>
    %cst_58 = arith.constant dense<0.000000e+00> : vector<2x32xf32>
    %182 = tpu.matmul %180, %3, %cst_58 {dimension_numbers = #tpu.dot_dimension_numbers<[1], [0], [0], [1], [0, 0, 1, 1], [], []>} : vector<2x32xf32>, vector<32x32xf32>, vector<2x32xf32> -> vector<2x32xf32>
    %cst_59 = arith.constant dense<0.000000e+00> : vector<2x32xf32>
    %183 = tpu.matmul %180, %4, %cst_59 {dimension_numbers = #tpu.dot_dimension_numbers<[1], [0], [0], [1], [0, 0, 1, 1], [], []>} : vector<2x32xf32>, vector<32x32xf32>, vector<2x32xf32> -> vector<2x32xf32>
    %184 = vector.broadcast %5 : vector<1x32xf32> to vector<2x32xf32>
    %185 = arith.addf %183, %184 : vector<2x32xf32>
    %186 = vector.extract_strided_slice %11 {offsets = [0, 5, 0], sizes = [2, 1, 32], strides = [1, 1, 1]} : vector<2x8x32xf32> to vector<2x1x32xf32>
    %187 = vector.shape_cast %186 : vector<2x1x32xf32> to vector<2x32xf32>
    %188 = arith.addf %187, %181 : vector<2x32xf32>
    %189 = arith.negf %188 : vector<2x32xf32>
    %190 = math.exp %189 : vector<2x32xf32>
    %cst_60 = arith.constant 1.000000e+00 : f32
    %191 = vector.broadcast %cst_60 : f32 to vector<2x32xf32>
    %192 = arith.addf %191, %190 : vector<2x32xf32>
    %193 = arith.divf %191, %192 : vector<2x32xf32>
    %194 = vector.extract_strided_slice %17 {offsets = [0, 5, 0], sizes = [2, 1, 32], strides = [1, 1, 1]} : vector<2x8x32xf32> to vector<2x1x32xf32>
    %195 = vector.shape_cast %194 : vector<2x1x32xf32> to vector<2x32xf32>
    %196 = arith.addf %195, %182 : vector<2x32xf32>
    %197 = arith.negf %196 : vector<2x32xf32>
    %198 = math.exp %197 : vector<2x32xf32>
    %cst_61 = arith.constant 1.000000e+00 : f32
    %199 = vector.broadcast %cst_61 : f32 to vector<2x32xf32>
    %200 = arith.addf %199, %198 : vector<2x32xf32>
    %201 = arith.divf %199, %200 : vector<2x32xf32>
    %202 = vector.extract_strided_slice %23 {offsets = [0, 5, 0], sizes = [2, 1, 32], strides = [1, 1, 1]} : vector<2x8x32xf32> to vector<2x1x32xf32>
    %203 = vector.shape_cast %202 : vector<2x1x32xf32> to vector<2x32xf32>
    %204 = arith.mulf %193, %185 : vector<2x32xf32>
    %205 = arith.addf %203, %204 : vector<2x32xf32>
    %206 = math.tanh %205 : vector<2x32xf32>
    %cst_62 = arith.constant 1.000000e+00 : f32
    %207 = vector.broadcast %cst_62 : f32 to vector<2x32xf32>
    %208 = arith.subf %207, %201 : vector<2x32xf32>
    %209 = arith.mulf %208, %206 : vector<2x32xf32>
    %210 = arith.mulf %201, %180 : vector<2x32xf32>
    %211 = arith.addf %209, %210 : vector<2x32xf32>
    %cst_63 = arith.constant dense<0.000000e+00> : vector<2x32xf32>
    %212 = tpu.matmul %211, %2, %cst_63 {dimension_numbers = #tpu.dot_dimension_numbers<[1], [0], [0], [1], [0, 0, 1, 1], [], []>} : vector<2x32xf32>, vector<32x32xf32>, vector<2x32xf32> -> vector<2x32xf32>
    %cst_64 = arith.constant dense<0.000000e+00> : vector<2x32xf32>
    %213 = tpu.matmul %211, %3, %cst_64 {dimension_numbers = #tpu.dot_dimension_numbers<[1], [0], [0], [1], [0, 0, 1, 1], [], []>} : vector<2x32xf32>, vector<32x32xf32>, vector<2x32xf32> -> vector<2x32xf32>
    %cst_65 = arith.constant dense<0.000000e+00> : vector<2x32xf32>
    %214 = tpu.matmul %211, %4, %cst_65 {dimension_numbers = #tpu.dot_dimension_numbers<[1], [0], [0], [1], [0, 0, 1, 1], [], []>} : vector<2x32xf32>, vector<32x32xf32>, vector<2x32xf32> -> vector<2x32xf32>
    %215 = vector.broadcast %5 : vector<1x32xf32> to vector<2x32xf32>
    %216 = arith.addf %214, %215 : vector<2x32xf32>
    %217 = vector.extract_strided_slice %11 {offsets = [0, 6, 0], sizes = [2, 1, 32], strides = [1, 1, 1]} : vector<2x8x32xf32> to vector<2x1x32xf32>
    %218 = vector.shape_cast %217 : vector<2x1x32xf32> to vector<2x32xf32>
    %219 = arith.addf %218, %212 : vector<2x32xf32>
    %220 = arith.negf %219 : vector<2x32xf32>
    %221 = math.exp %220 : vector<2x32xf32>
    %cst_66 = arith.constant 1.000000e+00 : f32
    %222 = vector.broadcast %cst_66 : f32 to vector<2x32xf32>
    %223 = arith.addf %222, %221 : vector<2x32xf32>
    %224 = arith.divf %222, %223 : vector<2x32xf32>
    %225 = vector.extract_strided_slice %17 {offsets = [0, 6, 0], sizes = [2, 1, 32], strides = [1, 1, 1]} : vector<2x8x32xf32> to vector<2x1x32xf32>
    %226 = vector.shape_cast %225 : vector<2x1x32xf32> to vector<2x32xf32>
    %227 = arith.addf %226, %213 : vector<2x32xf32>
    %228 = arith.negf %227 : vector<2x32xf32>
    %229 = math.exp %228 : vector<2x32xf32>
    %cst_67 = arith.constant 1.000000e+00 : f32
    %230 = vector.broadcast %cst_67 : f32 to vector<2x32xf32>
    %231 = arith.addf %230, %229 : vector<2x32xf32>
    %232 = arith.divf %230, %231 : vector<2x32xf32>
    %233 = vector.extract_strided_slice %23 {offsets = [0, 6, 0], sizes = [2, 1, 32], strides = [1, 1, 1]} : vector<2x8x32xf32> to vector<2x1x32xf32>
    %234 = vector.shape_cast %233 : vector<2x1x32xf32> to vector<2x32xf32>
    %235 = arith.mulf %224, %216 : vector<2x32xf32>
    %236 = arith.addf %234, %235 : vector<2x32xf32>
    %237 = math.tanh %236 : vector<2x32xf32>
    %cst_68 = arith.constant 1.000000e+00 : f32
    %238 = vector.broadcast %cst_68 : f32 to vector<2x32xf32>
    %239 = arith.subf %238, %232 : vector<2x32xf32>
    %240 = arith.mulf %239, %237 : vector<2x32xf32>
    %241 = arith.mulf %232, %211 : vector<2x32xf32>
    %242 = arith.addf %240, %241 : vector<2x32xf32>
    %cst_69 = arith.constant dense<0.000000e+00> : vector<2x32xf32>
    %243 = tpu.matmul %242, %2, %cst_69 {dimension_numbers = #tpu.dot_dimension_numbers<[1], [0], [0], [1], [0, 0, 1, 1], [], []>} : vector<2x32xf32>, vector<32x32xf32>, vector<2x32xf32> -> vector<2x32xf32>
    %cst_70 = arith.constant dense<0.000000e+00> : vector<2x32xf32>
    %244 = tpu.matmul %242, %3, %cst_70 {dimension_numbers = #tpu.dot_dimension_numbers<[1], [0], [0], [1], [0, 0, 1, 1], [], []>} : vector<2x32xf32>, vector<32x32xf32>, vector<2x32xf32> -> vector<2x32xf32>
    %cst_71 = arith.constant dense<0.000000e+00> : vector<2x32xf32>
    %245 = tpu.matmul %242, %4, %cst_71 {dimension_numbers = #tpu.dot_dimension_numbers<[1], [0], [0], [1], [0, 0, 1, 1], [], []>} : vector<2x32xf32>, vector<32x32xf32>, vector<2x32xf32> -> vector<2x32xf32>
    %246 = vector.broadcast %5 : vector<1x32xf32> to vector<2x32xf32>
    %247 = arith.addf %245, %246 : vector<2x32xf32>
    %248 = vector.extract_strided_slice %11 {offsets = [0, 7, 0], sizes = [2, 1, 32], strides = [1, 1, 1]} : vector<2x8x32xf32> to vector<2x1x32xf32>
    %249 = vector.shape_cast %248 : vector<2x1x32xf32> to vector<2x32xf32>
    %250 = arith.addf %249, %243 : vector<2x32xf32>
    %251 = arith.negf %250 : vector<2x32xf32>
    %252 = math.exp %251 : vector<2x32xf32>
    %cst_72 = arith.constant 1.000000e+00 : f32
    %253 = vector.broadcast %cst_72 : f32 to vector<2x32xf32>
    %254 = arith.addf %253, %252 : vector<2x32xf32>
    %255 = arith.divf %253, %254 : vector<2x32xf32>
    %256 = vector.extract_strided_slice %17 {offsets = [0, 7, 0], sizes = [2, 1, 32], strides = [1, 1, 1]} : vector<2x8x32xf32> to vector<2x1x32xf32>
    %257 = vector.shape_cast %256 : vector<2x1x32xf32> to vector<2x32xf32>
    %258 = arith.addf %257, %244 : vector<2x32xf32>
    %259 = arith.negf %258 : vector<2x32xf32>
    %260 = math.exp %259 : vector<2x32xf32>
    %cst_73 = arith.constant 1.000000e+00 : f32
    %261 = vector.broadcast %cst_73 : f32 to vector<2x32xf32>
    %262 = arith.addf %261, %260 : vector<2x32xf32>
    %263 = arith.divf %261, %262 : vector<2x32xf32>
    %264 = vector.extract_strided_slice %23 {offsets = [0, 7, 0], sizes = [2, 1, 32], strides = [1, 1, 1]} : vector<2x8x32xf32> to vector<2x1x32xf32>
    %265 = vector.shape_cast %264 : vector<2x1x32xf32> to vector<2x32xf32>
    %266 = arith.mulf %255, %247 : vector<2x32xf32>
    %267 = arith.addf %265, %266 : vector<2x32xf32>
    %268 = math.tanh %267 : vector<2x32xf32>
    %cst_74 = arith.constant 1.000000e+00 : f32
    %269 = vector.broadcast %cst_74 : f32 to vector<2x32xf32>
    %270 = arith.subf %269, %263 : vector<2x32xf32>
    %271 = arith.mulf %270, %268 : vector<2x32xf32>
    %272 = arith.mulf %263, %242 : vector<2x32xf32>
    %273 = arith.addf %271, %272 : vector<2x32xf32>
    %c0_75 = arith.constant 0 : index
    %c0_76 = arith.constant 0 : index
    %c0_77 = arith.constant 0 : index
    %274 = vector.load %arg25[%c0_75, %c0_76, %c0_77] : memref<2x2x32xf32, #tpu.memory_space<vmem>>, vector<1x2x32xf32>
    %275 = vector.shape_cast %274 : vector<1x2x32xf32> to vector<2x32xf32>
    %276 = vector.shape_cast %273 : vector<2x32xf32> to vector<1x2x32xf32>
    tpu.vector_store %arg25[%c0_75, %c0_76, %c0_77], %276 {strides = array<i32>} : memref<2x2x32xf32, #tpu.memory_space<vmem>>, vector<1x2x32xf32>,
    %277 = vector.shape_cast %56 : vector<2x32xf32> to vector<2x1x32xf32>
    %278 = vector.shape_cast %87 : vector<2x32xf32> to vector<2x1x32xf32>
    %279 = vector.shape_cast %118 : vector<2x32xf32> to vector<2x1x32xf32>
    %280 = vector.shape_cast %149 : vector<2x32xf32> to vector<2x1x32xf32>
    %281 = vector.shape_cast %180 : vector<2x32xf32> to vector<2x1x32xf32>
    %282 = vector.shape_cast %211 : vector<2x32xf32> to vector<2x1x32xf32>
    %283 = vector.shape_cast %242 : vector<2x32xf32> to vector<2x1x32xf32>
    %284 = vector.shape_cast %273 : vector<2x32xf32> to vector<2x1x32xf32>
    %285 = tpu.concatenate %277, %278, %279, %280, %281, %282, %283, %284 in 1 : vector<2x1x32xf32>, vector<2x1x32xf32>, vector<2x1x32xf32>, vector<2x1x32xf32>, vector<2x1x32xf32>, vector<2x1x32xf32>, vector<2x1x32xf32>, vector<2x1x32xf32> -> vector<2x8x32xf32>
    %286 = vector.shape_cast %285 : vector<2x8x32xf32> to vector<16x32xf32>
    %c0_78 = arith.constant 0 : index
    %c0_79 = arith.constant 0 : index
    %287 = vector.load %arg15[%c0_78, %c0_79] : memref<32x32xf32, #tpu.memory_space<vmem>>, vector<32x32xf32>
    %c0_80 = arith.constant 0 : index
    %c0_81 = arith.constant 0 : index
    %288 = vector.load %arg16[%c0_80, %c0_81] : memref<32x32xf32, #tpu.memory_space<vmem>>, vector<32x32xf32>
    %c0_82 = arith.constant 0 : index
    %c0_83 = arith.constant 0 : index
    %289 = vector.load %arg17[%c0_82, %c0_83] : memref<32x32xf32, #tpu.memory_space<vmem>>, vector<32x32xf32>
    %c0_84 = arith.constant 0 : index
    %c0_85 = arith.constant 0 : index
    %290 = vector.load %arg21[%c0_84, %c0_85] : memref<1x32xf32, #tpu.memory_space<vmem>>, vector<1x32xf32>
    %c0_86 = arith.constant 0 : index
    %c0_87 = arith.constant 0 : index
    %291 = vector.load %arg12[%c0_86, %c0_87] : memref<32x32xf32, #tpu.memory_space<vmem>>, vector<32x32xf32>
    %cst_88 = arith.constant dense<0.000000e+00> : vector<16x32xf32>
    %292 = tpu.matmul %286, %291, %cst_88 {dimension_numbers = #tpu.dot_dimension_numbers<[1], [0], [0], [1], [0, 0, 1, 1], [], []>} : vector<16x32xf32>, vector<32x32xf32>, vector<16x32xf32> -> vector<16x32xf32>
    %c0_89 = arith.constant 0 : index
    %c0_90 = arith.constant 0 : index
    %293 = vector.load %arg18[%c0_89, %c0_90] : memref<1x32xf32, #tpu.memory_space<vmem>>, vector<1x32xf32>
    %294 = vector.broadcast %293 : vector<1x32xf32> to vector<16x32xf32>
    %295 = arith.addf %292, %294 : vector<16x32xf32>
    %296 = vector.shape_cast %295 : vector<16x32xf32> to vector<2x8x32xf32>
    %c0_91 = arith.constant 0 : index
    %c0_92 = arith.constant 0 : index
    %297 = vector.load %arg13[%c0_91, %c0_92] : memref<32x32xf32, #tpu.memory_space<vmem>>, vector<32x32xf32>
    %cst_93 = arith.constant dense<0.000000e+00> : vector<16x32xf32>
    %298 = tpu.matmul %286, %297, %cst_93 {dimension_numbers = #tpu.dot_dimension_numbers<[1], [0], [0], [1], [0, 0, 1, 1], [], []>} : vector<16x32xf32>, vector<32x32xf32>, vector<16x32xf32> -> vector<16x32xf32>
    %c0_94 = arith.constant 0 : index
    %c0_95 = arith.constant 0 : index
    %299 = vector.load %arg19[%c0_94, %c0_95] : memref<1x32xf32, #tpu.memory_space<vmem>>, vector<1x32xf32>
    %300 = vector.broadcast %299 : vector<1x32xf32> to vector<16x32xf32>
    %301 = arith.addf %298, %300 : vector<16x32xf32>
    %302 = vector.shape_cast %301 : vector<16x32xf32> to vector<2x8x32xf32>
    %c0_96 = arith.constant 0 : index
    %c0_97 = arith.constant 0 : index
    %303 = vector.load %arg14[%c0_96, %c0_97] : memref<32x32xf32, #tpu.memory_space<vmem>>, vector<32x32xf32>
    %cst_98 = arith.constant dense<0.000000e+00> : vector<16x32xf32>
    %304 = tpu.matmul %286, %303, %cst_98 {dimension_numbers = #tpu.dot_dimension_numbers<[1], [0], [0], [1], [0, 0, 1, 1], [], []>} : vector<16x32xf32>, vector<32x32xf32>, vector<16x32xf32> -> vector<16x32xf32>
    %c0_99 = arith.constant 0 : index
    %c0_100 = arith.constant 0 : index
    %305 = vector.load %arg20[%c0_99, %c0_100] : memref<1x32xf32, #tpu.memory_space<vmem>>, vector<1x32xf32>
    %306 = vector.broadcast %305 : vector<1x32xf32> to vector<16x32xf32>
    %307 = arith.addf %304, %306 : vector<16x32xf32>
    %308 = vector.shape_cast %307 : vector<16x32xf32> to vector<2x8x32xf32>
    %c1 = arith.constant 1 : index
    %c0_101 = arith.constant 0 : index
    %c0_102 = arith.constant 0 : index
    %309 = vector.load %arg1[%c1, %c0_101, %c0_102] : memref<2x2x32xf32, #tpu.memory_space<vmem>>, vector<1x2x32xf32>
    %310 = vector.shape_cast %309 : vector<1x2x32xf32> to vector<2x32xf32>
    %cst_103 = arith.constant dense<0.000000e+00> : vector<2x32xf32>
    %311 = tpu.matmul %310, %287, %cst_103 {dimension_numbers = #tpu.dot_dimension_numbers<[1], [0], [0], [1], [0, 0, 1, 1], [], []>} : vector<2x32xf32>, vector<32x32xf32>, vector<2x32xf32> -> vector<2x32xf32>
    %cst_104 = arith.constant dense<0.000000e+00> : vector<2x32xf32>
    %312 = tpu.matmul %310, %288, %cst_104 {dimension_numbers = #tpu.dot_dimension_numbers<[1], [0], [0], [1], [0, 0, 1, 1], [], []>} : vector<2x32xf32>, vector<32x32xf32>, vector<2x32xf32> -> vector<2x32xf32>
    %cst_105 = arith.constant dense<0.000000e+00> : vector<2x32xf32>
    %313 = tpu.matmul %310, %289, %cst_105 {dimension_numbers = #tpu.dot_dimension_numbers<[1], [0], [0], [1], [0, 0, 1, 1], [], []>} : vector<2x32xf32>, vector<32x32xf32>, vector<2x32xf32> -> vector<2x32xf32>
    %314 = vector.broadcast %290 : vector<1x32xf32> to vector<2x32xf32>
    %315 = arith.addf %313, %314 : vector<2x32xf32>
    %316 = vector.extract_strided_slice %296 {offsets = [0, 0, 0], sizes = [2, 1, 32], strides = [1, 1, 1]} : vector<2x8x32xf32> to vector<2x1x32xf32>
    %317 = vector.shape_cast %316 : vector<2x1x32xf32> to vector<2x32xf32>
    %318 = arith.addf %317, %311 : vector<2x32xf32>
    %319 = arith.negf %318 : vector<2x32xf32>
    %320 = math.exp %319 : vector<2x32xf32>
    %cst_106 = arith.constant 1.000000e+00 : f32
    %321 = vector.broadcast %cst_106 : f32 to vector<2x32xf32>
    %322 = arith.addf %321, %320 : vector<2x32xf32>
    %323 = arith.divf %321, %322 : vector<2x32xf32>
    %324 = vector.extract_strided_slice %302 {offsets = [0, 0, 0], sizes = [2, 1, 32], strides = [1, 1, 1]} : vector<2x8x32xf32> to vector<2x1x32xf32>
    %325 = vector.shape_cast %324 : vector<2x1x32xf32> to vector<2x32xf32>
    %326 = arith.addf %325, %312 : vector<2x32xf32>
    %327 = arith.negf %326 : vector<2x32xf32>
    %328 = math.exp %327 : vector<2x32xf32>
    %cst_107 = arith.constant 1.000000e+00 : f32
    %329 = vector.broadcast %cst_107 : f32 to vector<2x32xf32>
    %330 = arith.addf %329, %328 : vector<2x32xf32>
    %331 = arith.divf %329, %330 : vector<2x32xf32>
    %332 = vector.extract_strided_slice %308 {offsets = [0, 0, 0], sizes = [2, 1, 32], strides = [1, 1, 1]} : vector<2x8x32xf32> to vector<2x1x32xf32>
    %333 = vector.shape_cast %332 : vector<2x1x32xf32> to vector<2x32xf32>
    %334 = arith.mulf %323, %315 : vector<2x32xf32>
    %335 = arith.addf %333, %334 : vector<2x32xf32>
    %336 = math.tanh %335 : vector<2x32xf32>
    %cst_108 = arith.constant 1.000000e+00 : f32
    %337 = vector.broadcast %cst_108 : f32 to vector<2x32xf32>
    %338 = arith.subf %337, %331 : vector<2x32xf32>
    %339 = arith.mulf %338, %336 : vector<2x32xf32>
    %340 = arith.mulf %331, %310 : vector<2x32xf32>
    %341 = arith.addf %339, %340 : vector<2x32xf32>
    %cst_109 = arith.constant dense<0.000000e+00> : vector<2x32xf32>
    %342 = tpu.matmul %341, %287, %cst_109 {dimension_numbers = #tpu.dot_dimension_numbers<[1], [0], [0], [1], [0, 0, 1, 1], [], []>} : vector<2x32xf32>, vector<32x32xf32>, vector<2x32xf32> -> vector<2x32xf32>
    %cst_110 = arith.constant dense<0.000000e+00> : vector<2x32xf32>
    %343 = tpu.matmul %341, %288, %cst_110 {dimension_numbers = #tpu.dot_dimension_numbers<[1], [0], [0], [1], [0, 0, 1, 1], [], []>} : vector<2x32xf32>, vector<32x32xf32>, vector<2x32xf32> -> vector<2x32xf32>
    %cst_111 = arith.constant dense<0.000000e+00> : vector<2x32xf32>
    %344 = tpu.matmul %341, %289, %cst_111 {dimension_numbers = #tpu.dot_dimension_numbers<[1], [0], [0], [1], [0, 0, 1, 1], [], []>} : vector<2x32xf32>, vector<32x32xf32>, vector<2x32xf32> -> vector<2x32xf32>
    %345 = vector.broadcast %290 : vector<1x32xf32> to vector<2x32xf32>
    %346 = arith.addf %344, %345 : vector<2x32xf32>
    %347 = vector.extract_strided_slice %296 {offsets = [0, 1, 0], sizes = [2, 1, 32], strides = [1, 1, 1]} : vector<2x8x32xf32> to vector<2x1x32xf32>
    %348 = vector.shape_cast %347 : vector<2x1x32xf32> to vector<2x32xf32>
    %349 = arith.addf %348, %342 : vector<2x32xf32>
    %350 = arith.negf %349 : vector<2x32xf32>
    %351 = math.exp %350 : vector<2x32xf32>
    %cst_112 = arith.constant 1.000000e+00 : f32
    %352 = vector.broadcast %cst_112 : f32 to vector<2x32xf32>
    %353 = arith.addf %352, %351 : vector<2x32xf32>
    %354 = arith.divf %352, %353 : vector<2x32xf32>
    %355 = vector.extract_strided_slice %302 {offsets = [0, 1, 0], sizes = [2, 1, 32], strides = [1, 1, 1]} : vector<2x8x32xf32> to vector<2x1x32xf32>
    %356 = vector.shape_cast %355 : vector<2x1x32xf32> to vector<2x32xf32>
    %357 = arith.addf %356, %343 : vector<2x32xf32>
    %358 = arith.negf %357 : vector<2x32xf32>
    %359 = math.exp %358 : vector<2x32xf32>
    %cst_113 = arith.constant 1.000000e+00 : f32
    %360 = vector.broadcast %cst_113 : f32 to vector<2x32xf32>
    %361 = arith.addf %360, %359 : vector<2x32xf32>
    %362 = arith.divf %360, %361 : vector<2x32xf32>
    %363 = vector.extract_strided_slice %308 {offsets = [0, 1, 0], sizes = [2, 1, 32], strides = [1, 1, 1]} : vector<2x8x32xf32> to vector<2x1x32xf32>
    %364 = vector.shape_cast %363 : vector<2x1x32xf32> to vector<2x32xf32>
    %365 = arith.mulf %354, %346 : vector<2x32xf32>
    %366 = arith.addf %364, %365 : vector<2x32xf32>
    %367 = math.tanh %366 : vector<2x32xf32>
    %cst_114 = arith.constant 1.000000e+00 : f32
    %368 = vector.broadcast %cst_114 : f32 to vector<2x32xf32>
    %369 = arith.subf %368, %362 : vector<2x32xf32>
    %370 = arith.mulf %369, %367 : vector<2x32xf32>
    %371 = arith.mulf %362, %341 : vector<2x32xf32>
    %372 = arith.addf %370, %371 : vector<2x32xf32>
    %cst_115 = arith.constant dense<0.000000e+00> : vector<2x32xf32>
    %373 = tpu.matmul %372, %287, %cst_115 {dimension_numbers = #tpu.dot_dimension_numbers<[1], [0], [0], [1], [0, 0, 1, 1], [], []>} : vector<2x32xf32>, vector<32x32xf32>, vector<2x32xf32> -> vector<2x32xf32>
    %cst_116 = arith.constant dense<0.000000e+00> : vector<2x32xf32>
    %374 = tpu.matmul %372, %288, %cst_116 {dimension_numbers = #tpu.dot_dimension_numbers<[1], [0], [0], [1], [0, 0, 1, 1], [], []>} : vector<2x32xf32>, vector<32x32xf32>, vector<2x32xf32> -> vector<2x32xf32>
    %cst_117 = arith.constant dense<0.000000e+00> : vector<2x32xf32>
    %375 = tpu.matmul %372, %289, %cst_117 {dimension_numbers = #tpu.dot_dimension_numbers<[1], [0], [0], [1], [0, 0, 1, 1], [], []>} : vector<2x32xf32>, vector<32x32xf32>, vector<2x32xf32> -> vector<2x32xf32>
    %376 = vector.broadcast %290 : vector<1x32xf32> to vector<2x32xf32>
    %377 = arith.addf %375, %376 : vector<2x32xf32>
    %378 = vector.extract_strided_slice %296 {offsets = [0, 2, 0], sizes = [2, 1, 32], strides = [1, 1, 1]} : vector<2x8x32xf32> to vector<2x1x32xf32>
    %379 = vector.shape_cast %378 : vector<2x1x32xf32> to vector<2x32xf32>
    %380 = arith.addf %379, %373 : vector<2x32xf32>
    %381 = arith.negf %380 : vector<2x32xf32>
    %382 = math.exp %381 : vector<2x32xf32>
    %cst_118 = arith.constant 1.000000e+00 : f32
    %383 = vector.broadcast %cst_118 : f32 to vector<2x32xf32>
    %384 = arith.addf %383, %382 : vector<2x32xf32>
    %385 = arith.divf %383, %384 : vector<2x32xf32>
    %386 = vector.extract_strided_slice %302 {offsets = [0, 2, 0], sizes = [2, 1, 32], strides = [1, 1, 1]} : vector<2x8x32xf32> to vector<2x1x32xf32>
    %387 = vector.shape_cast %386 : vector<2x1x32xf32> to vector<2x32xf32>
    %388 = arith.addf %387, %374 : vector<2x32xf32>
    %389 = arith.negf %388 : vector<2x32xf32>
    %390 = math.exp %389 : vector<2x32xf32>
    %cst_119 = arith.constant 1.000000e+00 : f32
    %391 = vector.broadcast %cst_119 : f32 to vector<2x32xf32>
    %392 = arith.addf %391, %390 : vector<2x32xf32>
    %393 = arith.divf %391, %392 : vector<2x32xf32>
    %394 = vector.extract_strided_slice %308 {offsets = [0, 2, 0], sizes = [2, 1, 32], strides = [1, 1, 1]} : vector<2x8x32xf32> to vector<2x1x32xf32>
    %395 = vector.shape_cast %394 : vector<2x1x32xf32> to vector<2x32xf32>
    %396 = arith.mulf %385, %377 : vector<2x32xf32>
    %397 = arith.addf %395, %396 : vector<2x32xf32>
    %398 = math.tanh %397 : vector<2x32xf32>
    %cst_120 = arith.constant 1.000000e+00 : f32
    %399 = vector.broadcast %cst_120 : f32 to vector<2x32xf32>
    %400 = arith.subf %399, %393 : vector<2x32xf32>
    %401 = arith.mulf %400, %398 : vector<2x32xf32>
    %402 = arith.mulf %393, %372 : vector<2x32xf32>
    %403 = arith.addf %401, %402 : vector<2x32xf32>
    %cst_121 = arith.constant dense<0.000000e+00> : vector<2x32xf32>
    %404 = tpu.matmul %403, %287, %cst_121 {dimension_numbers = #tpu.dot_dimension_numbers<[1], [0], [0], [1], [0, 0, 1, 1], [], []>} : vector<2x32xf32>, vector<32x32xf32>, vector<2x32xf32> -> vector<2x32xf32>
    %cst_122 = arith.constant dense<0.000000e+00> : vector<2x32xf32>
    %405 = tpu.matmul %403, %288, %cst_122 {dimension_numbers = #tpu.dot_dimension_numbers<[1], [0], [0], [1], [0, 0, 1, 1], [], []>} : vector<2x32xf32>, vector<32x32xf32>, vector<2x32xf32> -> vector<2x32xf32>
    %cst_123 = arith.constant dense<0.000000e+00> : vector<2x32xf32>
    %406 = tpu.matmul %403, %289, %cst_123 {dimension_numbers = #tpu.dot_dimension_numbers<[1], [0], [0], [1], [0, 0, 1, 1], [], []>} : vector<2x32xf32>, vector<32x32xf32>, vector<2x32xf32> -> vector<2x32xf32>
    %407 = vector.broadcast %290 : vector<1x32xf32> to vector<2x32xf32>
    %408 = arith.addf %406, %407 : vector<2x32xf32>
    %409 = vector.extract_strided_slice %296 {offsets = [0, 3, 0], sizes = [2, 1, 32], strides = [1, 1, 1]} : vector<2x8x32xf32> to vector<2x1x32xf32>
    %410 = vector.shape_cast %409 : vector<2x1x32xf32> to vector<2x32xf32>
    %411 = arith.addf %410, %404 : vector<2x32xf32>
    %412 = arith.negf %411 : vector<2x32xf32>
    %413 = math.exp %412 : vector<2x32xf32>
    %cst_124 = arith.constant 1.000000e+00 : f32
    %414 = vector.broadcast %cst_124 : f32 to vector<2x32xf32>
    %415 = arith.addf %414, %413 : vector<2x32xf32>
    %416 = arith.divf %414, %415 : vector<2x32xf32>
    %417 = vector.extract_strided_slice %302 {offsets = [0, 3, 0], sizes = [2, 1, 32], strides = [1, 1, 1]} : vector<2x8x32xf32> to vector<2x1x32xf32>
    %418 = vector.shape_cast %417 : vector<2x1x32xf32> to vector<2x32xf32>
    %419 = arith.addf %418, %405 : vector<2x32xf32>
    %420 = arith.negf %419 : vector<2x32xf32>
    %421 = math.exp %420 : vector<2x32xf32>
    %cst_125 = arith.constant 1.000000e+00 : f32
    %422 = vector.broadcast %cst_125 : f32 to vector<2x32xf32>
    %423 = arith.addf %422, %421 : vector<2x32xf32>
    %424 = arith.divf %422, %423 : vector<2x32xf32>
    %425 = vector.extract_strided_slice %308 {offsets = [0, 3, 0], sizes = [2, 1, 32], strides = [1, 1, 1]} : vector<2x8x32xf32> to vector<2x1x32xf32>
    %426 = vector.shape_cast %425 : vector<2x1x32xf32> to vector<2x32xf32>
    %427 = arith.mulf %416, %408 : vector<2x32xf32>
    %428 = arith.addf %426, %427 : vector<2x32xf32>
    %429 = math.tanh %428 : vector<2x32xf32>
    %cst_126 = arith.constant 1.000000e+00 : f32
    %430 = vector.broadcast %cst_126 : f32 to vector<2x32xf32>
    %431 = arith.subf %430, %424 : vector<2x32xf32>
    %432 = arith.mulf %431, %429 : vector<2x32xf32>
    %433 = arith.mulf %424, %403 : vector<2x32xf32>
    %434 = arith.addf %432, %433 : vector<2x32xf32>
    %cst_127 = arith.constant dense<0.000000e+00> : vector<2x32xf32>
    %435 = tpu.matmul %434, %287, %cst_127 {dimension_numbers = #tpu.dot_dimension_numbers<[1], [0], [0], [1], [0, 0, 1, 1], [], []>} : vector<2x32xf32>, vector<32x32xf32>, vector<2x32xf32> -> vector<2x32xf32>
    %cst_128 = arith.constant dense<0.000000e+00> : vector<2x32xf32>
    %436 = tpu.matmul %434, %288, %cst_128 {dimension_numbers = #tpu.dot_dimension_numbers<[1], [0], [0], [1], [0, 0, 1, 1], [], []>} : vector<2x32xf32>, vector<32x32xf32>, vector<2x32xf32> -> vector<2x32xf32>
    %cst_129 = arith.constant dense<0.000000e+00> : vector<2x32xf32>
    %437 = tpu.matmul %434, %289, %cst_129 {dimension_numbers = #tpu.dot_dimension_numbers<[1], [0], [0], [1], [0, 0, 1, 1], [], []>} : vector<2x32xf32>, vector<32x32xf32>, vector<2x32xf32> -> vector<2x32xf32>
    %438 = vector.broadcast %290 : vector<1x32xf32> to vector<2x32xf32>
    %439 = arith.addf %437, %438 : vector<2x32xf32>
    %440 = vector.extract_strided_slice %296 {offsets = [0, 4, 0], sizes = [2, 1, 32], strides = [1, 1, 1]} : vector<2x8x32xf32> to vector<2x1x32xf32>
    %441 = vector.shape_cast %440 : vector<2x1x32xf32> to vector<2x32xf32>
    %442 = arith.addf %441, %435 : vector<2x32xf32>
    %443 = arith.negf %442 : vector<2x32xf32>
    %444 = math.exp %443 : vector<2x32xf32>
    %cst_130 = arith.constant 1.000000e+00 : f32
    %445 = vector.broadcast %cst_130 : f32 to vector<2x32xf32>
    %446 = arith.addf %445, %444 : vector<2x32xf32>
    %447 = arith.divf %445, %446 : vector<2x32xf32>
    %448 = vector.extract_strided_slice %302 {offsets = [0, 4, 0], sizes = [2, 1, 32], strides = [1, 1, 1]} : vector<2x8x32xf32> to vector<2x1x32xf32>
    %449 = vector.shape_cast %448 : vector<2x1x32xf32> to vector<2x32xf32>
    %450 = arith.addf %449, %436 : vector<2x32xf32>
    %451 = arith.negf %450 : vector<2x32xf32>
    %452 = math.exp %451 : vector<2x32xf32>
    %cst_131 = arith.constant 1.000000e+00 : f32
    %453 = vector.broadcast %cst_131 : f32 to vector<2x32xf32>
    %454 = arith.addf %453, %452 : vector<2x32xf32>
    %455 = arith.divf %453, %454 : vector<2x32xf32>
    %456 = vector.extract_strided_slice %308 {offsets = [0, 4, 0], sizes = [2, 1, 32], strides = [1, 1, 1]} : vector<2x8x32xf32> to vector<2x1x32xf32>
    %457 = vector.shape_cast %456 : vector<2x1x32xf32> to vector<2x32xf32>
    %458 = arith.mulf %447, %439 : vector<2x32xf32>
    %459 = arith.addf %457, %458 : vector<2x32xf32>
    %460 = math.tanh %459 : vector<2x32xf32>
    %cst_132 = arith.constant 1.000000e+00 : f32
    %461 = vector.broadcast %cst_132 : f32 to vector<2x32xf32>
    %462 = arith.subf %461, %455 : vector<2x32xf32>
    %463 = arith.mulf %462, %460 : vector<2x32xf32>
    %464 = arith.mulf %455, %434 : vector<2x32xf32>
    %465 = arith.addf %463, %464 : vector<2x32xf32>
    %cst_133 = arith.constant dense<0.000000e+00> : vector<2x32xf32>
    %466 = tpu.matmul %465, %287, %cst_133 {dimension_numbers = #tpu.dot_dimension_numbers<[1], [0], [0], [1], [0, 0, 1, 1], [], []>} : vector<2x32xf32>, vector<32x32xf32>, vector<2x32xf32> -> vector<2x32xf32>
    %cst_134 = arith.constant dense<0.000000e+00> : vector<2x32xf32>
    %467 = tpu.matmul %465, %288, %cst_134 {dimension_numbers = #tpu.dot_dimension_numbers<[1], [0], [0], [1], [0, 0, 1, 1], [], []>} : vector<2x32xf32>, vector<32x32xf32>, vector<2x32xf32> -> vector<2x32xf32>
    %cst_135 = arith.constant dense<0.000000e+00> : vector<2x32xf32>
    %468 = tpu.matmul %465, %289, %cst_135 {dimension_numbers = #tpu.dot_dimension_numbers<[1], [0], [0], [1], [0, 0, 1, 1], [], []>} : vector<2x32xf32>, vector<32x32xf32>, vector<2x32xf32> -> vector<2x32xf32>
    %469 = vector.broadcast %290 : vector<1x32xf32> to vector<2x32xf32>
    %470 = arith.addf %468, %469 : vector<2x32xf32>
    %471 = vector.extract_strided_slice %296 {offsets = [0, 5, 0], sizes = [2, 1, 32], strides = [1, 1, 1]} : vector<2x8x32xf32> to vector<2x1x32xf32>
    %472 = vector.shape_cast %471 : vector<2x1x32xf32> to vector<2x32xf32>
    %473 = arith.addf %472, %466 : vector<2x32xf32>
    %474 = arith.negf %473 : vector<2x32xf32>
    %475 = math.exp %474 : vector<2x32xf32>
    %cst_136 = arith.constant 1.000000e+00 : f32
    %476 = vector.broadcast %cst_136 : f32 to vector<2x32xf32>
    %477 = arith.addf %476, %475 : vector<2x32xf32>
    %478 = arith.divf %476, %477 : vector<2x32xf32>
    %479 = vector.extract_strided_slice %302 {offsets = [0, 5, 0], sizes = [2, 1, 32], strides = [1, 1, 1]} : vector<2x8x32xf32> to vector<2x1x32xf32>
    %480 = vector.shape_cast %479 : vector<2x1x32xf32> to vector<2x32xf32>
    %481 = arith.addf %480, %467 : vector<2x32xf32>
    %482 = arith.negf %481 : vector<2x32xf32>
    %483 = math.exp %482 : vector<2x32xf32>
    %cst_137 = arith.constant 1.000000e+00 : f32
    %484 = vector.broadcast %cst_137 : f32 to vector<2x32xf32>
    %485 = arith.addf %484, %483 : vector<2x32xf32>
    %486 = arith.divf %484, %485 : vector<2x32xf32>
    %487 = vector.extract_strided_slice %308 {offsets = [0, 5, 0], sizes = [2, 1, 32], strides = [1, 1, 1]} : vector<2x8x32xf32> to vector<2x1x32xf32>
    %488 = vector.shape_cast %487 : vector<2x1x32xf32> to vector<2x32xf32>
    %489 = arith.mulf %478, %470 : vector<2x32xf32>
    %490 = arith.addf %488, %489 : vector<2x32xf32>
    %491 = math.tanh %490 : vector<2x32xf32>
    %cst_138 = arith.constant 1.000000e+00 : f32
    %492 = vector.broadcast %cst_138 : f32 to vector<2x32xf32>
    %493 = arith.subf %492, %486 : vector<2x32xf32>
    %494 = arith.mulf %493, %491 : vector<2x32xf32>
    %495 = arith.mulf %486, %465 : vector<2x32xf32>
    %496 = arith.addf %494, %495 : vector<2x32xf32>
    %cst_139 = arith.constant dense<0.000000e+00> : vector<2x32xf32>
    %497 = tpu.matmul %496, %287, %cst_139 {dimension_numbers = #tpu.dot_dimension_numbers<[1], [0], [0], [1], [0, 0, 1, 1], [], []>} : vector<2x32xf32>, vector<32x32xf32>, vector<2x32xf32> -> vector<2x32xf32>
    %cst_140 = arith.constant dense<0.000000e+00> : vector<2x32xf32>
    %498 = tpu.matmul %496, %288, %cst_140 {dimension_numbers = #tpu.dot_dimension_numbers<[1], [0], [0], [1], [0, 0, 1, 1], [], []>} : vector<2x32xf32>, vector<32x32xf32>, vector<2x32xf32> -> vector<2x32xf32>
    %cst_141 = arith.constant dense<0.000000e+00> : vector<2x32xf32>
    %499 = tpu.matmul %496, %289, %cst_141 {dimension_numbers = #tpu.dot_dimension_numbers<[1], [0], [0], [1], [0, 0, 1, 1], [], []>} : vector<2x32xf32>, vector<32x32xf32>, vector<2x32xf32> -> vector<2x32xf32>
    %500 = vector.broadcast %290 : vector<1x32xf32> to vector<2x32xf32>
    %501 = arith.addf %499, %500 : vector<2x32xf32>
    %502 = vector.extract_strided_slice %296 {offsets = [0, 6, 0], sizes = [2, 1, 32], strides = [1, 1, 1]} : vector<2x8x32xf32> to vector<2x1x32xf32>
    %503 = vector.shape_cast %502 : vector<2x1x32xf32> to vector<2x32xf32>
    %504 = arith.addf %503, %497 : vector<2x32xf32>
    %505 = arith.negf %504 : vector<2x32xf32>
    %506 = math.exp %505 : vector<2x32xf32>
    %cst_142 = arith.constant 1.000000e+00 : f32
    %507 = vector.broadcast %cst_142 : f32 to vector<2x32xf32>
    %508 = arith.addf %507, %506 : vector<2x32xf32>
    %509 = arith.divf %507, %508 : vector<2x32xf32>
    %510 = vector.extract_strided_slice %302 {offsets = [0, 6, 0], sizes = [2, 1, 32], strides = [1, 1, 1]} : vector<2x8x32xf32> to vector<2x1x32xf32>
    %511 = vector.shape_cast %510 : vector<2x1x32xf32> to vector<2x32xf32>
    %512 = arith.addf %511, %498 : vector<2x32xf32>
    %513 = arith.negf %512 : vector<2x32xf32>
    %514 = math.exp %513 : vector<2x32xf32>
    %cst_143 = arith.constant 1.000000e+00 : f32
    %515 = vector.broadcast %cst_143 : f32 to vector<2x32xf32>
    %516 = arith.addf %515, %514 : vector<2x32xf32>
    %517 = arith.divf %515, %516 : vector<2x32xf32>
    %518 = vector.extract_strided_slice %308 {offsets = [0, 6, 0], sizes = [2, 1, 32], strides = [1, 1, 1]} : vector<2x8x32xf32> to vector<2x1x32xf32>
    %519 = vector.shape_cast %518 : vector<2x1x32xf32> to vector<2x32xf32>
    %520 = arith.mulf %509, %501 : vector<2x32xf32>
    %521 = arith.addf %519, %520 : vector<2x32xf32>
    %522 = math.tanh %521 : vector<2x32xf32>
    %cst_144 = arith.constant 1.000000e+00 : f32
    %523 = vector.broadcast %cst_144 : f32 to vector<2x32xf32>
    %524 = arith.subf %523, %517 : vector<2x32xf32>
    %525 = arith.mulf %524, %522 : vector<2x32xf32>
    %526 = arith.mulf %517, %496 : vector<2x32xf32>
    %527 = arith.addf %525, %526 : vector<2x32xf32>
    %cst_145 = arith.constant dense<0.000000e+00> : vector<2x32xf32>
    %528 = tpu.matmul %527, %287, %cst_145 {dimension_numbers = #tpu.dot_dimension_numbers<[1], [0], [0], [1], [0, 0, 1, 1], [], []>} : vector<2x32xf32>, vector<32x32xf32>, vector<2x32xf32> -> vector<2x32xf32>
    %cst_146 = arith.constant dense<0.000000e+00> : vector<2x32xf32>
    %529 = tpu.matmul %527, %288, %cst_146 {dimension_numbers = #tpu.dot_dimension_numbers<[1], [0], [0], [1], [0, 0, 1, 1], [], []>} : vector<2x32xf32>, vector<32x32xf32>, vector<2x32xf32> -> vector<2x32xf32>
    %cst_147 = arith.constant dense<0.000000e+00> : vector<2x32xf32>
    %530 = tpu.matmul %527, %289, %cst_147 {dimension_numbers = #tpu.dot_dimension_numbers<[1], [0], [0], [1], [0, 0, 1, 1], [], []>} : vector<2x32xf32>, vector<32x32xf32>, vector<2x32xf32> -> vector<2x32xf32>
    %531 = vector.broadcast %290 : vector<1x32xf32> to vector<2x32xf32>
    %532 = arith.addf %530, %531 : vector<2x32xf32>
    %533 = vector.extract_strided_slice %296 {offsets = [0, 7, 0], sizes = [2, 1, 32], strides = [1, 1, 1]} : vector<2x8x32xf32> to vector<2x1x32xf32>
    %534 = vector.shape_cast %533 : vector<2x1x32xf32> to vector<2x32xf32>
    %535 = arith.addf %534, %528 : vector<2x32xf32>
    %536 = arith.negf %535 : vector<2x32xf32>
    %537 = math.exp %536 : vector<2x32xf32>
    %cst_148 = arith.constant 1.000000e+00 : f32
    %538 = vector.broadcast %cst_148 : f32 to vector<2x32xf32>
    %539 = arith.addf %538, %537 : vector<2x32xf32>
    %540 = arith.divf %538, %539 : vector<2x32xf32>
    %541 = vector.extract_strided_slice %302 {offsets = [0, 7, 0], sizes = [2, 1, 32], strides = [1, 1, 1]} : vector<2x8x32xf32> to vector<2x1x32xf32>
    %542 = vector.shape_cast %541 : vector<2x1x32xf32> to vector<2x32xf32>
    %543 = arith.addf %542, %529 : vector<2x32xf32>
    %544 = arith.negf %543 : vector<2x32xf32>
    %545 = math.exp %544 : vector<2x32xf32>
    %cst_149 = arith.constant 1.000000e+00 : f32
    %546 = vector.broadcast %cst_149 : f32 to vector<2x32xf32>
    %547 = arith.addf %546, %545 : vector<2x32xf32>
    %548 = arith.divf %546, %547 : vector<2x32xf32>
    %549 = vector.extract_strided_slice %308 {offsets = [0, 7, 0], sizes = [2, 1, 32], strides = [1, 1, 1]} : vector<2x8x32xf32> to vector<2x1x32xf32>
    %550 = vector.shape_cast %549 : vector<2x1x32xf32> to vector<2x32xf32>
    %551 = arith.mulf %540, %532 : vector<2x32xf32>
    %552 = arith.addf %550, %551 : vector<2x32xf32>
    %553 = math.tanh %552 : vector<2x32xf32>
    %cst_150 = arith.constant 1.000000e+00 : f32
    %554 = vector.broadcast %cst_150 : f32 to vector<2x32xf32>
    %555 = arith.subf %554, %548 : vector<2x32xf32>
    %556 = arith.mulf %555, %553 : vector<2x32xf32>
    %557 = arith.mulf %548, %527 : vector<2x32xf32>
    %558 = arith.addf %556, %557 : vector<2x32xf32>
    %c1_151 = arith.constant 1 : index
    %c0_152 = arith.constant 0 : index
    %c0_153 = arith.constant 0 : index
    %559 = vector.load %arg25[%c1_151, %c0_152, %c0_153] : memref<2x2x32xf32, #tpu.memory_space<vmem>>, vector<1x2x32xf32>
    %560 = vector.shape_cast %559 : vector<1x2x32xf32> to vector<2x32xf32>
    %561 = vector.shape_cast %558 : vector<2x32xf32> to vector<1x2x32xf32>
    tpu.vector_store %arg25[%c1_151, %c0_152, %c0_153], %561 {strides = array<i32>} : memref<2x2x32xf32, #tpu.memory_space<vmem>>, vector<1x2x32xf32>,
    %562 = vector.shape_cast %341 : vector<2x32xf32> to vector<2x1x32xf32>
    %563 = vector.shape_cast %372 : vector<2x32xf32> to vector<2x1x32xf32>
    %564 = vector.shape_cast %403 : vector<2x32xf32> to vector<2x1x32xf32>
    %565 = vector.shape_cast %434 : vector<2x32xf32> to vector<2x1x32xf32>
    %566 = vector.shape_cast %465 : vector<2x32xf32> to vector<2x1x32xf32>
    %567 = vector.shape_cast %496 : vector<2x32xf32> to vector<2x1x32xf32>
    %568 = vector.shape_cast %527 : vector<2x32xf32> to vector<2x1x32xf32>
    %569 = vector.shape_cast %558 : vector<2x32xf32> to vector<2x1x32xf32>
    %570 = tpu.concatenate %562, %563, %564, %565, %566, %567, %568, %569 in 1 : vector<2x1x32xf32>, vector<2x1x32xf32>, vector<2x1x32xf32>, vector<2x1x32xf32>, vector<2x1x32xf32>, vector<2x1x32xf32>, vector<2x1x32xf32>, vector<2x1x32xf32> -> vector<2x8x32xf32>
    %571 = vector.shape_cast %570 : vector<2x8x32xf32> to vector<16x32xf32>
    %cst_154 = arith.constant 0.000000e+00 : f32
    %572 = vector.broadcast %cst_154 : f32 to vector<16x32xf32>
    %573 = arith.maximumf %571, %572 : vector<16x32xf32>
    %c0_155 = arith.constant 0 : index
    %c0_156 = arith.constant 0 : index
    %574 = vector.load %arg22[%c0_155, %c0_156] : memref<32x8xf32, #tpu.memory_space<vmem>>, vector<32x8xf32>
    %cst_157 = arith.constant dense<0.000000e+00> : vector<16x8xf32>
    %575 = tpu.matmul %573, %574, %cst_157 {dimension_numbers = #tpu.dot_dimension_numbers<[1], [0], [0], [1], [0, 0, 1, 1], [], []>} : vector<16x32xf32>, vector<32x8xf32>, vector<16x8xf32> -> vector<16x8xf32>
    %c0_158 = arith.constant 0 : index
    %c0_159 = arith.constant 0 : index
    %576 = vector.load %arg23[%c0_158, %c0_159] : memref<1x8xf32, #tpu.memory_space<vmem>>, vector<1x8xf32>
    %577 = vector.broadcast %576 : vector<1x8xf32> to vector<16x8xf32>
    %578 = arith.addf %575, %577 : vector<16x8xf32>
    %579 = vector.shape_cast %578 : vector<16x8xf32> to vector<2x8x8xf32>
    %c0_160 = arith.constant 0 : index
    %c0_161 = arith.constant 0 : index
    %c0_162 = arith.constant 0 : index
    %580 = vector.load %arg24[%c0_160, %c0_161, %c0_162] : memref<2x8x8xf32, #tpu.memory_space<vmem>>, vector<2x8x8xf32>
    tpu.vector_store %arg24[%c0_160, %c0_161, %c0_162], %579 {strides = array<i32>} : memref<2x8x8xf32, #tpu.memory_space<vmem>>, vector<2x8x8xf32>,
    return
  }
}

</mosaic_0001>

<bundles_post_ra>
// kernel: gru_wrapper_forward.1
= control target key start
LH: loop header
LB: loop body
LE: loop exit
PB: predicated region body
PF: predicated region fallthrough
CT: control target
= control target key end

     0   :  { %s8885_s0 = inlined_call_operand.vmem [shape: f32[2,8,16], index: 0, kind: input, shape index: {}]   ;;  %s8886_s1 = inlined_call_operand.vmem [shape: f32[2,2,32], index: 1, kind: input, shape index: {}]   ;;  %s8887_s2 = inlined_call_operand.hbm [shape: f32[16,32], index: 2, kind: input, shape index: {}]   ;;  %s8888_s3 = inlined_call_operand.hbm [shape: f32[16,32], index: 3, kind: input, shape index: {}]   ;;  %s8889_s4 = inlined_call_operand.hbm [shape: f32[16,32], index: 4, kind: input, shape index: {}]   ;;  %s8890_s5 = inlined_call_operand.vmem [shape: f32[32,32], index: 5, kind: input, shape index: {}]   ;;  %s8891_s6 = inlined_call_operand.hbm [shape: f32[32,32], index: 6, kind: input, shape index: {}]   ;;  %s8892_s7 = inlined_call_operand.hbm [shape: f32[32,32], index: 7, kind: input, shape index: {}]   ;;  %s8893_s8 = inlined_call_operand.hbm [shape: f32[1,32], index: 8, kind: input, shape index: {}]   ;;  %s8894_s9 = inlined_call_operand.hbm [shape: f32[1,32], index: 9, kind: input, shape index: {}]   ;;  %s8895_s10 = inlined_call_operand.hbm [shape: f32[1,32], index: 10, kind: input, shape index: {}]   ;;  %s8896_s11 = inlined_call_operand.hbm [shape: f32[1,32], index: 11, kind: input, shape index: {}]   ;;  %s8897_s12 = inlined_call_operand.vmem [shape: f32[32,32], index: 12, kind: input, shape index: {}]   ;;  %s8898_s13 = inlined_call_operand.vmem [shape: f32[32,32], index: 13, kind: input, shape index: {}]   ;;  %s8899_s14 = inlined_call_operand.hbm [shape: f32[32,32], index: 14, kind: input, shape index: {}]   ;;  %s8900_s15 = inlined_call_operand.hbm [shape: f32[32,32], index: 15, kind: input, shape index: {}]   ;;  %s8901_s16 = inlined_call_operand.hbm [shape: f32[32,32], index: 16, kind: input, shape index: {}]   ;;  %s8902_s17 = inlined_call_operand.hbm [shape: f32[32,32], index: 17, kind: input, shape index: {}]   ;;  %s8903_s18 = inlined_call_operand.hbm [shape: f32[1,32], index: 18, kind: input, shape index: {}]   ;;  %s8904_s19 = inlined_call_operand.hbm [shape: f32[1,32], index: 19, kind: input, shape index: {}]   ;;  %s8905_s20 = inlined_call_operand.hbm [shape: f32[1,32], index: 20, kind: input, shape index: {}]   ;;  %s8906_s21 = inlined_call_operand.hbm [shape: f32[1,32], index: 21, kind: input, shape index: {}]   ;;  %s8907_s22 = inlined_call_operand.vmem [shape: f32[32,8], index: 22, kind: input, shape index: {}]   ;;  %s8908_s23 = inlined_call_operand.vmem [shape: f32[1,8], index: 23, kind: input, shape index: {}]   ;;  %s8909_s24 = inlined_call_operand.hbm [shape: f32[2,8,8], index: 24, kind: output, shape index: {0}]   ;;  %s8910_s25 = inlined_call_operand.hbm [shape: f32[2,2,32], index: 25, kind: output, shape index: {1}]  }
   0x1   :  { %8923 = sst [smem:[#allocation43_spill]] %s8885_s0 }
   0x2   :  { %8924 = sst [smem:[#allocation44_spill]] %s8886_s1 }
   0x3   :  { %8925 = sst [smem:[#allocation45_spill]] %s8887_s2 }
   0x4   :  { %8926 = sst [smem:[#allocation46_spill]] %s8888_s3 }
   0x5   :  { %8927 = sst [smem:[#allocation47_spill]] %s8889_s4 }
   0x6   :  { %8928 = sst [smem:[#allocation48_spill]] %s8890_s5 }
   0x7   :  { %8929 = sst [smem:[#allocation49_spill]] %s8891_s6 }
   0x8   :  { %8930 = sst [smem:[#allocation50_spill]] %s8892_s7 }
   0x9   :  { %8931 = sst [smem:[#allocation51_spill]] %s8893_s8 }
   0xa   :  { %8932 = sst [smem:[#allocation52_spill]] %s8894_s9 }
   0xb   :  { %8933 = sst [smem:[#allocation53_spill]] %s8908_s23 }
   0xc   :  { %8934 = sst [smem:[#allocation54_spill]] %s8909_s24 }
   0xd   :  { %8935 = sst [smem:[#allocation55_spill]] %s8910_s25 }
   0xe   :  { %31 = vsyncpa [#allocation3], 0 }
   0xf   :  { %32 = vsyncpa [#allocation6], 0 }
  0x10   :  { %33 = vsyncpa [#allocation9], 0 }
  0x11   :  { %34 = vsyncpa [#allocation12], 0 }
  0x12   :  { %35 = vsyncpa [#allocation15], 0 }
  0x13   :  { %36 = vsyncpa [#allocation18], 0 }
  0x14   :  { %37 = vsyncpa [#allocation21], 0 }
  0x15   :  { %38 = vsyncpa [#allocation24], 0 }
  0x16   :  { %39 = vsyncpa [#allocation27], 0 }
  0x17   :  { %40 = vsyncpa [#allocation4], 0 }
  0x18   :  { %41 = vsyncpa [#allocation31], 0  ;;  %s7598_s29 = smov [#allocation5]   ;;  %s7599_s6 = smov [#allocation8]  }
  0x19   :  { %s63_s2 = sshll.u32 %s7598_s29, 4  ;;  %s89_s30 = sshll.u32 %s7599_s6, 4  ;;  %s64_s2 = int_to_ptr.vmem [resolvable:$true] %s63_s2  ;;  %s7754_s30 = int_to_ptr.vmem [resolvable:$true] %s89_s30 }
  0x1a   :  { %s8936_s26 = sld [smem:[#allocation46_spill]] }
  0x20   :  { %s7158_s1 = scalar_lea.hbm %s8936_s26, 256 }
  0x21   :  { %p7159_p0 = scmp.ne.s32.totalorder %s8936_s26, %s7158_s1  ;;  %p7162_p1 = scmp.lt.u32.totalorder %s7158_s1, %s8936_s26 }
  0x23   :  { %p7164_p2 = pnand %p7162_p1, %p7159_p0 }
  0x25   :  { %7167 = shalt.err (!%p7164_p2)
}
  0x26   :  { %s7168_s9 = scalar_lea.vmem %s64_s2, 256  ;;  %p7173_p4 = scmp.lt.s32.totalorder %s64_s2, %s64_s2 }
  0x27   :  { %p7169_p3 = scmp.ne.s32.totalorder %s64_s2, %s7168_s9  ;;  %p7174_p5 = scmp.lt.s32.totalorder %s7168_s9, %s7168_s9 }
  0x29   :  { %p7175_p6 = por %p7174_p5, %p7173_p4 }
  0x2b   :  { %p7176_p7 = pnand %p7175_p6, %p7169_p3 }
  0x2d   :  { %7179 = shalt.err (!%p7176_p7)
}
  0x2e   :  { %s7600_s5 = smov 128   ;;  %s7601_s0 = smov 8  }
  0x2f   :  { %69 = dma.hbm_to_vmem [thread:$0]  %s8936_s26, 256, %s64_s2, [#allocation6], %s7600_s5, %s7600_s5, %s7601_s0  }
  0x30   :  { %s8937_s1 = sld [smem:[#allocation49_spill]] }
  0x36   :  { %s7180_s8 = scalar_lea.hbm %s8937_s1, 512 }
  0x37   :  { %p7181_p8 = scmp.ne.s32.totalorder %s8937_s1, %s7180_s8  ;;  %p7184_p9 = scmp.lt.u32.totalorder %s7180_s8, %s8937_s1 }
  0x39   :  { %p7186_p10 = pnand %p7184_p9, %p7181_p8 }
  0x3b   :  { %7189 = shalt.err (!%p7186_p10)
}
  0x3c   :  { %s7190_s24 = scalar_lea.vmem %s7754_s30, 512  ;;  %p7195_p12 = scmp.lt.s32.totalorder %s7754_s30, %s7754_s30 }
  0x3d   :  { %p7191_p11 = scmp.ne.s32.totalorder %s7754_s30, %s7190_s24  ;;  %p7196_p13 = scmp.lt.s32.totalorder %s7190_s24, %s7190_s24 }
  0x3f   :  { %p7197_p0 = por %p7196_p13, %p7195_p12 }
  0x41   :  { %p7198_p1 = pnand %p7197_p0, %p7191_p11 }
  0x43   :  { %7201 = shalt.err (!%p7198_p1)
}
  0x44   :  { %95 = dma.hbm_to_vmem [thread:$0]  %s8937_s1, 512, %s7754_s30, [#allocation9], %s7600_s5, %s7600_s5, %s7601_s0  }
  0x45   :  { %s7602_s29 = smov [#allocation11]   ;;  %s7603_s7 = smov [#allocation14]  }
  0x46   :  { %s114_s6 = sshll.u32 %s7602_s29, 4  ;;  %s134_s3 = sshll.u32 %s7603_s7, 4  ;;  %s115_s6 = int_to_ptr.vmem [resolvable:$true] %s114_s6  ;;  %s135_s3 = int_to_ptr.vmem [resolvable:$true] %s134_s3 }
  0x47   :  { %s8938_s24 = sld [smem:[#allocation51_spill]] }
  0x4d   :  { %s7202_s4 = scalar_lea.hbm %s8938_s24, 16 }
  0x4e   :  { %p7203_p2 = scmp.ne.s32.totalorder %s8938_s24, %s7202_s4  ;;  %p7206_p3 = scmp.lt.u32.totalorder %s7202_s4, %s8938_s24 }
  0x50   :  { %p7208_p4 = pnand %p7206_p3, %p7203_p2 }
  0x52   :  { %7211 = shalt.err (!%p7208_p4)
}
  0x53   :  { %s7212_s30 = scalar_lea.vmem %s115_s6, 16  ;;  %s7216_s1 = scalar_lea.vmem %s115_s6, 32 }
  0x54   :  { %p7213_p5 = scmp.ne.s32.totalorder %s115_s6, %s7212_s30  ;;  %p7217_p6 = scmp.lt.s32.totalorder %s115_s6, %s115_s6 }
  0x55   :  { %p7218_p7 = scmp.lt.s32.totalorder %s7216_s1, %s7212_s30 }
  0x57   :  { %p7219_p8 = por %p7218_p7, %p7217_p6 }
  0x59   :  { %p7220_p9 = pnand %p7219_p8, %p7213_p5 }
  0x5b   :  { %7223 = shalt.err (!%p7220_p9)
}
  0x5c   :  { %117 = dma.hbm_to_vmem [thread:$0]  %s8938_s24, 16, %s115_s6, [#allocation12]  }
  0x5d   :  { %s7224_s8 = scalar_lea.hbm %s8895_s10, 16 }
  0x5e   :  { %p7225_p10 = scmp.ne.s32.totalorder %s8895_s10, %s7224_s8  ;;  %p7228_p11 = scmp.lt.u32.totalorder %s7224_s8, %s8895_s10 }
  0x60   :  { %p7230_p12 = pnand %p7228_p11, %p7225_p10 }
  0x62   :  { %7233 = shalt.err (!%p7230_p12)
}
  0x63   :  { %s7234_s28 = scalar_lea.vmem %s135_s3, 16  ;;  %s7238_s9 = scalar_lea.vmem %s135_s3, 32 }
  0x64   :  { %p7235_p13 = scmp.ne.s32.totalorder %s135_s3, %s7234_s28  ;;  %p7239_p0 = scmp.lt.s32.totalorder %s135_s3, %s135_s3 }
  0x65   :  { %p7240_p1 = scmp.lt.s32.totalorder %s7238_s9, %s7234_s28 }
  0x67   :  { %p7241_p2 = por %p7240_p1, %p7239_p0 }
  0x69   :  { %p7242_p3 = pnand %p7241_p2, %p7235_p13 }
  0x6b   :  { %7245 = shalt.err (!%p7242_p3)
}
  0x6c   :  { %137 = dma.hbm_to_vmem [thread:$0]  %s8895_s10, 16, %s135_s3, [#allocation15]  }
  0x6d   :  { %s7604_s30 = smov [#allocation17]   ;;  %s7605_s2 = smov [#allocation20]  }
  0x6e   :  { %s157_s1 = sshll.u32 %s7604_s30, 4  ;;  %s181_s26 = sshll.u32 %s7605_s2, 4  ;;  %s158_s1 = int_to_ptr.vmem [resolvable:$true] %s157_s1  ;;  %s7815_s26 = int_to_ptr.vmem [resolvable:$true] %s181_s26 }
  0x6f   :  { %s7246_s8 = scalar_lea.hbm %s8899_s14, 512 }
  0x70   :  { %p7247_p4 = scmp.ne.s32.totalorder %s8899_s14, %s7246_s8  ;;  %p7250_p5 = scmp.lt.u32.totalorder %s7246_s8, %s8899_s14 }
  0x72   :  { %p7252_p6 = pnand %p7250_p5, %p7247_p4 }
  0x74   :  { %7255 = shalt.err (!%p7252_p6)
}
  0x75   :  { %s7256_s10 = scalar_lea.vmem %s158_s1, 512  ;;  %p7261_p8 = scmp.lt.s32.totalorder %s158_s1, %s158_s1 }
  0x76   :  { %p7257_p7 = scmp.ne.s32.totalorder %s158_s1, %s7256_s10  ;;  %p7262_p9 = scmp.lt.s32.totalorder %s7256_s10, %s7256_s10 }
  0x78   :  { %p7263_p10 = por %p7262_p9, %p7261_p8 }
  0x7a   :  { %p7264_p11 = pnand %p7263_p10, %p7257_p7 }
  0x7c   :  { %7267 = shalt.err (!%p7264_p11)
}
  0x7d   :  { %163 = dma.hbm_to_vmem [thread:$0]  %s8899_s14, 512, %s158_s1, [#allocation18], %s7600_s5, %s7600_s5, %s7601_s0  }
  0x7e   :  { %s7268_s24 = scalar_lea.hbm %s8901_s16, 512 }
  0x7f   :  { %p7269_p12 = scmp.ne.s32.totalorder %s8901_s16, %s7268_s24  ;;  %p7272_p13 = scmp.lt.u32.totalorder %s7268_s24, %s8901_s16 }
  0x81   :  { %p7274_p0 = pnand %p7272_p13, %p7269_p12 }
  0x83   :  { %7277 = shalt.err (!%p7274_p0)
}
  0x84   :  { %s7278_s8 = scalar_lea.vmem %s7815_s26, 512  ;;  %p7283_p2 = scmp.lt.s32.totalorder %s7815_s26, %s7815_s26 }
  0x85   :  { %p7279_p1 = scmp.ne.s32.totalorder %s7815_s26, %s7278_s8  ;;  %p7284_p3 = scmp.lt.s32.totalorder %s7278_s8, %s7278_s8 }
  0x87   :  { %p7285_p4 = por %p7284_p3, %p7283_p2 }
  0x89   :  { %p7286_p5 = pnand %p7285_p4, %p7279_p1 }
  0x8b   :  { %7289 = shalt.err (!%p7286_p5)
}
  0x8c   :  { %187 = dma.hbm_to_vmem [thread:$0]  %s8901_s16, 512, %s7815_s26, [#allocation21], %s7600_s5, %s7600_s5, %s7601_s0  }
  0x8d   :  { %s7606_s23 = smov [#allocation23]   ;;  %s7607_s27 = smov [#allocation26]  }
  0x8e   :  { %s206_s25 = sshll.u32 %s7606_s23, 4  ;;  %s226_s4 = sshll.u32 %s7607_s27, 4  ;;  %s207_s25 = int_to_ptr.vmem [resolvable:$true] %s206_s25  ;;  %s227_s4 = int_to_ptr.vmem [resolvable:$true] %s226_s4 }
  0x8f   :  { %s7290_s28 = scalar_lea.hbm %s8903_s18, 16 }
  0x90   :  { %p7291_p6 = scmp.ne.s32.totalorder %s8903_s18, %s7290_s28  ;;  %p7294_p7 = scmp.lt.u32.totalorder %s7290_s28, %s8903_s18 }
  0x92   :  { %p7296_p8 = pnand %p7294_p7, %p7291_p6 }
  0x94   :  { %7299 = shalt.err (!%p7296_p8)
}
  0x95   :  { %s7300_s16 = scalar_lea.vmem %s207_s25, 16  ;;  %s7304_s26 = scalar_lea.vmem %s207_s25, 32 }
  0x96   :  { %p7301_p9 = scmp.ne.s32.totalorder %s207_s25, %s7300_s16  ;;  %p7305_p10 = scmp.lt.s32.totalorder %s207_s25, %s207_s25 }
  0x97   :  { %p7306_p11 = scmp.lt.s32.totalorder %s7304_s26, %s7300_s16 }
  0x99   :  { %p7307_p12 = por %p7306_p11, %p7305_p10 }
  0x9b   :  { %p7308_p13 = pnand %p7307_p12, %p7301_p9 }
  0x9d   :  { %7311 = shalt.err (!%p7308_p13)
}
  0x9e   :  { %209 = dma.hbm_to_vmem [thread:$0]  %s8903_s18, 16, %s207_s25, [#allocation24]  }
  0x9f   :  { %s7312_s14 = scalar_lea.hbm %s8905_s20, 16 }
  0xa0   :  { %p7313_p0 = scmp.ne.s32.totalorder %s8905_s20, %s7312_s14  ;;  %p7316_p1 = scmp.lt.u32.totalorder %s7312_s14, %s8905_s20 }
  0xa2   :  { %p7318_p2 = pnand %p7316_p1, %p7313_p0 }
  0xa4   :  { %7321 = shalt.err (!%p7318_p2)
}
  0xa5   :  { %s7322_s3 = scalar_lea.vmem %s227_s4, 16  ;;  %s7326_s28 = scalar_lea.vmem %s227_s4, 32 }
  0xa6   :  { %p7323_p3 = scmp.ne.s32.totalorder %s227_s4, %s7322_s3  ;;  %p7327_p4 = scmp.lt.s32.totalorder %s227_s4, %s227_s4 }
  0xa7   :  { %p7328_p5 = scmp.lt.s32.totalorder %s7326_s28, %s7322_s3 }
  0xa9   :  { %p7329_p6 = por %p7328_p5, %p7327_p4 }
  0xab   :  { %p7330_p7 = pnand %p7329_p6, %p7323_p3 }
  0xad   :  { %7333 = shalt.err (!%p7330_p7)
}
  0xae   :  { %229 = dma.hbm_to_vmem [thread:$0]  %s8905_s20, 16, %s227_s4, [#allocation27]  }
  0xaf   :  { %s7608_s9 = smov [#allocation2]   ;;  %s7609_s24 = smov [#allocation7]  }
  0xb0   :  { %s51_s6 = sshll.u32 %s7608_s9, 4  ;;  %s75_s30 = sshll.u32 %s7609_s24, 4  ;;  %s52_s6 = int_to_ptr.vmem [resolvable:$true] %s51_s6  ;;  %s7876_s30 = int_to_ptr.vmem [resolvable:$true] %s75_s30 }
  0xb1   :  { %s8939_s2 = sld [smem:[#allocation45_spill]] }
  0xb7   :  { %s7334_s29 = scalar_lea.hbm %s8939_s2, 256 }
  0xb8   :  { %p7335_p8 = scmp.ne.s32.totalorder %s8939_s2, %s7334_s29  ;;  %p7338_p9 = scmp.lt.u32.totalorder %s7334_s29, %s8939_s2 }
  0xba   :  { %p7340_p10 = pnand %p7338_p9, %p7335_p8 }
  0xbc   :  { %7343 = shalt.err (!%p7340_p10)
}
  0xbd   :  { %s7344_s20 = scalar_lea.vmem %s52_s6, 256  ;;  %p7349_p12 = scmp.lt.s32.totalorder %s52_s6, %s52_s6 }
  0xbe   :  { %p7345_p11 = scmp.ne.s32.totalorder %s52_s6, %s7344_s20  ;;  %p7350_p13 = scmp.lt.s32.totalorder %s7344_s20, %s7344_s20 }
  0xc0   :  { %p7351_p0 = por %p7350_p13, %p7349_p12 }
  0xc2   :  { %p7352_p1 = pnand %p7351_p0, %p7345_p11 }
  0xc4   :  { %7355 = shalt.err (!%p7352_p1)
}
  0xc5   :  { %57 = dma.hbm_to_vmem [thread:$0]  %s8939_s2, 256, %s52_s6, [#allocation3], %s7600_s5, %s7600_s5, %s7601_s0  }
  0xc6   :  { %s8940_s3 = sld [smem:[#allocation47_spill]] }
  0xcc   :  { %s7356_s28 = scalar_lea.hbm %s8940_s3, 256 }
  0xcd   :  { %p7357_p2 = scmp.ne.s32.totalorder %s8940_s3, %s7356_s28  ;;  %p7360_p3 = scmp.lt.u32.totalorder %s7356_s28, %s8940_s3 }
  0xcf   :  { %p7362_p4 = pnand %p7360_p3, %p7357_p2 }
  0xd1   :  { %7365 = shalt.err (!%p7362_p4)
}
  0xd2   :  { %s7366_s16 = scalar_lea.vmem %s7876_s30, 256  ;;  %p7371_p6 = scmp.lt.s32.totalorder %s7876_s30, %s7876_s30 }
  0xd3   :  { %p7367_p5 = scmp.ne.s32.totalorder %s7876_s30, %s7366_s16  ;;  %p7372_p7 = scmp.lt.s32.totalorder %s7366_s16, %s7366_s16 }
  0xd5   :  { %p7373_p8 = por %p7372_p7, %p7371_p6 }
  0xd7   :  { %p7374_p9 = pnand %p7373_p8, %p7367_p5 }
  0xd9   :  { %7377 = shalt.err (!%p7374_p9)
}
  0xda   :  { %81 = dma.hbm_to_vmem [thread:$0]  %s8940_s3, 256, %s7876_s30, [#allocation6], %s7600_s5, %s7600_s5, %s7601_s0  }
  0xdb   :  { %s7610_s2 = smov [#allocation10]   ;;  %s7611_s7 = smov [#allocation13]  }
  0xdc   :  { %s101_s29 = sshll.u32 %s7610_s2, 4  ;;  %s124_s8 = sshll.u32 %s7611_s7, 4  ;;  %s102_s29 = int_to_ptr.vmem [resolvable:$true] %s101_s29  ;;  %s125_s8 = int_to_ptr.vmem [resolvable:$true] %s124_s8 }
  0xdd   :  { %s8941_s20 = sld [smem:[#allocation50_spill]] }
  0xe3   :  { %s7378_s4 = scalar_lea.hbm %s8941_s20, 512 }
  0xe4   :  { %p7379_p10 = scmp.ne.s32.totalorder %s8941_s20, %s7378_s4  ;;  %p7382_p11 = scmp.lt.u32.totalorder %s7378_s4, %s8941_s20 }
  0xe6   :  { %p7384_p12 = pnand %p7382_p11, %p7379_p10 }
  0xe8   :  { %7387 = shalt.err (!%p7384_p12)
}
  0xe9   :  { %s7388_s30 = scalar_lea.vmem %s102_s29, 512  ;;  %p7393_p0 = scmp.lt.s32.totalorder %s102_s29, %s102_s29 }
  0xea   :  { %p7389_p13 = scmp.ne.s32.totalorder %s102_s29, %s7388_s30  ;;  %p7394_p1 = scmp.lt.s32.totalorder %s7388_s30, %s7388_s30 }
  0xec   :  { %p7395_p2 = por %p7394_p1, %p7393_p0 }
  0xee   :  { %p7396_p3 = pnand %p7395_p2, %p7389_p13 }
  0xf0   :  { %7399 = shalt.err (!%p7396_p3)
}
  0xf1   :  { %107 = dma.hbm_to_vmem [thread:$0]  %s8941_s20, 512, %s102_s29, [#allocation9], %s7600_s5, %s7600_s5, %s7601_s0  }
  0xf2   :  { %s8942_s24 = sld [smem:[#allocation52_spill]] }
  0xf8   :  { %s7400_s16 = scalar_lea.hbm %s8942_s24, 16 }
  0xf9   :  { %p7401_p4 = scmp.ne.s32.totalorder %s8942_s24, %s7400_s16  ;;  %p7404_p5 = scmp.lt.u32.totalorder %s7400_s16, %s8942_s24 }
  0xfb   :  { %p7406_p6 = pnand %p7404_p5, %p7401_p4 }
  0xfd   :  { %7409 = shalt.err (!%p7406_p6)
}
  0xfe   :  { %s7410_s14 = scalar_lea.vmem %s125_s8, 16  ;;  %s7414_s1 = scalar_lea.vmem %s125_s8, 32 }
  0xff   :  { %p7411_p7 = scmp.ne.s32.totalorder %s125_s8, %s7410_s14  ;;  %p7415_p8 = scmp.lt.s32.totalorder %s125_s8, %s125_s8 }
 0x100   :  { %p7416_p9 = scmp.lt.s32.totalorder %s7414_s1, %s7410_s14 }
 0x102   :  { %p7417_p10 = por %p7416_p9, %p7415_p8 }
 0x104   :  { %p7418_p11 = pnand %p7417_p10, %p7411_p7 }
 0x106   :  { %7421 = shalt.err (!%p7418_p11)
}
 0x107   :  { %127 = dma.hbm_to_vmem [thread:$0]  %s8942_s24, 16, %s125_s8, [#allocation12]  }
 0x108   :  { %s7612_s4 = smov [#allocation16]   ;;  %s7613_s27 = smov [#allocation19]  }
 0x109   :  { %s144_s23 = sshll.u32 %s7612_s4, 4  ;;  %s169_s10 = sshll.u32 %s7613_s27, 4  ;;  %s145_s23 = int_to_ptr.vmem [resolvable:$true] %s144_s23  ;;  %s7940_s10 = int_to_ptr.vmem [resolvable:$true] %s169_s10 }
 0x10a   :  { %s7422_s3 = scalar_lea.hbm %s8896_s11, 16 }
 0x10b   :  { %p7423_p12 = scmp.ne.s32.totalorder %s8896_s11, %s7422_s3  ;;  %p7426_p13 = scmp.lt.u32.totalorder %s7422_s3, %s8896_s11 }
 0x10d   :  { %p7428_p0 = pnand %p7426_p13, %p7423_p12 }
 0x10f   :  { %7431 = shalt.err (!%p7428_p0)
}
 0x110   :  { %s7432_s8 = scalar_lea.vmem %s145_s23, 16  ;;  %s7436_s24 = scalar_lea.vmem %s145_s23, 32 }
 0x111   :  { %p7433_p1 = scmp.ne.s32.totalorder %s145_s23, %s7432_s8  ;;  %p7437_p2 = scmp.lt.s32.totalorder %s145_s23, %s145_s23 }
 0x112   :  { %p7438_p3 = scmp.lt.s32.totalorder %s7436_s24, %s7432_s8 }
 0x114   :  { %p7439_p4 = por %p7438_p3, %p7437_p2 }
 0x116   :  { %p7440_p5 = pnand %p7439_p4, %p7433_p1 }
 0x118   :  { %7443 = shalt.err (!%p7440_p5)
}
 0x119   :  { %147 = dma.hbm_to_vmem [thread:$0]  %s8896_s11, 16, %s145_s23, [#allocation15]  }
 0x11a   :  { %s7444_s14 = scalar_lea.hbm %s8900_s15, 512 }
 0x11b   :  { %p7445_p6 = scmp.ne.s32.totalorder %s8900_s15, %s7444_s14  ;;  %p7448_p7 = scmp.lt.u32.totalorder %s7444_s14, %s8900_s15 }
 0x11d   :  { %p7450_p8 = pnand %p7448_p7, %p7445_p6 }
 0x11f   :  { %7453 = shalt.err (!%p7450_p8)
}
 0x120   :  { %s7454_s27 = scalar_lea.vmem %s7940_s10, 512  ;;  %p7459_p10 = scmp.lt.s32.totalorder %s7940_s10, %s7940_s10 }
 0x121   :  { %p7455_p9 = scmp.ne.s32.totalorder %s7940_s10, %s7454_s27  ;;  %p7460_p11 = scmp.lt.s32.totalorder %s7454_s27, %s7454_s27 }
 0x123   :  { %p7461_p12 = por %p7460_p11, %p7459_p10 }
 0x125   :  { %p7462_p13 = pnand %p7461_p12, %p7455_p9 }
 0x127   :  { %7465 = shalt.err (!%p7462_p13)
}
 0x128   :  { %175 = dma.hbm_to_vmem [thread:$0]  %s8900_s15, 512, %s7940_s10, [#allocation18], %s7600_s5, %s7600_s5, %s7601_s0  }
 0x129   :  { %s7614_s28 = smov [#allocation22]   ;;  %s7615_s3 = smov [#allocation25]  }
 0x12a   :  { %s193_s30 = sshll.u32 %s7614_s28, 4  ;;  %s216_s18 = sshll.u32 %s7615_s3, 4  ;;  %s194_s30 = int_to_ptr.vmem [resolvable:$true] %s193_s30  ;;  %s217_s18 = int_to_ptr.vmem [resolvable:$true] %s216_s18 }
 0x12b   :  { %s7466_s16 = scalar_lea.hbm %s8902_s17, 512 }
 0x12c   :  { %p7467_p0 = scmp.ne.s32.totalorder %s8902_s17, %s7466_s16  ;;  %p7470_p1 = scmp.lt.u32.totalorder %s7466_s16, %s8902_s17 }
 0x12e   :  { %p7472_p2 = pnand %p7470_p1, %p7467_p0 }
 0x130   :  { %7475 = shalt.err (!%p7472_p2)
}
 0x131   :  { %s7476_s15 = scalar_lea.vmem %s194_s30, 512  ;;  %p7481_p4 = scmp.lt.s32.totalorder %s194_s30, %s194_s30 }
 0x132   :  { %p7477_p3 = scmp.ne.s32.totalorder %s194_s30, %s7476_s15  ;;  %p7482_p5 = scmp.lt.s32.totalorder %s7476_s15, %s7476_s15 }
 0x134   :  { %p7483_p6 = por %p7482_p5, %p7481_p4 }
 0x136   :  { %p7484_p7 = pnand %p7483_p6, %p7477_p3 }
 0x138   :  { %7487 = shalt.err (!%p7484_p7)
}
 0x139   :  { %199 = dma.hbm_to_vmem [thread:$0]  %s8902_s17, 512, %s194_s30, [#allocation21], %s7600_s5, %s7600_s5, %s7601_s0  }
 0x13a   :  { %s7488_s1 = scalar_lea.hbm %s8904_s19, 16 }
 0x13b   :  { %p7489_p8 = scmp.ne.s32.totalorder %s8904_s19, %s7488_s1  ;;  %p7492_p9 = scmp.lt.u32.totalorder %s7488_s1, %s8904_s19 }
 0x13d   :  { %p7494_p10 = pnand %p7492_p9, %p7489_p8 }
 0x13f   :  { %7497 = shalt.err (!%p7494_p10)
}
 0x140   :  { %s7498_s11 = scalar_lea.vmem %s217_s18, 16  ;;  %s7502_s23 = scalar_lea.vmem %s217_s18, 32 }
 0x141   :  { %p7499_p11 = scmp.ne.s32.totalorder %s217_s18, %s7498_s11  ;;  %p7503_p12 = scmp.lt.s32.totalorder %s217_s18, %s217_s18 }
 0x142   :  { %p7504_p13 = scmp.lt.s32.totalorder %s7502_s23, %s7498_s11 }
 0x144   :  { %p7505_p0 = por %p7504_p13, %p7503_p12 }
 0x146   :  { %p7506_p1 = pnand %p7505_p0, %p7499_p11 }
 0x148   :  { %7509 = shalt.err (!%p7506_p1)
}
 0x149   :  { %219 = dma.hbm_to_vmem [thread:$0]  %s8904_s19, 16, %s217_s18, [#allocation24]  }
 0x14a   :  { %s7616_s30 = smov [#allocation28]   ;;  %s7510_s16 = scalar_lea.hbm %s8906_s21, 16 }
 0x14b   :  { %s236_s3 = sshll.u32 %s7616_s30, 4  ;;  %p7511_p2 = scmp.ne.s32.totalorder %s8906_s21, %s7510_s16  ;;  %s237_s3 = int_to_ptr.vmem [resolvable:$true] %s236_s3 }
 0x14c   :  { %p7514_p3 = scmp.lt.u32.totalorder %s7510_s16, %s8906_s21 }
 0x14e   :  { %p7516_p4 = pnand %p7514_p3, %p7511_p2 }
 0x150   :  { %7519 = shalt.err (!%p7516_p4)
}
 0x151   :  { %s7520_s15 = scalar_lea.vmem %s237_s3, 16  ;;  %s7524_s19 = scalar_lea.vmem %s237_s3, 32 }
 0x152   :  { %p7521_p5 = scmp.ne.s32.totalorder %s237_s3, %s7520_s15  ;;  %p7525_p6 = scmp.lt.s32.totalorder %s237_s3, %s237_s3 }
 0x153   :  { %p7526_p7 = scmp.lt.s32.totalorder %s7524_s19, %s7520_s15 }
 0x155   :  { %p7527_p8 = por %p7526_p7, %p7525_p6 }
 0x157   :  { %p7528_p9 = pnand %p7527_p8, %p7521_p5 }
 0x159   :  { %7531 = shalt.err (!%p7528_p9)
}
 0x15a   :  { %239 = dma.hbm_to_vmem [thread:$0]  %s8906_s21, 16, %s237_s3, [#allocation27]  }
 0x15b   :  { %7576 = dma.done.wait [#allocation3], 256  }
 0x15c   :  { %7577 = vsyncadd [#allocation3], 4294967040 }
 0x15d   :  { %7578 = dma.done.wait [#allocation6], 512  }
 0x15e   :  { %7579 = vsyncadd [#allocation6], 4294966784 }
 0x15f   :  { %7580 = dma.done.wait [#allocation9], 1024  }
 0x160   :  { %7581 = vsyncadd [#allocation9], 4294966272 }
 0x161   :  { %7582 = dma.done.wait [#allocation12], 32  }
 0x162   :  { %7583 = vsyncadd [#allocation12], 4294967264 }
 0x163   :  { %7584 = dma.done.wait [#allocation15], 32  }
 0x164   :  { %7585 = vsyncadd [#allocation15], 4294967264 }
 0x165   :  { %7586 = dma.done.wait [#allocation18], 1024  }
 0x166   :  { %7587 = vsyncadd [#allocation18], 4294966272 }
 0x167   :  { %7588 = dma.done.wait [#allocation21], 1024  }
 0x168   :  { %7589 = vsyncadd [#allocation21], 4294966272 }
 0x169   :  { %7590 = dma.done.wait [#allocation24], 32  }
 0x16a   :  { %7591 = vsyncadd [#allocation24], 4294967264 }
 0x16b   :  { %7592 = dma.done.wait [#allocation27], 32  }
 0x16c   :  { %7593 = vsyncadd [#allocation27], 4294967264  ;;  %vm319_vm0 = vcmask 130048   ;;  %v310_v0 = vld [vmem:[#allocation2] sm:$0xff]  ;;  %v311_v1 = vld [vmem:[#allocation2 + $0x8] sm:$0xff]  ;;  %s8943_s7 = sld [smem:[#allocation43_spill]] }
 0x16d   :  { %v401_v2 = vld [vmem:[#allocation5] sm:$0xff]  ;;  %v6478_v3 = vpack.c.bf16 %v311_v1, %v310_v0  ;;  %v402_v4 = vld [vmem:[#allocation5 + $0x8] sm:$0xff]  ;;  %v485_v7 = vld [vmem:[#allocation7] sm:$0xff]  ;;  %s8944_s29 = sld [smem:[#allocation48_spill]]  ;;  %v7617_v16 = vmov 0.0|0.0   ;;  %vm7618_vm1 = vmmov 0  }
 0x16e   :  { %v6482_v6 = vpack.c.bf16 %v402_v4, %v401_v2  ;;  %v486_v8 = vld [vmem:[#allocation7 + $0x8] sm:$0xff]  ;;  %v301_v14 = vld [vmem:[#allocation8] sm:$0xff]  ;;  %v302_v15 = vld [vmem:[#allocation8 + $0x8] sm:$0xff]  ;;  %v7619_v25 = vmov 0.0   ;;  %s8945_s9 = sld [smem:[#allocation44_spill]]  ;;  %vm570_vm2 = vcmask 261120  }
 0x16f   :  { %6479 = vmatprep.subr.bf16.mxu0 %v6478_v3  ;;  %v6486_v10 = vpack.c.bf16 %v486_v8, %v485_v7  ;;  %v8038_v19 = vpack.c.bf16 %v302_v15, %v301_v14  ;;  %v303_v21 = vld [vmem:[#allocation8 + $0x10] sm:$0xff]  ;;  %v304_v22 = vld [vmem:[#allocation8 + $0x18] sm:$0xff]  ;;  %v305_v23 = vld [vmem:[#allocation10] sm:$0xff]  ;;  %vm850_vm3 = vcmask 1041409   ;;  %vm2797_vm4 = vcmask 1040384  }
 0x170   :  { %6483 = vmatprep.subr.bf16.mxu1 %v6482_v6  ;;  %6481 = vmatpush3.bf16.msra.mxu0 %v6478_v3  ;;  %v306_v24 = vld [vmem:[#allocation10 + $0x8] sm:$0xff]  ;;  %v8050_v26 = vpack.c.bf16 %v304_v22, %v303_v21  ;;  %v307_v29 = vld [vmem:[#allocation10 + $0x10] sm:$0xff]  ;;  %v308_v30 = vld [vmem:[#allocation10 + $0x18] sm:$0xff]  ;;  %vm2800_vm5 = vcmask 1041408   ;;  %vm2803_vm6 = vcmask 1042432   ;;  %vm2806_vm7 = vcmask 1043456  }
 0x171   :  { %6485 = vmatpush3.bf16.msra.mxu1 %v6482_v6  ;;  %6487 = vmatprep.subr.bf16.mxu0 %v6486_v10  ;;  %v8061_v28 = vpack.c.bf16 %v306_v24, %v305_v23  ;;  %v8068_v31 = vpack.c.bf16 %v308_v30, %v307_v29  ;;  %v5473_v36 = vld [vmem:[#allocation11] ss:$0 sm:$0xff]  ;;  %v5476_v40 = vld [vmem:[#allocation13] ss:$0 sm:$0xff]  ;;  %v8104_v0 = vld [vmem:[#allocation16] ss:$0 sm:$0xff] }
 0x172   :  { %v295_v5 = vld [vmem:[%s8943_s7] sm:$0xff]  ;;  %v296_v12 = vld [vmem:[%s8943_s7 + $0x8] sm:$0xff]  ;;  %6490 = vmatprep.subr.bf16.mxu1 %v7617_v16  ;;  %vm2809_vm8 = vcmask 1044480   ;;  %vm2812_vm9 = vcmask 1045504   ;;  %vm2793_vm10 = vcmask 261127   ;;  %vm2815_vm11 = vcmask 1046528  }
 0x173   :  { %5896 = vmatprep.mubr.msk.f32.mxu1 %vm319_vm0, %v295_v5  ;;  %5889 = vmatprep.mubr.msk.f32.mxu0 %vm319_vm0, %v295_v5  ;;  %v297_v9 = vld [vmem:[%s8944_s29] sm:$0xff]  ;;  %v298_v11 = vld [vmem:[%s8944_s29 + $0x8] sm:$0xff]  ;;  %v299_v17 = vld [vmem:[%s8944_s29 + $0x10] sm:$0xff]  ;;  %vm2795_vm12 = vcmask 253952  }
 0x174   :  { %v8027_v13 = vpack.c.bf16 %v298_v11, %v297_v9  ;;  %v300_v18 = vld [vmem:[%s8944_s29 + $0x18] sm:$0xff]  ;;  %5890 = vmatmul.mubr.msk.f32.vlgmr.msra.gmra.mrb[0].mxu0 %vm319_vm0, %v296_v12  ;;  %5897 = vmatmul.mubr.msk.f32.vlgmr.msra.gmra.mrb[0].mxu1 %vm319_vm0, %v296_v12  ;;  %v8058_v27 = vld [vmem:[%s8945_s9] sm:$0x3] }
 0x175   :  { %6489 = vmatpush3.bf16.msra.mxu0 %v6486_v10  ;;  %5903 = vmatprep.mubr.msk.f32.mxu0 %vm319_vm0, %v295_v5  ;;  %v8042_v20 = vpack.c.bf16 %v300_v18, %v299_v17  ;;  %v5479_v5 = vld [vmem:[#allocation14] ss:$0 sm:$0xff]  ;;  %v840_v22 = vrot.slane %v8058_v27, 1 }
 0x176   :  { %6492 = vmatpush3.bf16.msra.mxu1 %v8027_v13  ;;  %6496 = vmatprep.subr.bf16.mxu0 %v7617_v16 }
 0x177   :  { %6493 = vmatprep.subr.bf16.mxu1 %v7617_v16  ;;  %5914 = vmatprep.mubr.msk.f32.mxu1 %vm7618_vm1, %v7619_v25 }
 0x178   :  { %5904 = vmatmul.mubr.msk.f32.vlgmr.msra.gmra.mrb[2].mxu0 %vm319_vm0, %v296_v12 }
 0x179   :  { %6498 = vmatpush3.bf16.msra.mxu0 %v8038_v19  ;;  %5925 = vmatprep.mubr.msk.f32.mxu0 %vm7618_vm1, %v7619_v25 }
 0x17a   :  { %6495 = vmatpush3.bf16.msra.mxu1 %v8042_v20  ;;  %6499 = vmatprep.subr.bf16.mxu0 %v7617_v16 }
 0x17b   :  { %6502 = vmatprep.subr.bf16.mxu1 %v7617_v16 }
 0x17d   :  { %5915 = vmatmul.mubr.msk.f32.vlgmr.msra.gmra.mrb[2].mxu1 %vm570_vm2, %v8058_v27  ;;  %6501 = vmatpush3.bf16.msra.mxu0 %v8050_v26 }
 0x17e   :  { %6504 = vmatpush3.bf16.msra.mxu1 %v8061_v28  ;;  %5936 = vmatprep.mubr.msk.f32.mxu1 %vm7618_vm1, %v7619_v25 }
 0x17f   :  { %6505 = vmatprep.subr.bf16.mxu1 %v7617_v16  ;;  %6508 = vmatprep.subr.bf16.mxu0 %v7617_v16 }
 0x180   :  { %5926 = vmatmul.mubr.msk.f32.vlgmr.msra.gmra.mrb[4].mxu0 %vm570_vm2, %v8058_v27 }
 0x181   :  { %6510 = vmatpush3.bf16.msra.mxu0 %v8027_v13  ;;  %5947 = vmatprep.mubr.msk.f32.mxu0 %vm7618_vm1, %v7619_v25 }
 0x182   :  { %6507 = vmatpush3.bf16.msra.mxu1 %v8068_v31  ;;  %6511 = vmatprep.subr.bf16.mxu0 %v7617_v16 }
 0x183   :  { %6514 = vmatprep.subr.bf16.mxu1 %v7617_v16 }
 0x185   :  { %5937 = vmatmul.mubr.msk.f32.vlgmr.msra.gmra.mrb[4].mxu1 %vm570_vm2, %v8058_v27  ;;  %6513 = vmatpush3.bf16.msra.mxu0 %v8042_v20 }
 0x186   :  { %6516 = vmatpush3.bf16.msra.mxu1 %v8038_v19  ;;  %5958 = vmatprep.mubr.msk.f32.mxu1 %vm7618_vm1, %v7619_v25 }
 0x187   :  { %6517 = vmatprep.subr.bf16.mxu1 %v7617_v16  ;;  %6520 = vmatprep.subr.bf16.mxu0 %v7617_v16 }
 0x18a   :  { %6519 = vmatpush3.bf16.msra.mxu1 %v8050_v26 }
 0x18b   :  { %6526 = vmatprep.subr.bf16.mxu1 %v7617_v16 }
 0x247   :  { %v5891_v32 = vpop.f32.mrb[0].mxu0  ;;  %v5898_v33 = vpop.f32.mrb[0].mxu1 }
 0x248   :  { %v392_v34 = vpop.f32.mrb[1].mxu0  ;;  %v476_v35 = vpop.f32.mrb[1].mxu1  ;;  %v8094_v41 = vadd.f32 %v5891_v32, %v5473_v36  ;;  %v8100_v50 = vadd.f32 %v5898_v33, %v5476_v40 }
 0x249   :  { %v8092_v39 = vadd.f32 %v5473_v36, %v392_v34  ;;  %v8097_v46 = vadd.f32 %v5476_v40, %v476_v35 }
 0x24b   :  { %v5905_v37 = vpop.f32.mrb[2].mxu0 }
 0x24c   :  { %v560_v38 = vpop.f32.mrb[3].mxu0  ;;  %v8109_v12 = vadd.f32 %v5905_v37, %v5479_v5 }
 0x24d   :  { %v8107_v9 = vadd.f32 %v5479_v5, %v560_v38 }
 0x250   :  { %v640_v42 = vpop.f32.mrb[2].mxu1 }
 0x251   :  { %v791_v43 = vrot.slane %v640_v42, 1  ;;  %v794_v44 = vadd.f32 %v640_v42, %v8092_v39  ;;  %v5916_v45 = vpop.f32.mrb[3].mxu1 }
 0x253   :  { %v795_v47 = vadd.f32 %v791_v43, %v8094_v41  ;;  %v5486_v48 = vmul.f32 -1.442695, %v794_v44  ;;  %v710_v49 = vpop.f32.mrb[4].mxu0 }
 0x254   :  { %v809_v51 = vrot.slane %v710_v49, 1  ;;  %v812_v52 = vadd.f32 %v710_v49, %v8097_v46  ;;  %v5927_v53 = vpop.f32.mrb[5].mxu0 }
 0x255   :  { %6836 = vpow2.f32 %v5486_v48  ;;  %v5487_v54 = vmul.f32 -1.442695, %v795_v47 }
 0x256   :  { %v813_v55 = vadd.f32 %v809_v51, %v8100_v50  ;;  %v5488_v56 = vmul.f32 -1.442695, %v812_v52 }
 0x257   :  { %6838 = vpow2.f32 %v5487_v54 }
 0x258   :  { %v786_v57 = vpop.f32.mrb[4].mxu1  ;;  %v5489_v59 = vmul.f32 -1.442695, %v813_v55  ;;  %6840 = vpow2.f32 %v5488_v56 }
 0x259   :  { %v5938_v58 = vpop.f32.mrb[5].mxu1  ;;  %v787_v2 = vadd.f32 %v8104_v0, %v786_v57 }
 0x25a   :  { %6842 = vpow2.f32 %v5489_v59 }
 0x25b   :  { %v827_v7 = vrot.slane %v787_v2, 1 }
 0x25f   :  { %v6837_v60 = vpop.eup %6836 }
 0x260   :  { %v802_v61 = vadd.f32 1.0, %v6837_v60 }
 0x261   :  { %v6839_v62 = vpop.eup %6838 }
 0x262   :  { %v803_v63 = vadd.f32 1.0, %v6839_v62  ;;  %6844 = vrcp.f32 %v802_v61  ;;  %v6841_v1 = vpop.eup %6840 }
 0x263   :  { %v820_v4 = vadd.f32 1.0, %v6841_v1 }
 0x264   :  { %6846 = vrcp.f32 %v803_v63  ;;  %v6843_v3 = vpop.eup %6842 }
 0x265   :  { %v821_v6 = vadd.f32 1.0, %v6843_v3  ;;  %6848 = vrcp.f32 %v820_v4 }
 0x267   :  { %6850 = vrcp.f32 %v821_v6 }
 0x26c   :  { %v6845_v8 = vpop.eup %6844 }
 0x26d   :  { %v830_v10 = vmul.f32 %v6845_v8, %v787_v2 }
 0x26e   :  { %v6847_v11 = vpop.eup %6846 }
 0x26f   :  { %v831_v14 = vmul.f32 %v6847_v11, %v827_v7  ;;  %v832_v15 = vadd.f32 %v830_v10, %v8107_v9  ;;  %v6849_v18 = vpop.eup %6848 }
 0x270   :  { %v836_v23 = vsub.f32 1.0, %v6849_v18  ;;  %v843_v32 = vmul.f32 %v6849_v18, %v8058_v27 }
 0x271   :  { %v833_v17 = vadd.f32 %v831_v14, %v8109_v12  ;;  %6852 = vtanh.f32 %v832_v15  ;;  %v6851_v21 = vpop.eup %6850 }
 0x272   :  { %v837_v29 = vsub.f32 1.0, %v6851_v21  ;;  %v844_v35 = vmul.f32 %v6851_v21, %v840_v22 }
 0x273   :  { %6854 = vtanh.f32 %v833_v17 }
 0x27b   :  { %v6853_v24 = vpop.eup %6852 }
 0x27c   :  { %v838_v30 = vmul.f32 %v6853_v24, %v836_v23 }
 0x27d   :  { %v6855_v33 = vpop.eup %6854 }
 0x27e   :  { %v839_v34 = vmul.f32 %v6855_v33, %v837_v29  ;;  %v8115_v36 = vadd.f32 %v843_v32, %v838_v30 }
 0x280   :  { %v8117_v37 = vadd.f32 %v844_v35, %v839_v34  ;;  %v1114_v22 = vrot.slane %v8115_v36, 7 }
 0x282   :  { %v849_v38 = vrot.slane %v8117_v37, 7 }
 0x284   :  { %v851_v40 = vsel %vm850_vm3, %v849_v38, %v8115_v36 }
 0x285   :  { %5948 = vmatmul.mubr.msk.f32.vlgmr.msra.gmra.mrb[6].mxu0 %vm570_vm2, %v851_v40  ;;  %5959 = vmatmul.mubr.msk.f32.vlgmr.msra.gmra.mrb[6].mxu1 %vm570_vm2, %v851_v40 }
 0x286   :  { %6522 = vmatpush3.bf16.msra.mxu0 %v8061_v28  ;;  %5969 = vmatprep.mubr.msk.f32.mxu0 %vm7618_vm1, %v7619_v25 }
 0x287   :  { %6523 = vmatprep.subr.bf16.mxu0 %v7617_v16  ;;  %6528 = vmatpush3.bf16.msra.mxu1 %v8027_v13 }
 0x288   :  { %6529 = vmatprep.subr.bf16.mxu1 %v7617_v16  ;;  %5980 = vmatprep.mubr.msk.f32.mxu1 %vm7618_vm1, %v7619_v25 }
 0x28a   :  { %6525 = vmatpush3.bf16.msra.mxu0 %v8068_v31 }
 0x28b   :  { %6532 = vmatprep.subr.bf16.mxu0 %v7617_v16  ;;  %6531 = vmatpush3.bf16.msra.mxu1 %v8042_v20 }
 0x28c   :  { %6538 = vmatprep.subr.bf16.mxu1 %v7617_v16 }
 0x28d   :  { %5970 = vmatmul.mubr.msk.f32.vlgmr.msra.gmra.mrb[8].mxu0 %vm570_vm2, %v851_v40 }
 0x28e   :  { %6534 = vmatpush3.bf16.msra.mxu0 %v8038_v19  ;;  %5991 = vmatprep.mubr.msk.f32.mxu0 %vm7618_vm1, %v7619_v25 }
 0x28f   :  { %6535 = vmatprep.subr.bf16.mxu0 %v7617_v16 }
 0x292   :  { %6537 = vmatpush3.bf16.msra.mxu0 %v8050_v26 }
 0x293   :  { %6544 = vmatprep.subr.bf16.mxu0 %v7617_v16 }
 0x358   :  { %v920_v27 = vpop.f32.mrb[6].mxu0  ;;  %v990_v42 = vpop.f32.mrb[6].mxu1 }
 0x359   :  { %v1065_v43 = vrot.slane %v920_v27, 7  ;;  %v1069_v44 = vadd.f32 %v920_v27, %v8094_v41  ;;  %v5949_v45 = vpop.f32.mrb[7].mxu0  ;;  %v5960_v47 = vpop.f32.mrb[7].mxu1  ;;  %v1083_v48 = vrot.slane %v990_v42, 7  ;;  %v1087_v52 = vadd.f32 %v990_v42, %v8100_v50 }
 0x35b   :  { %v1068_v49 = vadd.f32 %v1065_v43, %v8092_v39  ;;  %v5494_v51 = vmul.f32 -1.442695, %v1069_v44  ;;  %v1086_v54 = vadd.f32 %v1083_v48, %v8097_v46  ;;  %v5496_v55 = vmul.f32 -1.442695, %v1087_v52 }
 0x35d   :  { %v5493_v53 = vmul.f32 -1.442695, %v1068_v49  ;;  %6856 = vpow2.f32 %v5494_v51  ;;  %v5495_v58 = vmul.f32 -1.442695, %v1086_v54 }
 0x35f   :  { %6858 = vpow2.f32 %v5493_v53 }
 0x360   :  { %v1060_v56 = vpop.f32.mrb[8].mxu0  ;;  %6860 = vpow2.f32 %v5496_v55 }
 0x361   :  { %v5971_v57 = vpop.f32.mrb[9].mxu0  ;;  %6862 = vpow2.f32 %v5495_v58  ;;  %v1061_v3 = vadd.f32 %v8104_v0, %v1060_v56 }
 0x363   :  { %v1101_v6 = vrot.slane %v1061_v3, 7 }
 0x367   :  { %v6857_v59 = vpop.eup %6856 }
 0x368   :  { %v1077_v60 = vadd.f32 1.0, %v6857_v59 }
 0x369   :  { %v6859_v61 = vpop.eup %6858 }
 0x36a   :  { %v1076_v62 = vadd.f32 1.0, %v6859_v61  ;;  %6864 = vrcp.f32 %v1077_v60  ;;  %v6861_v63 = vpop.eup %6860 }
 0x36b   :  { %v6863_v1 = vpop.eup %6862  ;;  %v1095_v2 = vadd.f32 1.0, %v6861_v63 }
 0x36c   :  { %6866 = vrcp.f32 %v1076_v62  ;;  %v1094_v4 = vadd.f32 1.0, %v6863_v1 }
 0x36d   :  { %6868 = vrcp.f32 %v1095_v2 }
 0x36e   :  { %6870 = vrcp.f32 %v1094_v4 }
 0x374   :  { %v6865_v5 = vpop.eup %6864 }
 0x375   :  { %v1105_v7 = vmul.f32 %v6865_v5, %v1061_v3 }
 0x376   :  { %v6867_v8 = vpop.eup %6866 }
 0x377   :  { %v1104_v10 = vmul.f32 %v6867_v8, %v1101_v6  ;;  %v1107_v11 = vadd.f32 %v1105_v7, %v8109_v12  ;;  %v6869_v15 = vpop.eup %6868 }
 0x378   :  { %v6871_v17 = vpop.eup %6870  ;;  %v1111_v18 = vsub.f32 1.0, %v6869_v15  ;;  %v1118_v29 = vmul.f32 %v6869_v15, %v849_v38 }
 0x379   :  { %v1106_v14 = vadd.f32 %v1104_v10, %v8107_v9  ;;  %6872 = vtanh.f32 %v1107_v11  ;;  %v1110_v23 = vsub.f32 1.0, %v6871_v17  ;;  %v1117_v33 = vmul.f32 %v6871_v17, %v1114_v22 }
 0x37b   :  { %6874 = vtanh.f32 %v1106_v14 }
 0x383   :  { %v6873_v21 = vpop.eup %6872 }
 0x384   :  { %v1113_v24 = vmul.f32 %v6873_v21, %v1111_v18 }
 0x385   :  { %v6875_v30 = vpop.eup %6874 }
 0x386   :  { %v1112_v32 = vmul.f32 %v6875_v30, %v1110_v23  ;;  %v8155_v34 = vadd.f32 %v1118_v29, %v1113_v24 }
 0x388   :  { %v8157_v35 = vadd.f32 %v1117_v33, %v1112_v32  ;;  %v1391_v18 = vrot.slane %v8155_v34, 7 }
 0x38a   :  { %v1123_v40 = vrot.slane %v8157_v35, 1  ;;  %v1390_v15 = vrot.slane %v8157_v35, 7 }
 0x38c   :  { %v1124_v27 = vsel %vm850_vm3, %v8155_v34, %v1123_v40 }
 0x38d   :  { %5981 = vmatmul.mubr.msk.f32.vlgmr.msra.gmra.mrb[8].mxu1 %vm570_vm2, %v1124_v27  ;;  %5992 = vmatmul.mubr.msk.f32.vlgmr.msra.gmra.mrb[10].mxu0 %vm570_vm2, %v1124_v27 }
 0x38e   :  { %6540 = vmatpush3.bf16.msra.mxu1 %v8061_v28  ;;  %6002 = vmatprep.mubr.msk.f32.mxu1 %vm7618_vm1, %v7619_v25 }
 0x38f   :  { %6541 = vmatprep.subr.bf16.mxu1 %v7617_v16  ;;  %6546 = vmatpush3.bf16.msra.mxu0 %v8027_v13 }
 0x390   :  { %6547 = vmatprep.subr.bf16.mxu0 %v7617_v16  ;;  %6013 = vmatprep.mubr.msk.f32.mxu0 %vm7618_vm1, %v7619_v25 }
 0x392   :  { %6543 = vmatpush3.bf16.msra.mxu1 %v8068_v31 }
 0x393   :  { %6550 = vmatprep.subr.bf16.mxu1 %v7617_v16  ;;  %6549 = vmatpush3.bf16.msra.mxu0 %v8042_v20 }
 0x394   :  { %6556 = vmatprep.subr.bf16.mxu0 %v7617_v16 }
 0x395   :  { %6003 = vmatmul.mubr.msk.f32.vlgmr.msra.gmra.mrb[10].mxu1 %vm570_vm2, %v1124_v27 }
 0x396   :  { %6552 = vmatpush3.bf16.msra.mxu1 %v8038_v19  ;;  %6024 = vmatprep.mubr.msk.f32.mxu1 %vm7618_vm1, %v7619_v25 }
 0x397   :  { %6553 = vmatprep.subr.bf16.mxu1 %v7617_v16 }
 0x39a   :  { %6555 = vmatpush3.bf16.msra.mxu1 %v8050_v26 }
 0x39b   :  { %6562 = vmatprep.subr.bf16.mxu1 %v7617_v16 }
 0x460   :  { %v1193_v38 = vpop.f32.mrb[8].mxu1  ;;  %v1263_v42 = vpop.f32.mrb[10].mxu0 }
 0x461   :  { %v1338_v43 = vrot.slane %v1193_v38, 6  ;;  %v1339_v44 = vrot.slane %v1193_v38, 7  ;;  %v1357_v45 = vrot.slane %v1263_v42, 6  ;;  %v1358_v47 = vrot.slane %v1263_v42, 7  ;;  %v5982_v48 = vpop.f32.mrb[9].mxu1  ;;  %v5993_v49 = vpop.f32.mrb[11].mxu0 }
 0x463   :  { %v1342_v51 = vadd.f32 %v1338_v43, %v8092_v39  ;;  %v1343_v52 = vadd.f32 %v1339_v44, %v8094_v41  ;;  %v1361_v53 = vadd.f32 %v1357_v45, %v8097_v46  ;;  %v1362_v54 = vadd.f32 %v1358_v47, %v8100_v50 }
 0x464   :  { %v2798_v45 = vsel %vm2797_vm4, %v8115_v36, %v8157_v35  ;;  %v2799_v47 = vsel %vm2797_vm4, %v8117_v37, %v8155_v34 }
 0x465   :  { %v5500_v55 = vmul.f32 -1.442695, %v1342_v51  ;;  %v5501_v56 = vmul.f32 -1.442695, %v1343_v52  ;;  %v5502_v57 = vmul.f32 -1.442695, %v1361_v53 }
 0x466   :  { %v5503_v58 = vmul.f32 -1.442695, %v1362_v54 }
 0x467   :  { %6876 = vpow2.f32 %v5500_v55 }
 0x468   :  { %6878 = vpow2.f32 %v5501_v56  ;;  %v1333_v59 = vpop.f32.mrb[10].mxu1 }
 0x469   :  { %6880 = vpow2.f32 %v5502_v57  ;;  %v6004_v60 = vpop.f32.mrb[11].mxu1  ;;  %v1334_v6 = vadd.f32 %v8104_v0, %v1333_v59 }
 0x46a   :  { %6882 = vpow2.f32 %v5503_v58 }
 0x46b   :  { %v1376_v7 = vrot.slane %v1334_v6, 6  ;;  %v1377_v10 = vrot.slane %v1334_v6, 7 }
 0x471   :  { %v6877_v61 = vpop.eup %6876 }
 0x472   :  { %v6879_v62 = vpop.eup %6878  ;;  %v1350_v63 = vadd.f32 1.0, %v6877_v61 }
 0x473   :  { %v6881_v1 = vpop.eup %6880  ;;  %v1351_v2 = vadd.f32 1.0, %v6879_v62 }
 0x474   :  { %v6883_v3 = vpop.eup %6882  ;;  %6884 = vrcp.f32 %v1350_v63  ;;  %v1369_v4 = vadd.f32 1.0, %v6881_v1 }
 0x475   :  { %6886 = vrcp.f32 %v1351_v2  ;;  %v1370_v5 = vadd.f32 1.0, %v6883_v3 }
 0x476   :  { %6888 = vrcp.f32 %v1369_v4 }
 0x477   :  { %6890 = vrcp.f32 %v1370_v5 }
 0x47e   :  { %v6885_v8 = vpop.eup %6884 }
 0x47f   :  { %v6887_v11 = vpop.eup %6886  ;;  %v1380_v14 = vmul.f32 %v6885_v8, %v1376_v7 }
 0x480   :  { %v6889_v17 = vpop.eup %6888  ;;  %v1381_v21 = vmul.f32 %v6887_v11, %v1377_v10 }
 0x481   :  { %v6891_v22 = vpop.eup %6890  ;;  %v1382_v23 = vadd.f32 %v1380_v14, %v8107_v9  ;;  %v1394_v24 = vmul.f32 %v6889_v17, %v1390_v15  ;;  %v1386_v32 = vsub.f32 1.0, %v6889_v17 }
 0x482   :  { %v1383_v29 = vadd.f32 %v1381_v21, %v8109_v12  ;;  %v1395_v30 = vmul.f32 %v6891_v22, %v1391_v18  ;;  %v1387_v40 = vsub.f32 1.0, %v6891_v22 }
 0x483   :  { %6892 = vtanh.f32 %v1382_v23 }
 0x484   :  { %6894 = vtanh.f32 %v1383_v29 }
 0x48d   :  { %v6893_v33 = vpop.eup %6892 }
 0x48e   :  { %v6895_v27 = vpop.eup %6894  ;;  %v1388_v38 = vmul.f32 %v6893_v33, %v1386_v32 }
 0x48f   :  { %v1389_v42 = vmul.f32 %v6895_v27, %v1387_v40 }
 0x490   :  { %v8192_v43 = vadd.f32 %v1394_v24, %v1388_v38 }
 0x491   :  { %v8194_v44 = vadd.f32 %v1395_v30, %v1389_v42 }
 0x492   :  { %v1400_v48 = vrot.slane %v8192_v43, 2  ;;  %v8205_v49 = vsel %vm2800_vm5, %v2798_v45, %v8192_v43  ;;  %v1668_v29 = vrot.slane %v8192_v43, 7 }
 0x493   :  { %v1401_v51 = vrot.slane %v8194_v44, 1  ;;  %v8210_v52 = vsel %vm2800_vm5, %v2799_v47, %v8194_v44  ;;  %v1669_v33 = vrot.slane %v8194_v44, 7 }
 0x495   :  { %v1402_v53 = vsel %vm850_vm3, %v1401_v51, %v1400_v48 }
 0x496   :  { %6014 = vmatmul.mubr.msk.f32.vlgmr.msra.gmra.mrb[12].mxu0 %vm570_vm2, %v1402_v53  ;;  %6025 = vmatmul.mubr.msk.f32.vlgmr.msra.gmra.mrb[12].mxu1 %vm570_vm2, %v1402_v53 }
 0x497   :  { %6558 = vmatpush3.bf16.msra.mxu0 %v8061_v28  ;;  %6035 = vmatprep.mubr.msk.f32.mxu0 %vm7618_vm1, %v7619_v25 }
 0x498   :  { %6559 = vmatprep.subr.bf16.mxu0 %v7617_v16  ;;  %6564 = vmatpush3.bf16.msra.mxu1 %v8027_v13 }
 0x499   :  { %6565 = vmatprep.subr.bf16.mxu1 %v7617_v16  ;;  %6046 = vmatprep.mubr.msk.f32.mxu1 %vm7618_vm1, %v7619_v25 }
 0x49b   :  { %6561 = vmatpush3.bf16.msra.mxu0 %v8068_v31 }
 0x49c   :  { %6568 = vmatprep.subr.bf16.mxu0 %v7617_v16  ;;  %6567 = vmatpush3.bf16.msra.mxu1 %v8042_v20 }
 0x49d   :  { %6574 = vmatprep.subr.bf16.mxu1 %v7617_v16 }
 0x49e   :  { %6036 = vmatmul.mubr.msk.f32.vlgmr.msra.gmra.mrb[14].mxu0 %vm570_vm2, %v1402_v53 }
 0x49f   :  { %6570 = vmatpush3.bf16.msra.mxu0 %v8038_v19  ;;  %6057 = vmatprep.mubr.msk.f32.mxu0 %vm7618_vm1, %v7619_v25 }
 0x4a0   :  { %6571 = vmatprep.subr.bf16.mxu0 %v7617_v16 }
 0x4a3   :  { %6573 = vmatpush3.bf16.msra.mxu0 %v8050_v26 }
 0x4a4   :  { %6580 = vmatprep.subr.bf16.mxu0 %v7617_v16 }
 0x569   :  { %v1471_v36 = vpop.f32.mrb[12].mxu0  ;;  %v1541_v37 = vpop.f32.mrb[12].mxu1 }
 0x56a   :  { %v1616_v34 = vrot.slane %v1471_v36, 5  ;;  %v1617_v35 = vrot.slane %v1471_v36, 6  ;;  %v1635_v54 = vrot.slane %v1541_v37, 5  ;;  %v1636_v55 = vrot.slane %v1541_v37, 6  ;;  %v6015_v56 = vpop.f32.mrb[13].mxu0  ;;  %v6026_v57 = vpop.f32.mrb[13].mxu1 }
 0x56c   :  { %v1620_v58 = vadd.f32 %v1616_v34, %v8092_v39  ;;  %v1621_v59 = vadd.f32 %v1617_v35, %v8094_v41  ;;  %v1639_v60 = vadd.f32 %v1635_v54, %v8097_v46  ;;  %v1640_v61 = vadd.f32 %v1636_v55, %v8100_v50 }
 0x56e   :  { %v5507_v62 = vmul.f32 -1.442695, %v1620_v58  ;;  %v5508_v63 = vmul.f32 -1.442695, %v1621_v59  ;;  %v5509_v1 = vmul.f32 -1.442695, %v1639_v60 }
 0x56f   :  { %v5510_v2 = vmul.f32 -1.442695, %v1640_v61 }
 0x570   :  { %6896 = vpow2.f32 %v5507_v62 }
 0x571   :  { %6898 = vpow2.f32 %v5508_v63  ;;  %v1611_v3 = vpop.f32.mrb[14].mxu0 }
 0x572   :  { %6900 = vpow2.f32 %v5509_v1  ;;  %v6037_v4 = vpop.f32.mrb[15].mxu0  ;;  %v1612_v17 = vadd.f32 %v8104_v0, %v1611_v3 }
 0x573   :  { %6902 = vpow2.f32 %v5510_v2 }
 0x574   :  { %v1654_v18 = vrot.slane %v1612_v17, 5  ;;  %v1655_v22 = vrot.slane %v1612_v17, 6 }
 0x57a   :  { %v6897_v5 = vpop.eup %6896 }
 0x57b   :  { %v6899_v6 = vpop.eup %6898  ;;  %v1628_v7 = vadd.f32 1.0, %v6897_v5 }
 0x57c   :  { %v6901_v8 = vpop.eup %6900  ;;  %v1629_v10 = vadd.f32 1.0, %v6899_v6 }
 0x57d   :  { %v6903_v11 = vpop.eup %6902  ;;  %6904 = vrcp.f32 %v1628_v7  ;;  %v1647_v14 = vadd.f32 1.0, %v6901_v8 }
 0x57e   :  { %6906 = vrcp.f32 %v1629_v10  ;;  %v1648_v15 = vadd.f32 1.0, %v6903_v11 }
 0x57f   :  { %6908 = vrcp.f32 %v1647_v14 }
 0x580   :  { %6910 = vrcp.f32 %v1648_v15 }
 0x587   :  { %v6905_v21 = vpop.eup %6904 }
 0x588   :  { %v6907_v23 = vpop.eup %6906  ;;  %v1658_v24 = vmul.f32 %v6905_v21, %v1654_v18 }
 0x589   :  { %v6909_v30 = vpop.eup %6908  ;;  %v1659_v32 = vmul.f32 %v6907_v23, %v1655_v22 }
 0x58a   :  { %v6911_v40 = vpop.eup %6910  ;;  %v1660_v27 = vadd.f32 %v1658_v24, %v8107_v9  ;;  %v1672_v38 = vmul.f32 %v6909_v30, %v1668_v29  ;;  %v1664_v47 = vsub.f32 1.0, %v6909_v30 }
 0x58b   :  { %v1661_v42 = vadd.f32 %v1659_v32, %v8109_v12  ;;  %v1673_v45 = vmul.f32 %v6911_v40, %v1669_v33  ;;  %v1665_v51 = vsub.f32 1.0, %v6911_v40 }
 0x58c   :  { %6912 = vtanh.f32 %v1660_v27 }
 0x58d   :  { %6914 = vtanh.f32 %v1661_v42 }
 0x596   :  { %v6913_v48 = vpop.eup %6912 }
 0x597   :  { %v6915_v53 = vpop.eup %6914  ;;  %v1666_v36 = vmul.f32 %v6913_v48, %v1664_v47 }
 0x598   :  { %v1667_v37 = vmul.f32 %v6915_v53, %v1665_v51 }
 0x599   :  { %v8243_v43 = vadd.f32 %v1672_v38, %v1666_v36 }
 0x59a   :  { %v8245_v34 = vadd.f32 %v1673_v45, %v1667_v37 }
 0x59b   :  { %v1678_v44 = vrot.slane %v8243_v43, 3  ;;  %v8251_v35 = vsel %vm2803_vm6, %v8205_v49, %v8243_v43  ;;  %v1946_v27 = vrot.slane %v8243_v43, 7 }
 0x59c   :  { %v1679_v54 = vrot.slane %v8245_v34, 2  ;;  %v8257_v55 = vsel %vm2803_vm6, %v8210_v52, %v8245_v34  ;;  %v1947_v45 = vrot.slane %v8245_v34, 7 }
 0x59e   :  { %v1680_v56 = vsel %vm850_vm3, %v1679_v54, %v1678_v44 }
 0x59f   :  { %6047 = vmatmul.mubr.msk.f32.vlgmr.msra.gmra.mrb[14].mxu1 %vm570_vm2, %v1680_v56  ;;  %6058 = vmatmul.mubr.msk.f32.vlgmr.msra.gmra.mrb[16].mxu0 %vm570_vm2, %v1680_v56 }
 0x5a0   :  { %6576 = vmatpush3.bf16.msra.mxu1 %v8061_v28  ;;  %6068 = vmatprep.mubr.msk.f32.mxu1 %vm7618_vm1, %v7619_v25 }
 0x5a1   :  { %6577 = vmatprep.subr.bf16.mxu1 %v7617_v16  ;;  %6582 = vmatpush3.bf16.msra.mxu0 %v8027_v13 }
 0x5a2   :  { %6583 = vmatprep.subr.bf16.mxu0 %v7617_v16  ;;  %6079 = vmatprep.mubr.msk.f32.mxu0 %vm7618_vm1, %v7619_v25 }
 0x5a4   :  { %6579 = vmatpush3.bf16.msra.mxu1 %v8068_v31 }
 0x5a5   :  { %6586 = vmatprep.subr.bf16.mxu1 %v7617_v16  ;;  %6585 = vmatpush3.bf16.msra.mxu0 %v8042_v20 }
 0x5a6   :  { %6592 = vmatprep.subr.bf16.mxu0 %v7617_v16 }
 0x5a7   :  { %6069 = vmatmul.mubr.msk.f32.vlgmr.msra.gmra.mrb[16].mxu1 %vm570_vm2, %v1680_v56 }
 0x5a8   :  { %6588 = vmatpush3.bf16.msra.mxu1 %v8038_v19  ;;  %6090 = vmatprep.mubr.msk.f32.mxu1 %vm7618_vm1, %v7619_v25 }
 0x5a9   :  { %6589 = vmatprep.subr.bf16.mxu1 %v7617_v16 }
 0x5ac   :  { %6591 = vmatpush3.bf16.msra.mxu1 %v8050_v26 }
 0x5ad   :  { %6598 = vmatprep.subr.bf16.mxu1 %v7617_v16 }
 0x672   :  { %v1749_v49 = vpop.f32.mrb[14].mxu1  ;;  %v1819_v52 = vpop.f32.mrb[16].mxu0 }
 0x673   :  { %v1894_v57 = vrot.slane %v1749_v49, 4  ;;  %v1895_v58 = vrot.slane %v1749_v49, 5  ;;  %v1913_v59 = vrot.slane %v1819_v52, 4  ;;  %v1914_v60 = vrot.slane %v1819_v52, 5  ;;  %v6048_v61 = vpop.f32.mrb[15].mxu1  ;;  %v6059_v62 = vpop.f32.mrb[17].mxu0 }
 0x675   :  { %v1898_v63 = vadd.f32 %v1894_v57, %v8092_v39  ;;  %v1899_v1 = vadd.f32 %v1895_v58, %v8094_v41  ;;  %v1917_v2 = vadd.f32 %v1913_v59, %v8097_v46  ;;  %v1918_v3 = vadd.f32 %v1914_v60, %v8100_v50 }
 0x677   :  { %v5514_v4 = vmul.f32 -1.442695, %v1898_v63  ;;  %v5515_v5 = vmul.f32 -1.442695, %v1899_v1  ;;  %v5516_v6 = vmul.f32 -1.442695, %v1917_v2 }
 0x678   :  { %v5517_v7 = vmul.f32 -1.442695, %v1918_v3 }
 0x679   :  { %6916 = vpow2.f32 %v5514_v4 }
 0x67a   :  { %6918 = vpow2.f32 %v5515_v5  ;;  %v1889_v8 = vpop.f32.mrb[16].mxu1 }
 0x67b   :  { %6920 = vpow2.f32 %v5516_v6  ;;  %v6070_v10 = vpop.f32.mrb[17].mxu1  ;;  %v1890_v24 = vadd.f32 %v8104_v0, %v1889_v8 }
 0x67c   :  { %6922 = vpow2.f32 %v5517_v7 }
 0x67d   :  { %v1932_v29 = vrot.slane %v1890_v24, 4  ;;  %v1933_v32 = vrot.slane %v1890_v24, 5 }
 0x683   :  { %v6917_v11 = vpop.eup %6916 }
 0x684   :  { %v6919_v14 = vpop.eup %6918  ;;  %v1906_v15 = vadd.f32 1.0, %v6917_v11 }
 0x685   :  { %v6921_v17 = vpop.eup %6920  ;;  %v1907_v18 = vadd.f32 1.0, %v6919_v14 }
 0x686   :  { %v6923_v21 = vpop.eup %6922  ;;  %6924 = vrcp.f32 %v1906_v15  ;;  %v1925_v22 = vadd.f32 1.0, %v6921_v17 }
 0x687   :  { %6926 = vrcp.f32 %v1907_v18  ;;  %v1926_v23 = vadd.f32 1.0, %v6923_v21 }
 0x688   :  { %6928 = vrcp.f32 %v1925_v22 }
 0x689   :  { %6930 = vrcp.f32 %v1926_v23 }
 0x690   :  { %v6925_v30 = vpop.eup %6924 }
 0x691   :  { %v6927_v33 = vpop.eup %6926  ;;  %v1936_v40 = vmul.f32 %v6925_v30, %v1932_v29 }
 0x692   :  { %v6929_v38 = vpop.eup %6928  ;;  %v1937_v42 = vmul.f32 %v6927_v33, %v1933_v32 }
 0x693   :  { %v6931_v47 = vpop.eup %6930  ;;  %v1938_v48 = vadd.f32 %v1936_v40, %v8107_v9  ;;  %v1950_v51 = vmul.f32 %v6929_v38, %v1946_v27  ;;  %v1942_v37 = vsub.f32 1.0, %v6929_v38 }
 0x694   :  { %v1939_v53 = vadd.f32 %v1937_v42, %v8109_v12  ;;  %v1951_v36 = vmul.f32 %v6931_v47, %v1947_v45  ;;  %v1943_v54 = vsub.f32 1.0, %v6931_v47 }
 0x695   :  { %6932 = vtanh.f32 %v1938_v48 }
 0x696   :  { %6934 = vtanh.f32 %v1939_v53 }
 0x69f   :  { %v6933_v44 = vpop.eup %6932 }
 0x6a0   :  { %v6935_v56 = vpop.eup %6934  ;;  %v1944_v49 = vmul.f32 %v6933_v44, %v1942_v37 }
 0x6a1   :  { %v1945_v52 = vmul.f32 %v6935_v56, %v1943_v54 }
 0x6a2   :  { %v8290_v43 = vadd.f32 %v1950_v51, %v1944_v49 }
 0x6a3   :  { %v8292_v57 = vadd.f32 %v1951_v36, %v1945_v52 }
 0x6a4   :  { %v1956_v34 = vrot.slane %v8290_v43, 4  ;;  %v8298_v58 = vsel %vm2806_vm7, %v8251_v35, %v8290_v43  ;;  %v2224_v48 = vrot.slane %v8290_v43, 7 }
 0x6a5   :  { %v1957_v59 = vrot.slane %v8292_v57, 3  ;;  %v8304_v60 = vsel %vm2806_vm7, %v8257_v55, %v8292_v57  ;;  %v2225_v36 = vrot.slane %v8292_v57, 7 }
 0x6a7   :  { %v1958_v61 = vsel %vm850_vm3, %v1957_v59, %v1956_v34 }
 0x6a8   :  { %6080 = vmatmul.mubr.msk.f32.vlgmr.msra.gmra.mrb[18].mxu0 %vm570_vm2, %v1958_v61  ;;  %6091 = vmatmul.mubr.msk.f32.vlgmr.msra.gmra.mrb[18].mxu1 %vm570_vm2, %v1958_v61 }
 0x6a9   :  { %6594 = vmatpush3.bf16.msra.mxu0 %v8061_v28  ;;  %6101 = vmatprep.mubr.msk.f32.mxu0 %vm7618_vm1, %v7619_v25 }
 0x6aa   :  { %6595 = vmatprep.subr.bf16.mxu0 %v7617_v16  ;;  %6600 = vmatpush3.bf16.msra.mxu1 %v8027_v13 }
 0x6ab   :  { %6601 = vmatprep.subr.bf16.mxu1 %v7617_v16  ;;  %6112 = vmatprep.mubr.msk.f32.mxu1 %vm7618_vm1, %v7619_v25 }
 0x6ad   :  { %6597 = vmatpush3.bf16.msra.mxu0 %v8068_v31 }
 0x6ae   :  { %6604 = vmatprep.subr.bf16.mxu0 %v7617_v16  ;;  %6603 = vmatpush3.bf16.msra.mxu1 %v8042_v20 }
 0x6af   :  { %6610 = vmatprep.subr.bf16.mxu1 %v7617_v16 }
 0x6b0   :  { %6102 = vmatmul.mubr.msk.f32.vlgmr.msra.gmra.mrb[20].mxu0 %vm570_vm2, %v1958_v61 }
 0x6b1   :  { %6606 = vmatpush3.bf16.msra.mxu0 %v8038_v19  ;;  %6123 = vmatprep.mubr.msk.f32.mxu0 %vm7618_vm1, %v7619_v25 }
 0x6b2   :  { %6607 = vmatprep.subr.bf16.mxu0 %v7617_v16 }
 0x6b5   :  { %6609 = vmatpush3.bf16.msra.mxu0 %v8050_v26 }
 0x6b6   :  { %6616 = vmatprep.subr.bf16.mxu0 %v7617_v16 }
 0x77b   :  { %v2027_v35 = vpop.f32.mrb[18].mxu0  ;;  %v2097_v55 = vpop.f32.mrb[18].mxu1 }
 0x77c   :  { %v2172_v62 = vrot.slane %v2027_v35, 3  ;;  %v2173_v63 = vrot.slane %v2027_v35, 4  ;;  %v2191_v1 = vrot.slane %v2097_v55, 3  ;;  %v2192_v2 = vrot.slane %v2097_v55, 4  ;;  %v6081_v3 = vpop.f32.mrb[19].mxu0  ;;  %v6092_v4 = vpop.f32.mrb[19].mxu1 }
 0x77e   :  { %v2176_v5 = vadd.f32 %v2172_v62, %v8092_v39  ;;  %v2177_v6 = vadd.f32 %v2173_v63, %v8094_v41  ;;  %v2195_v7 = vadd.f32 %v2191_v1, %v8097_v46  ;;  %v2196_v8 = vadd.f32 %v2192_v2, %v8100_v50 }
 0x780   :  { %v5521_v10 = vmul.f32 -1.442695, %v2176_v5  ;;  %v5522_v11 = vmul.f32 -1.442695, %v2177_v6  ;;  %v5523_v14 = vmul.f32 -1.442695, %v2195_v7 }
 0x781   :  { %v5524_v15 = vmul.f32 -1.442695, %v2196_v8 }
 0x782   :  { %6936 = vpow2.f32 %v5521_v10 }
 0x783   :  { %6938 = vpow2.f32 %v5522_v11  ;;  %v2167_v17 = vpop.f32.mrb[20].mxu0 }
 0x784   :  { %6940 = vpow2.f32 %v5523_v14  ;;  %v6103_v18 = vpop.f32.mrb[21].mxu0  ;;  %v2168_v40 = vadd.f32 %v8104_v0, %v2167_v17 }
 0x785   :  { %6942 = vpow2.f32 %v5524_v15 }
 0x786   :  { %v2210_v27 = vrot.slane %v2168_v40, 3  ;;  %v2211_v42 = vrot.slane %v2168_v40, 4 }
 0x78c   :  { %v6937_v21 = vpop.eup %6936 }
 0x78d   :  { %v6939_v22 = vpop.eup %6938  ;;  %v2184_v23 = vadd.f32 1.0, %v6937_v21 }
 0x78e   :  { %v6941_v24 = vpop.eup %6940  ;;  %v2185_v29 = vadd.f32 1.0, %v6939_v22 }
 0x78f   :  { %v6943_v30 = vpop.eup %6942  ;;  %6944 = vrcp.f32 %v2184_v23  ;;  %v2203_v32 = vadd.f32 1.0, %v6941_v24 }
 0x790   :  { %6946 = vrcp.f32 %v2185_v29  ;;  %v2204_v33 = vadd.f32 1.0, %v6943_v30 }
 0x791   :  { %6948 = vrcp.f32 %v2203_v32 }
 0x792   :  { %6950 = vrcp.f32 %v2204_v33 }
 0x799   :  { %v6945_v38 = vpop.eup %6944 }
 0x79a   :  { %v6947_v45 = vpop.eup %6946  ;;  %v2214_v47 = vmul.f32 %v6945_v38, %v2210_v27 }
 0x79b   :  { %v6949_v51 = vpop.eup %6948  ;;  %v2215_v53 = vmul.f32 %v6947_v45, %v2211_v42 }
 0x79c   :  { %v6951_v37 = vpop.eup %6950  ;;  %v2216_v44 = vadd.f32 %v2214_v47, %v8107_v9  ;;  %v2228_v54 = vmul.f32 %v6949_v51, %v2224_v48  ;;  %v2220_v52 = vsub.f32 1.0, %v6949_v51 }
 0x79d   :  { %v2217_v56 = vadd.f32 %v2215_v53, %v8109_v12  ;;  %v2229_v49 = vmul.f32 %v6951_v37, %v2225_v36  ;;  %v2221_v59 = vsub.f32 1.0, %v6951_v37 }
 0x79e   :  { %6952 = vtanh.f32 %v2216_v44 }
 0x79f   :  { %6954 = vtanh.f32 %v2217_v56 }
 0x7a8   :  { %v6953_v34 = vpop.eup %6952 }
 0x7a9   :  { %v6955_v61 = vpop.eup %6954  ;;  %v2222_v35 = vmul.f32 %v6953_v34, %v2220_v52 }
 0x7aa   :  { %v2223_v55 = vmul.f32 %v6955_v61, %v2221_v59 }
 0x7ab   :  { %v8337_v43 = vadd.f32 %v2228_v54, %v2222_v35 }
 0x7ac   :  { %v8339_v62 = vadd.f32 %v2229_v49, %v2223_v55 }
 0x7ad   :  { %v2234_v57 = vrot.slane %v8337_v43, 5  ;;  %v8345_v63 = vsel %vm2809_vm8, %v8298_v58, %v8337_v43  ;;  %v2502_v51 = vrot.slane %v8337_v43, 7 }
 0x7ae   :  { %v2235_v1 = vrot.slane %v8339_v62, 4  ;;  %v8351_v2 = vsel %vm2809_vm8, %v8304_v60, %v8339_v62  ;;  %v2503_v37 = vrot.slane %v8339_v62, 7 }
 0x7b0   :  { %v2236_v3 = vsel %vm850_vm3, %v2235_v1, %v2234_v57 }
 0x7b1   :  { %6113 = vmatmul.mubr.msk.f32.vlgmr.msra.gmra.mrb[20].mxu1 %vm570_vm2, %v2236_v3  ;;  %6124 = vmatmul.mubr.msk.f32.vlgmr.msra.gmra.mrb[22].mxu0 %vm570_vm2, %v2236_v3 }
 0x7b2   :  { %6612 = vmatpush3.bf16.msra.mxu1 %v8061_v28  ;;  %6134 = vmatprep.mubr.msk.f32.mxu1 %vm7618_vm1, %v7619_v25 }
 0x7b3   :  { %6613 = vmatprep.subr.bf16.mxu1 %v7617_v16  ;;  %6618 = vmatpush3.bf16.msra.mxu0 %v8027_v13 }
 0x7b4   :  { %6619 = vmatprep.subr.bf16.mxu0 %v7617_v16  ;;  %6145 = vmatprep.mubr.msk.f32.mxu0 %vm7618_vm1, %v7619_v25 }
 0x7b6   :  { %6615 = vmatpush3.bf16.msra.mxu1 %v8068_v31 }
 0x7b7   :  { %6622 = vmatprep.subr.bf16.mxu1 %v7617_v16  ;;  %6621 = vmatpush3.bf16.msra.mxu0 %v8042_v20 }
 0x7b8   :  { %6628 = vmatprep.subr.bf16.mxu0 %v7617_v16 }
 0x7b9   :  { %6135 = vmatmul.mubr.msk.f32.vlgmr.msra.gmra.mrb[22].mxu1 %vm570_vm2, %v2236_v3 }
 0x7ba   :  { %6624 = vmatpush3.bf16.msra.mxu1 %v8038_v19  ;;  %6156 = vmatprep.mubr.msk.f32.mxu1 %vm7618_vm1, %v7619_v25 }
 0x7bb   :  { %6625 = vmatprep.subr.bf16.mxu1 %v7617_v16 }
 0x7be   :  { %6627 = vmatpush3.bf16.msra.mxu1 %v8050_v26 }
 0x884   :  { %v2305_v13 = vpop.f32.mrb[20].mxu1  ;;  %v2375_v58 = vpop.f32.mrb[22].mxu0 }
 0x885   :  { %v2450_v60 = vrot.slane %v2305_v13, 2  ;;  %v2451_v4 = vrot.slane %v2305_v13, 3  ;;  %v2469_v5 = vrot.slane %v2375_v58, 2  ;;  %v2470_v6 = vrot.slane %v2375_v58, 3  ;;  %v6114_v20 = vpop.f32.mrb[21].mxu1  ;;  %v6125_v7 = vpop.f32.mrb[23].mxu0 }
 0x886   :  { %v2925_v7 = vld [vmem:[%s8898_s13 + $0x10] sm:$0xff] }
 0x887   :  { %v2454_v8 = vadd.f32 %v2450_v60, %v8092_v39  ;;  %v2455_v10 = vadd.f32 %v2451_v4, %v8094_v41  ;;  %v2473_v19 = vadd.f32 %v2469_v5, %v8097_v46  ;;  %v2474_v11 = vadd.f32 %v2470_v6, %v8100_v50  ;;  %v2924_v4 = vld [vmem:[%s8898_s13 + $0x8] sm:$0xff]  ;;  %v2834_v5 = vld [vmem:[%s8897_s12 + $0x18] sm:$0xff] }
 0x889   :  { %v5528_v14 = vmul.f32 -1.442695, %v2454_v8  ;;  %v5529_v15 = vmul.f32 -1.442695, %v2455_v10  ;;  %v5530_v17 = vmul.f32 -1.442695, %v2473_v19 }
 0x88a   :  { %v5531_v26 = vmul.f32 -1.442695, %v2474_v11  ;;  %v2926_v8 = vld [vmem:[%s8898_s13 + $0x18] sm:$0xff]  ;;  %v3010_v11 = vld [vmem:[#allocation17 + $0x8] sm:$0xff] }
 0x88b   :  { %6956 = vpow2.f32 %v5528_v14  ;;  %v6646_v10 = vpack.c.bf16 %v2926_v8, %v2925_v7  ;;  %v3009_v19 = vld [vmem:[#allocation17] sm:$0xff] }
 0x88c   :  { %6958 = vpow2.f32 %v5529_v15  ;;  %v2445_v18 = vpop.f32.mrb[22].mxu1  ;;  %v8433_v14 = vpack.c.bf16 %v3010_v11, %v3009_v19  ;;  %v2820_v19 = vld [vmem:[#allocation19 + $0x10] sm:$0xff]  ;;  %v2821_v11 = vld [vmem:[#allocation19 + $0x18] sm:$0xff] }
 0x88d   :  { %6960 = vpow2.f32 %v5530_v17  ;;  %v6136_v21 = vpop.f32.mrb[23].mxu1  ;;  %v2446_v27 = vadd.f32 %v8104_v0, %v2445_v18 }
 0x88e   :  { %6962 = vpow2.f32 %v5531_v26 }
 0x88f   :  { %v2488_v38 = vrot.slane %v2446_v27, 2  ;;  %v2489_v45 = vrot.slane %v2446_v27, 3 }
 0x895   :  { %v6957_v22 = vpop.eup %6956 }
 0x896   :  { %v6959_v23 = vpop.eup %6958  ;;  %v2462_v24 = vadd.f32 1.0, %v6957_v22 }
 0x897   :  { %v6961_v29 = vpop.eup %6960  ;;  %v2463_v30 = vadd.f32 1.0, %v6959_v23 }
 0x898   :  { %v6963_v32 = vpop.eup %6962  ;;  %6964 = vrcp.f32 %v2462_v24  ;;  %v2481_v33 = vadd.f32 1.0, %v6961_v29 }
 0x899   :  { %6966 = vrcp.f32 %v2463_v30  ;;  %v2482_v40 = vadd.f32 1.0, %v6963_v32 }
 0x89a   :  { %6968 = vrcp.f32 %v2481_v33 }
 0x89b   :  { %6970 = vrcp.f32 %v2482_v40 }
 0x8a2   :  { %v6965_v42 = vpop.eup %6964 }
 0x8a3   :  { %v6967_v47 = vpop.eup %6966  ;;  %v2492_v48 = vmul.f32 %v6965_v42, %v2488_v38 }
 0x8a4   :  { %v6969_v53 = vpop.eup %6968  ;;  %v2493_v36 = vmul.f32 %v6967_v47, %v2489_v45 }
 0x8a5   :  { %v6971_v44 = vpop.eup %6970  ;;  %v2494_v54 = vadd.f32 %v2492_v48, %v8107_v9  ;;  %v2506_v56 = vmul.f32 %v6969_v53, %v2502_v51  ;;  %v2498_v0 = vsub.f32 1.0, %v6969_v53 }
 0x8a6   :  { %v2495_v49 = vadd.f32 %v2493_v36, %v8109_v12  ;;  %v2507_v52 = vmul.f32 %v6971_v44, %v2503_v37  ;;  %v2499_v59 = vsub.f32 1.0, %v6971_v44  ;;  %v7156_v37 = vld [vmem:[#allocation16] ss:$0 sm:$0xff] }
 0x8a7   :  { %6972 = vtanh.f32 %v2494_v54 }
 0x8a8   :  { %6974 = vtanh.f32 %v2495_v49 }
 0x8b1   :  { %v6973_v34 = vpop.eup %6972 }
 0x8b2   :  { %v6975_v61 = vpop.eup %6974  ;;  %v2500_v35 = vmul.f32 %v6973_v34, %v2498_v0 }
 0x8b3   :  { %v2501_v55 = vmul.f32 %v6975_v61, %v2499_v59 }
 0x8b4   :  { %v8383_v43 = vadd.f32 %v2506_v56, %v2500_v35 }
 0x8b5   :  { %v8385_v57 = vadd.f32 %v2507_v52, %v2501_v55 }
 0x8b6   :  { %v2512_v62 = vrot.slane %v8383_v43, 6  ;;  %v8391_v1 = vsel %vm2812_vm9, %v8345_v63, %v8383_v43  ;;  %v2831_v63 = vld [vmem:[%s8897_s12] sm:$0xff]  ;;  %v2780_v34 = vrot.slane %v8383_v43, 7 }
 0x8b7   :  { %v2513_v3 = vrot.slane %v8385_v57, 5  ;;  %v8397_v13 = vsel %vm2812_vm9, %v8351_v2, %v8385_v57  ;;  %v2832_v2 = vld [vmem:[%s8897_s12 + $0x8] sm:$0xff]  ;;  %v2781_v35 = vrot.slane %v8385_v57, 7  ;;  %v2819_v43 = vld [vmem:[#allocation19 + $0x8] sm:$0xff] }
 0x8b8   :  { %v6634_v60 = vpack.c.bf16 %v2832_v2, %v2831_v63  ;;  %v3011_v57 = vld [vmem:[#allocation17 + $0x10] sm:$0xff] }
 0x8b9   :  { %v2514_v58 = vsel %vm850_vm3, %v2513_v3, %v2512_v62 }
 0x8ba   :  { %6146 = vmatmul.mubr.msk.f32.vlgmr.msra.gmra.mrb[24].mxu0 %vm570_vm2, %v2514_v58  ;;  %6157 = vmatmul.mubr.msk.f32.vlgmr.msra.gmra.mrb[24].mxu1 %vm570_vm2, %v2514_v58 }
 0x8bb   :  { %6630 = vmatpush3.bf16.msra.mxu0 %v8061_v28  ;;  %6167 = vmatprep.mubr.msk.f32.mxu0 %vm7618_vm1, %v7619_v25  ;;  %v2923_v28 = vld [vmem:[%s8898_s13] sm:$0xff] }
 0x8bc   :  { %6631 = vmatprep.subr.bf16.mxu0 %v7617_v16  ;;  %v6642_v6 = vpack.c.bf16 %v2924_v4, %v2923_v28  ;;  %6635 = vmatprep.subr.bf16.mxu1 %v6634_v60 }
 0x8bd   :  { %6637 = vmatpush3.bf16.msra.mxu1 %v6634_v60 }
 0x8bf   :  { %6633 = vmatpush3.bf16.msra.mxu0 %v8068_v31  ;;  %v2833_v31 = vld [vmem:[%s8897_s12 + $0x10] sm:$0xff] }
 0x8c0   :  { %v6638_v20 = vpack.c.bf16 %v2834_v5, %v2833_v31  ;;  %6643 = vmatprep.subr.bf16.mxu0 %v6642_v6  ;;  %v2818_v5 = vld [vmem:[#allocation19] sm:$0xff] }
 0x8c1   :  { %v8444_v8 = vpack.c.bf16 %v2819_v43, %v2818_v5 }
 0x8c2   :  { %6168 = vmatmul.mubr.msk.f32.vlgmr.msra.gmra.mrb[26].mxu0 %vm570_vm2, %v2514_v58  ;;  %6639 = vmatprep.subr.bf16.mxu1 %v6638_v20 }
 0x8c3   :  { %6645 = vmatpush3.bf16.msra.mxu0 %v6642_v6  ;;  %6641 = vmatpush3.bf16.msra.mxu1 %v6638_v20  ;;  %v3012_v20 = vld [vmem:[#allocation17 + $0x18] sm:$0xff] }
 0x8c4   :  { %6647 = vmatprep.subr.bf16.mxu0 %v6646_v10  ;;  %6651 = vmatprep.subr.bf16.mxu1 %v8433_v14 }
 0x8c7   :  { %6649 = vmatpush3.bf16.msra.mxu0 %v6646_v10  ;;  %v6654_v10 = vpack.c.bf16 %v3012_v20, %v3011_v57  ;;  %v5545_v57 = vld [vmem:[#allocation26] ss:$0 sm:$0xff] }
 0x8c8   :  { %6658 = vmatprep.subr.bf16.mxu0 %v7617_v16 }
 0x98d   :  { %v2583_v15 = vpop.f32.mrb[24].mxu0  ;;  %v2653_v17 = vpop.f32.mrb[24].mxu1 }
 0x98e   :  { %v2728_v26 = vrot.slane %v2583_v15, 1  ;;  %v2729_v18 = vrot.slane %v2583_v15, 2  ;;  %v2747_v21 = vrot.slane %v2653_v17, 1  ;;  %v2748_v22 = vrot.slane %v2653_v17, 2  ;;  %v6147_v23 = vpop.f32.mrb[25].mxu0  ;;  %v6158_v24 = vpop.f32.mrb[25].mxu1 }
 0x98f   :  { %v2824_v23 = vld [vmem:[#allocation20 + $0x10] sm:$0xff]  ;;  %v2825_v24 = vld [vmem:[#allocation20 + $0x18] sm:$0xff] }
 0x990   :  { %v2732_v29 = vadd.f32 %v2728_v26, %v8092_v39  ;;  %v2733_v30 = vadd.f32 %v2729_v18, %v8094_v41  ;;  %v2751_v32 = vadd.f32 %v2747_v21, %v8097_v46  ;;  %v2752_v33 = vadd.f32 %v2748_v22, %v8100_v50  ;;  %v2822_v26 = vld [vmem:[#allocation20] sm:$0xff]  ;;  %v2823_v18 = vld [vmem:[#allocation20 + $0x8] sm:$0xff] }
 0x991   :  { %v2827_v21 = vld [vmem:[#allocation22 + $0x8] sm:$0xff]  ;;  %v8470_v22 = vpack.c.bf16 %v2823_v18, %v2822_v26 }
 0x992   :  { %v5535_v40 = vmul.f32 -1.442695, %v2732_v29  ;;  %v5536_v27 = vmul.f32 -1.442695, %v2733_v30  ;;  %v5537_v38 = vmul.f32 -1.442695, %v2751_v32 }
 0x993   :  { %v5538_v42 = vmul.f32 -1.442695, %v2752_v33  ;;  %v2828_v30 = vld [vmem:[#allocation22 + $0x10] sm:$0xff]  ;;  %v2829_v32 = vld [vmem:[#allocation22 + $0x18] sm:$0xff]  ;;  %v8480_v33 = vpack.c.bf16 %v2825_v24, %v2824_v23 }
 0x994   :  { %6976 = vpow2.f32 %v5535_v40  ;;  %v8486_v40 = vpack.c.bf16 %v2829_v32, %v2828_v30 }
 0x995   :  { %6978 = vpow2.f32 %v5536_v27  ;;  %v2723_v45 = vpop.f32.mrb[26].mxu0 }
 0x996   :  { %6980 = vpow2.f32 %v5537_v38  ;;  %v6169_v47 = vpop.f32.mrb[27].mxu0  ;;  %v2724_v44 = vadd.f32 %v7156_v37, %v2723_v45 }
 0x997   :  { %6982 = vpow2.f32 %v5538_v42  ;;  %v5539_v47 = vld [vmem:[#allocation23] ss:$0 sm:$0xff] }
 0x998   :  { %v2766_v54 = vrot.slane %v2724_v44, 1  ;;  %v2767_v49 = vrot.slane %v2724_v44, 2 }
 0x99e   :  { %v6977_v48 = vpop.eup %6976 }
 0x99f   :  { %v6979_v51 = vpop.eup %6978  ;;  %v2740_v53 = vadd.f32 1.0, %v6977_v48 }
 0x9a0   :  { %v6981_v39 = vpop.eup %6980  ;;  %v2741_v36 = vadd.f32 1.0, %v6979_v51 }
 0x9a1   :  { %v6983_v41 = vpop.eup %6982  ;;  %6984 = vrcp.f32 %v2740_v53  ;;  %v2759_v46 = vadd.f32 1.0, %v6981_v39 }
 0x9a2   :  { %6986 = vrcp.f32 %v2741_v36  ;;  %v2760_v50 = vadd.f32 1.0, %v6983_v41 }
 0x9a3   :  { %6988 = vrcp.f32 %v2759_v46 }
 0x9a4   :  { %6990 = vrcp.f32 %v2760_v50 }
 0x9ab   :  { %v6985_v56 = vpop.eup %6984 }
 0x9ac   :  { %v6987_v52 = vpop.eup %6986  ;;  %v2770_v0 = vmul.f32 %v6985_v56, %v2766_v54  ;;  %v5542_v54 = vld [vmem:[#allocation25] ss:$0 sm:$0xff] }
 0x9ad   :  { %v6989_v59 = vpop.eup %6988  ;;  %v2771_v61 = vmul.f32 %v6987_v52, %v2767_v49 }
 0x9ae   :  { %v6991_v55 = vpop.eup %6990  ;;  %v2772_v62 = vadd.f32 %v2770_v0, %v8107_v9  ;;  %v2784_v3 = vmul.f32 %v6989_v59, %v2780_v34  ;;  %v2776_v2 = vsub.f32 1.0, %v6989_v59 }
 0x9af   :  { %v2773_v58 = vadd.f32 %v2771_v61, %v8109_v12  ;;  %v2785_v63 = vmul.f32 %v6991_v55, %v2781_v35  ;;  %v2777_v60 = vsub.f32 1.0, %v6991_v55 }
 0x9b0   :  { %6992 = vtanh.f32 %v2772_v62 }
 0x9b1   :  { %6994 = vtanh.f32 %v2773_v58 }
 0x9ba   :  { %v6993_v28 = vpop.eup %6992 }
 0x9bb   :  { %v6995_v4 = vpop.eup %6994  ;;  %v2778_v31 = vmul.f32 %v6993_v28, %v2776_v2 }
 0x9bc   :  { %v2779_v6 = vmul.f32 %v6995_v4, %v2777_v60  ;;  %v8523_v4 = vld [vmem:[#allocation28] ss:$0 sm:$0xff] }
 0x9bd   :  { %v2786_v7 = vadd.f32 %v2784_v3, %v2778_v31 }
 0x9be   :  { %v2787_v9 = vadd.f32 %v2785_v63, %v2779_v6 }
 0x9bf   :  { %2794 = vst.msk [vmem:[#allocation30 - $0x7] sm:$0x80] %vm2793_vm10, %v2786_v7  ;;  %v2816_v12 = vsel %vm2815_vm11, %v8391_v1, %v2786_v7  ;;  %v8457_v1 = vpack.c.bf16 %v2821_v11, %v2820_v19 }
 0x9c0   :  { %6178 = vmatprep.mubr.msk.f32.mxu1 %vm570_vm2, %v2816_v12  ;;  %6189 = vmatprep.mubr.msk.f32.mxu0 %vm570_vm2, %v2816_v12  ;;  %v2790_v15 = vrot.slane %v2787_v9, 7  ;;  %v2817_v17 = vsel %vm2815_vm11, %v8397_v13, %v2787_v9  ;;  %v2826_v13 = vld [vmem:[#allocation22] sm:$0xff] }
 0x9c1   :  { %6179 = vmatmul.mubr.msk.f32.vlgmr.msra.gmra.mrb[26].mxu1 %vm570_vm2, %v2817_v17  ;;  %6190 = vmatmul.mubr.msk.f32.vlgmr.msra.gmra.mrb[28].mxu0 %vm570_vm2, %v2817_v17  ;;  %v8474_v29 = vpack.c.bf16 %v2827_v21, %v2826_v13 }
 0x9c2   :  { %6653 = vmatpush3.bf16.msra.mxu1 %v8433_v14  ;;  %6660 = vmatpush3.bf16.msra.mxu0 %v8444_v8  ;;  %2796 = vst.msk [vmem:[#allocation30 + $0x1] sm:$0x1] %vm2795_vm12, %v2790_v15  ;;  %v8468_v14 = vld [vmem:[%s8945_s9 + $0x2] sm:$0x3] }
 0x9c3   :  { %6200 = vmatprep.mubr.msk.f32.mxu1 %vm570_vm2, %v2816_v12  ;;  %6655 = vmatprep.subr.bf16.mxu1 %v6654_v10  ;;  %v3366_v21 = vrot.slane %v8468_v14, 1 }
 0x9c4   :  { %6661 = vmatprep.subr.bf16.mxu0 %v7617_v16  ;;  %6211 = vmatprep.mubr.msk.f32.mxu0 %vm7618_vm1, %v7619_v25 }
 0x9c6   :  { %6657 = vmatpush3.bf16.msra.mxu1 %v6654_v10  ;;  %6663 = vmatpush3.bf16.msra.mxu0 %v8457_v1 }
 0x9c7   :  { %6664 = vmatprep.subr.bf16.mxu1 %v7617_v16  ;;  %6670 = vmatprep.subr.bf16.mxu0 %v7617_v16 }
 0x9c9   :  { %6201 = vmatmul.mubr.msk.f32.vlgmr.msra.gmra.mrb[28].mxu1 %vm570_vm2, %v2817_v17  ;;  %6212 = vmatmul.mubr.msk.f32.vlgmr.msra.gmra.mrb[30].mxu0 %vm570_vm2, %v8468_v14 }
 0x9ca   :  { %6666 = vmatpush3.bf16.msra.mxu1 %v8470_v22  ;;  %6222 = vmatprep.mubr.msk.f32.mxu1 %vm7618_vm1, %v7619_v25 }
 0x9cb   :  { %6667 = vmatprep.subr.bf16.mxu1 %v7617_v16  ;;  %6672 = vmatpush3.bf16.msra.mxu0 %v8474_v29 }
 0x9cc   :  { %6673 = vmatprep.subr.bf16.mxu0 %v7617_v16  ;;  %6233 = vmatprep.mubr.msk.f32.mxu0 %vm7618_vm1, %v7619_v25 }
 0x9ce   :  { %6669 = vmatpush3.bf16.msra.mxu1 %v8480_v33 }
 0x9cf   :  { %6675 = vmatpush3.bf16.msra.mxu0 %v8486_v40  ;;  %6676 = vmatprep.subr.bf16.mxu1 %v7617_v16 }
 0x9d0   :  { %6682 = vmatprep.subr.bf16.mxu0 %v7617_v16 }
 0x9d1   :  { %6223 = vmatmul.mubr.msk.f32.vlgmr.msra.gmra.mrb[30].mxu1 %vm570_vm2, %v8468_v14 }
 0x9d2   :  { %6234 = vmatmul.mubr.msk.f32.vlgmr.msra.gmra.mrb[32].mxu0 %vm570_vm2, %v8468_v14  ;;  %6678 = vmatpush3.bf16.msra.mxu1 %v8444_v8 }
 0x9d3   :  { %6684 = vmatpush3.bf16.msra.mxu0 %v8470_v22  ;;  %6679 = vmatprep.subr.bf16.mxu1 %v7617_v16 }
 0x9d4   :  { %6685 = vmatprep.subr.bf16.mxu0 %v7617_v16  ;;  %6244 = vmatprep.mubr.msk.f32.mxu1 %vm7618_vm1, %v7619_v25 }
 0x9d5   :  { %6255 = vmatprep.mubr.msk.f32.mxu0 %vm7618_vm1, %v7619_v25 }
 0x9d6   :  { %6681 = vmatpush3.bf16.msra.mxu1 %v8457_v1 }
 0x9d7   :  { %6687 = vmatpush3.bf16.msra.mxu0 %v8480_v33  ;;  %6688 = vmatprep.subr.bf16.mxu1 %v7617_v16 }
 0x9d8   :  { %6694 = vmatprep.subr.bf16.mxu0 %v7617_v16 }
 0xa94   :  { %v6180_v27 = vpop.f32.mrb[26].mxu1  ;;  %v6191_v38 = vpop.f32.mrb[28].mxu0 }
 0xa95   :  { %v2914_v42 = vpop.f32.mrb[27].mxu1  ;;  %v3000_v45 = vpop.f32.mrb[29].mxu0  ;;  %v8513_v39 = vadd.f32 %v6180_v27, %v5539_v47  ;;  %v8519_v0 = vadd.f32 %v6191_v38, %v5542_v54 }
 0xa96   :  { %v8511_v48 = vadd.f32 %v5539_v47, %v2914_v42  ;;  %v8517_v49 = vadd.f32 %v5542_v54, %v3000_v45 }
 0xa9c   :  { %v6202_v51 = vpop.f32.mrb[28].mxu1  ;;  %v3166_v53 = vpop.f32.mrb[30].mxu0 }
 0xa9d   :  { %v3317_v36 = vrot.slane %v3166_v53, 1  ;;  %v3320_v41 = vadd.f32 %v3166_v53, %v8511_v48  ;;  %v3086_v46 = vpop.f32.mrb[29].mxu1  ;;  %v6213_v50 = vpop.f32.mrb[31].mxu0  ;;  %v8528_v11 = vadd.f32 %v6202_v51, %v5545_v57 }
 0xa9e   :  { %v8526_v12 = vadd.f32 %v5545_v57, %v3086_v46 }
 0xa9f   :  { %v3321_v37 = vadd.f32 %v3317_v36, %v8513_v39  ;;  %v5553_v44 = vmul.f32 -1.442695, %v3320_v41 }
 0xaa1   :  { %6996 = vpow2.f32 %v5553_v44  ;;  %v5554_v56 = vmul.f32 -1.442695, %v3321_v37 }
 0xaa3   :  { %6998 = vpow2.f32 %v5554_v56 }
 0xaa4   :  { %v3236_v52 = vpop.f32.mrb[30].mxu1 }
 0xaa5   :  { %v3335_v34 = vrot.slane %v3236_v52, 1  ;;  %v3338_v59 = vadd.f32 %v3236_v52, %v8517_v49  ;;  %v6224_v61 = vpop.f32.mrb[31].mxu1  ;;  %v3312_v35 = vpop.f32.mrb[32].mxu0 }
 0xaa6   :  { %v6235_v55 = vpop.f32.mrb[33].mxu0  ;;  %v3313_v5 = vadd.f32 %v8523_v4, %v3312_v35 }
 0xaa7   :  { %v3339_v62 = vadd.f32 %v3335_v34, %v8519_v0  ;;  %v5555_v3 = vmul.f32 -1.442695, %v3338_v59 }
 0xaa8   :  { %v3353_v7 = vrot.slane %v3313_v5, 1 }
 0xaa9   :  { %7000 = vpow2.f32 %v5555_v3  ;;  %v5556_v58 = vmul.f32 -1.442695, %v3339_v62 }
 0xaab   :  { %v6997_v63 = vpop.eup %6996  ;;  %7002 = vpow2.f32 %v5556_v58 }
 0xaac   :  { %v3328_v2 = vadd.f32 1.0, %v6997_v63 }
 0xaad   :  { %v6999_v28 = vpop.eup %6998 }
 0xaae   :  { %v3329_v60 = vadd.f32 1.0, %v6999_v28  ;;  %7004 = vrcp.f32 %v3328_v2 }
 0xab0   :  { %7006 = vrcp.f32 %v3329_v60 }
 0xab3   :  { %v7001_v31 = vpop.eup %7000 }
 0xab4   :  { %v3346_v6 = vadd.f32 1.0, %v7001_v31 }
 0xab5   :  { %v7003_v43 = vpop.eup %7002 }
 0xab6   :  { %v3347_v20 = vadd.f32 1.0, %v7003_v43  ;;  %7008 = vrcp.f32 %v3346_v6 }
 0xab8   :  { %v7005_v9 = vpop.eup %7004  ;;  %7010 = vrcp.f32 %v3347_v20 }
 0xab9   :  { %v3356_v10 = vmul.f32 %v7005_v9, %v3313_v5 }
 0xaba   :  { %v7007_v19 = vpop.eup %7006 }
 0xabb   :  { %v3357_v15 = vmul.f32 %v7007_v19, %v3353_v7  ;;  %v3358_v17 = vadd.f32 %v3356_v10, %v8526_v12 }
 0xabd   :  { %v3359_v26 = vadd.f32 %v3357_v15, %v8528_v11  ;;  %7012 = vtanh.f32 %v3358_v17 }
 0xabf   :  { %7014 = vtanh.f32 %v3359_v26 }
 0xac0   :  { %v7009_v18 = vpop.eup %7008 }
 0xac1   :  { %v3362_v23 = vsub.f32 1.0, %v7009_v18  ;;  %v3369_v27 = vmul.f32 %v7009_v18, %v8468_v14 }
 0xac2   :  { %v7011_v13 = vpop.eup %7010 }
 0xac3   :  { %v3363_v30 = vsub.f32 1.0, %v7011_v13  ;;  %v3370_v45 = vmul.f32 %v7011_v13, %v3366_v21 }
 0xac7   :  { %v7013_v24 = vpop.eup %7012 }
 0xac8   :  { %v3364_v32 = vmul.f32 %v7013_v24, %v3362_v23 }
 0xac9   :  { %v7015_v38 = vpop.eup %7014 }
 0xaca   :  { %v3365_v42 = vmul.f32 %v7015_v38, %v3363_v30  ;;  %v8534_v47 = vadd.f32 %v3369_v27, %v3364_v32 }
 0xacc   :  { %v8536_v51 = vadd.f32 %v3370_v45, %v3365_v42  ;;  %v3639_v21 = vrot.slane %v8534_v47, 7 }
 0xace   :  { %v3375_v53 = vrot.slane %v8536_v51, 7 }
 0xad0   :  { %v3376_v36 = vsel %vm850_vm3, %v3375_v53, %v8534_v47 }
 0xad1   :  { %6245 = vmatmul.mubr.msk.f32.vlgmr.msra.gmra.mrb[32].mxu1 %vm570_vm2, %v3376_v36  ;;  %6256 = vmatmul.mubr.msk.f32.vlgmr.msra.gmra.mrb[34].mxu0 %vm570_vm2, %v3376_v36 }
 0xad2   :  { %6690 = vmatpush3.bf16.msra.mxu1 %v8474_v29  ;;  %6266 = vmatprep.mubr.msk.f32.mxu1 %vm7618_vm1, %v7619_v25 }
 0xad3   :  { %6691 = vmatprep.subr.bf16.mxu1 %v7617_v16  ;;  %6696 = vmatpush3.bf16.msra.mxu0 %v8444_v8 }
 0xad4   :  { %6697 = vmatprep.subr.bf16.mxu0 %v7617_v16  ;;  %6277 = vmatprep.mubr.msk.f32.mxu0 %vm7618_vm1, %v7619_v25 }
 0xad6   :  { %6693 = vmatpush3.bf16.msra.mxu1 %v8486_v40 }
 0xad7   :  { %6700 = vmatprep.subr.bf16.mxu1 %v7617_v16  ;;  %6699 = vmatpush3.bf16.msra.mxu0 %v8457_v1 }
 0xad8   :  { %6706 = vmatprep.subr.bf16.mxu0 %v7617_v16 }
 0xad9   :  { %6267 = vmatmul.mubr.msk.f32.vlgmr.msra.gmra.mrb[34].mxu1 %vm570_vm2, %v3376_v36 }
 0xada   :  { %6702 = vmatpush3.bf16.msra.mxu1 %v8470_v22  ;;  %6288 = vmatprep.mubr.msk.f32.mxu1 %vm7618_vm1, %v7619_v25 }
 0xadb   :  { %6703 = vmatprep.subr.bf16.mxu1 %v7617_v16 }
 0xade   :  { %6705 = vmatpush3.bf16.msra.mxu1 %v8480_v33 }
 0xadf   :  { %6712 = vmatprep.subr.bf16.mxu1 %v7617_v16 }
 0xba4   :  { %v3445_v14 = vpop.f32.mrb[32].mxu1  ;;  %v3515_v41 = vpop.f32.mrb[34].mxu0 }
 0xba5   :  { %v3590_v46 = vrot.slane %v3445_v14, 7  ;;  %v3594_v50 = vadd.f32 %v3445_v14, %v8513_v39  ;;  %v6246_v37 = vpop.f32.mrb[33].mxu1  ;;  %v6257_v44 = vpop.f32.mrb[35].mxu0  ;;  %v3608_v54 = vrot.slane %v3515_v41, 7  ;;  %v3612_v34 = vadd.f32 %v3515_v41, %v8519_v0 }
 0xba7   :  { %v3593_v56 = vadd.f32 %v3590_v46, %v8511_v48  ;;  %v5561_v52 = vmul.f32 -1.442695, %v3594_v50  ;;  %v3611_v61 = vadd.f32 %v3608_v54, %v8517_v49  ;;  %v5563_v35 = vmul.f32 -1.442695, %v3612_v34 }
 0xba9   :  { %v5560_v59 = vmul.f32 -1.442695, %v3593_v56  ;;  %7016 = vpow2.f32 %v5561_v52  ;;  %v5562_v3 = vmul.f32 -1.442695, %v3611_v61 }
 0xbab   :  { %7018 = vpow2.f32 %v5560_v59 }
 0xbac   :  { %v3585_v55 = vpop.f32.mrb[34].mxu1  ;;  %7020 = vpow2.f32 %v5563_v35 }
 0xbad   :  { %v6268_v62 = vpop.f32.mrb[35].mxu1  ;;  %7022 = vpow2.f32 %v5562_v3  ;;  %v3586_v43 = vadd.f32 %v8523_v4, %v3585_v55 }
 0xbaf   :  { %v3626_v20 = vrot.slane %v3586_v43, 7 }
 0xbb3   :  { %v7017_v58 = vpop.eup %7016 }
 0xbb4   :  { %v3602_v63 = vadd.f32 1.0, %v7017_v58 }
 0xbb5   :  { %v7019_v2 = vpop.eup %7018 }
 0xbb6   :  { %v3601_v28 = vadd.f32 1.0, %v7019_v2  ;;  %7024 = vrcp.f32 %v3602_v63  ;;  %v7021_v60 = vpop.eup %7020 }
 0xbb7   :  { %v7023_v31 = vpop.eup %7022  ;;  %v3620_v5 = vadd.f32 1.0, %v7021_v60 }
 0xbb8   :  { %7026 = vrcp.f32 %v3601_v28  ;;  %v3619_v6 = vadd.f32 1.0, %v7023_v31 }
 0xbb9   :  { %7028 = vrcp.f32 %v3620_v5 }
 0xbba   :  { %7030 = vrcp.f32 %v3619_v6 }
 0xbc0   :  { %v7025_v57 = vpop.eup %7024 }
 0xbc1   :  { %v3630_v7 = vmul.f32 %v7025_v57, %v3586_v43 }
 0xbc2   :  { %v7027_v9 = vpop.eup %7026 }
 0xbc3   :  { %v3629_v10 = vmul.f32 %v7027_v9, %v3626_v20  ;;  %v3632_v19 = vadd.f32 %v3630_v7, %v8528_v11  ;;  %v7029_v17 = vpop.eup %7028 }
 0xbc4   :  { %v7031_v26 = vpop.eup %7030  ;;  %v3636_v18 = vsub.f32 1.0, %v7029_v17  ;;  %v3643_v30 = vmul.f32 %v7029_v17, %v3375_v53 }
 0xbc5   :  { %v3631_v15 = vadd.f32 %v3629_v10, %v8526_v12  ;;  %7032 = vtanh.f32 %v3632_v19  ;;  %v3635_v23 = vsub.f32 1.0, %v7031_v26  ;;  %v3642_v38 = vmul.f32 %v7031_v26, %v3639_v21 }
 0xbc7   :  { %7034 = vtanh.f32 %v3631_v15 }
 0xbcf   :  { %v7033_v13 = vpop.eup %7032 }
 0xbd0   :  { %v3638_v24 = vmul.f32 %v7033_v13, %v3636_v18 }
 0xbd1   :  { %v7035_v32 = vpop.eup %7034 }
 0xbd2   :  { %v3637_v27 = vmul.f32 %v7035_v32, %v3635_v23  ;;  %v8574_v42 = vadd.f32 %v3643_v30, %v3638_v24 }
 0xbd4   :  { %v8576_v45 = vadd.f32 %v3642_v38, %v3637_v27  ;;  %v3916_v18 = vrot.slane %v8574_v42, 7 }
 0xbd6   :  { %v3648_v36 = vrot.slane %v8576_v45, 1  ;;  %v3915_v17 = vrot.slane %v8576_v45, 7 }
 0xbd8   :  { %v3649_v14 = vsel %vm850_vm3, %v8574_v42, %v3648_v36 }
 0xbd9   :  { %6278 = vmatmul.mubr.msk.f32.vlgmr.msra.gmra.mrb[36].mxu0 %vm570_vm2, %v3649_v14  ;;  %6289 = vmatmul.mubr.msk.f32.vlgmr.msra.gmra.mrb[36].mxu1 %vm570_vm2, %v3649_v14 }
 0xbda   :  { %6708 = vmatpush3.bf16.msra.mxu0 %v8474_v29  ;;  %6299 = vmatprep.mubr.msk.f32.mxu0 %vm7618_vm1, %v7619_v25 }
 0xbdb   :  { %6709 = vmatprep.subr.bf16.mxu0 %v7617_v16  ;;  %6714 = vmatpush3.bf16.msra.mxu1 %v8444_v8 }
 0xbdc   :  { %6715 = vmatprep.subr.bf16.mxu1 %v7617_v16  ;;  %6310 = vmatprep.mubr.msk.f32.mxu1 %vm7618_vm1, %v7619_v25 }
 0xbde   :  { %6711 = vmatpush3.bf16.msra.mxu0 %v8486_v40 }
 0xbdf   :  { %6718 = vmatprep.subr.bf16.mxu0 %v7617_v16  ;;  %6717 = vmatpush3.bf16.msra.mxu1 %v8457_v1 }
 0xbe0   :  { %6724 = vmatprep.subr.bf16.mxu1 %v7617_v16 }
 0xbe1   :  { %6300 = vmatmul.mubr.msk.f32.vlgmr.msra.gmra.mrb[38].mxu0 %vm570_vm2, %v3649_v14 }
 0xbe2   :  { %6720 = vmatpush3.bf16.msra.mxu0 %v8470_v22  ;;  %6321 = vmatprep.mubr.msk.f32.mxu0 %vm7618_vm1, %v7619_v25 }
 0xbe3   :  { %6721 = vmatprep.subr.bf16.mxu0 %v7617_v16 }
 0xbe6   :  { %6723 = vmatpush3.bf16.msra.mxu0 %v8480_v33 }
 0xbe7   :  { %6730 = vmatprep.subr.bf16.mxu0 %v7617_v16 }
 0xcac   :  { %v3718_v53 = vpop.f32.mrb[36].mxu0  ;;  %v3788_v41 = vpop.f32.mrb[36].mxu1 }
 0xcad   :  { %v3863_v46 = vrot.slane %v3718_v53, 6  ;;  %v3864_v50 = vrot.slane %v3718_v53, 7  ;;  %v3882_v37 = vrot.slane %v3788_v41, 6  ;;  %v3883_v44 = vrot.slane %v3788_v41, 7  ;;  %v6279_v54 = vpop.f32.mrb[37].mxu0  ;;  %v6290_v56 = vpop.f32.mrb[37].mxu1 }
 0xcaf   :  { %v3867_v52 = vadd.f32 %v3863_v46, %v8511_v48  ;;  %v3868_v34 = vadd.f32 %v3864_v50, %v8513_v39  ;;  %v3886_v59 = vadd.f32 %v3882_v37, %v8517_v49  ;;  %v3887_v61 = vadd.f32 %v3883_v44, %v8519_v0 }
 0xcb0   :  { %v5321_v50 = vsel %vm2797_vm4, %v8534_v47, %v8576_v45  ;;  %v5322_v44 = vsel %vm2797_vm4, %v8536_v51, %v8574_v42 }
 0xcb1   :  { %v5567_v35 = vmul.f32 -1.442695, %v3867_v52  ;;  %v5568_v55 = vmul.f32 -1.442695, %v3868_v34  ;;  %v5569_v62 = vmul.f32 -1.442695, %v3886_v59 }
 0xcb2   :  { %v5570_v3 = vmul.f32 -1.442695, %v3887_v61 }
 0xcb3   :  { %7036 = vpow2.f32 %v5567_v35 }
 0xcb4   :  { %7038 = vpow2.f32 %v5568_v55  ;;  %v3858_v58 = vpop.f32.mrb[38].mxu0 }
 0xcb5   :  { %7040 = vpow2.f32 %v5569_v62  ;;  %v6301_v63 = vpop.f32.mrb[39].mxu0  ;;  %v3859_v20 = vadd.f32 %v8523_v4, %v3858_v58 }
 0xcb6   :  { %7042 = vpow2.f32 %v5570_v3 }
 0xcb7   :  { %v3901_v7 = vrot.slane %v3859_v20, 6  ;;  %v3902_v10 = vrot.slane %v3859_v20, 7 }
 0xcbd   :  { %v7037_v2 = vpop.eup %7036 }
 0xcbe   :  { %v7039_v28 = vpop.eup %7038  ;;  %v3875_v60 = vadd.f32 1.0, %v7037_v2 }
 0xcbf   :  { %v7041_v31 = vpop.eup %7040  ;;  %v3876_v5 = vadd.f32 1.0, %v7039_v28 }
 0xcc0   :  { %v7043_v43 = vpop.eup %7042  ;;  %7044 = vrcp.f32 %v3875_v60  ;;  %v3894_v6 = vadd.f32 1.0, %v7041_v31 }
 0xcc1   :  { %7046 = vrcp.f32 %v3876_v5  ;;  %v3895_v57 = vadd.f32 1.0, %v7043_v43 }
 0xcc2   :  { %7048 = vrcp.f32 %v3894_v6 }
 0xcc3   :  { %7050 = vrcp.f32 %v3895_v57 }
 0xcca   :  { %v7045_v9 = vpop.eup %7044 }
 0xccb   :  { %v7047_v19 = vpop.eup %7046  ;;  %v3905_v15 = vmul.f32 %v7045_v9, %v3901_v7 }
 0xccc   :  { %v7049_v26 = vpop.eup %7048  ;;  %v3906_v13 = vmul.f32 %v7047_v19, %v3902_v10 }
 0xccd   :  { %v7051_v21 = vpop.eup %7050  ;;  %v3907_v23 = vadd.f32 %v3905_v15, %v8526_v12  ;;  %v3919_v24 = vmul.f32 %v7049_v26, %v3915_v17  ;;  %v3911_v27 = vsub.f32 1.0, %v7049_v26 }
 0xcce   :  { %v3908_v30 = vadd.f32 %v3906_v13, %v8528_v11  ;;  %v3920_v32 = vmul.f32 %v7051_v21, %v3916_v18  ;;  %v3912_v36 = vsub.f32 1.0, %v7051_v21 }
 0xccf   :  { %7052 = vtanh.f32 %v3907_v23 }
 0xcd0   :  { %7054 = vtanh.f32 %v3908_v30 }
 0xcd9   :  { %v7053_v38 = vpop.eup %7052 }
 0xcda   :  { %v7055_v14 = vpop.eup %7054  ;;  %v3913_v53 = vmul.f32 %v7053_v38, %v3911_v27 }
 0xcdb   :  { %v3914_v41 = vmul.f32 %v7055_v14, %v3912_v36 }
 0xcdc   :  { %v8611_v46 = vadd.f32 %v3919_v24, %v3913_v53 }
 0xcdd   :  { %v8616_v37 = vadd.f32 %v3920_v32, %v3914_v41 }
 0xcde   :  { %v3925_v54 = vrot.slane %v8611_v46, 2  ;;  %v8624_v56 = vsel %vm2800_vm5, %v5321_v50, %v8611_v46  ;;  %v4193_v30 = vrot.slane %v8611_v46, 7 }
 0xcdf   :  { %v3926_v52 = vrot.slane %v8616_v37, 1  ;;  %v8629_v34 = vsel %vm2800_vm5, %v5322_v44, %v8616_v37  ;;  %v4194_v38 = vrot.slane %v8616_v37, 7 }
 0xce1   :  { %v3927_v47 = vsel %vm850_vm3, %v3926_v52, %v3925_v54 }
 0xce2   :  { %6311 = vmatmul.mubr.msk.f32.vlgmr.msra.gmra.mrb[38].mxu1 %vm570_vm2, %v3927_v47  ;;  %6322 = vmatmul.mubr.msk.f32.vlgmr.msra.gmra.mrb[40].mxu0 %vm570_vm2, %v3927_v47 }
 0xce3   :  { %6726 = vmatpush3.bf16.msra.mxu1 %v8474_v29  ;;  %6332 = vmatprep.mubr.msk.f32.mxu1 %vm7618_vm1, %v7619_v25 }
 0xce4   :  { %6727 = vmatprep.subr.bf16.mxu1 %v7617_v16  ;;  %6732 = vmatpush3.bf16.msra.mxu0 %v8444_v8 }
 0xce5   :  { %6733 = vmatprep.subr.bf16.mxu0 %v7617_v16  ;;  %6343 = vmatprep.mubr.msk.f32.mxu0 %vm7618_vm1, %v7619_v25 }
 0xce7   :  { %6729 = vmatpush3.bf16.msra.mxu1 %v8486_v40 }
 0xce8   :  { %6736 = vmatprep.subr.bf16.mxu1 %v7617_v16  ;;  %6735 = vmatpush3.bf16.msra.mxu0 %v8457_v1 }
 0xce9   :  { %6742 = vmatprep.subr.bf16.mxu0 %v7617_v16 }
 0xcea   :  { %6333 = vmatmul.mubr.msk.f32.vlgmr.msra.gmra.mrb[40].mxu1 %vm570_vm2, %v3927_v47 }
 0xceb   :  { %6738 = vmatpush3.bf16.msra.mxu1 %v8470_v22  ;;  %6354 = vmatprep.mubr.msk.f32.mxu1 %vm7618_vm1, %v7619_v25 }
 0xcec   :  { %6739 = vmatprep.subr.bf16.mxu1 %v7617_v16 }
 0xcef   :  { %6741 = vmatpush3.bf16.msra.mxu1 %v8480_v33 }
 0xcf0   :  { %6748 = vmatprep.subr.bf16.mxu1 %v7617_v16 }
 0xdb5   :  { %v3996_v51 = vpop.f32.mrb[38].mxu1  ;;  %v4066_v42 = vpop.f32.mrb[40].mxu0 }
 0xdb6   :  { %v4141_v45 = vrot.slane %v3996_v51, 5  ;;  %v4142_v59 = vrot.slane %v3996_v51, 6  ;;  %v4160_v61 = vrot.slane %v4066_v42, 5  ;;  %v4161_v35 = vrot.slane %v4066_v42, 6  ;;  %v6312_v55 = vpop.f32.mrb[39].mxu1  ;;  %v6323_v62 = vpop.f32.mrb[41].mxu0 }
 0xdb8   :  { %v4145_v3 = vadd.f32 %v4141_v45, %v8511_v48  ;;  %v4146_v58 = vadd.f32 %v4142_v59, %v8513_v39  ;;  %v4164_v63 = vadd.f32 %v4160_v61, %v8517_v49  ;;  %v4165_v2 = vadd.f32 %v4161_v35, %v8519_v0 }
 0xdba   :  { %v5574_v28 = vmul.f32 -1.442695, %v4145_v3  ;;  %v5575_v60 = vmul.f32 -1.442695, %v4146_v58  ;;  %v5576_v31 = vmul.f32 -1.442695, %v4164_v63 }
 0xdbb   :  { %v5577_v5 = vmul.f32 -1.442695, %v4165_v2 }
 0xdbc   :  { %7056 = vpow2.f32 %v5574_v28 }
 0xdbd   :  { %7058 = vpow2.f32 %v5575_v60  ;;  %v4136_v43 = vpop.f32.mrb[40].mxu1 }
 0xdbe   :  { %7060 = vpow2.f32 %v5576_v31  ;;  %v6334_v6 = vpop.f32.mrb[41].mxu1  ;;  %v4137_v26 = vadd.f32 %v8523_v4, %v4136_v43 }
 0xdbf   :  { %7062 = vpow2.f32 %v5577_v5 }
 0xdc0   :  { %v4179_v18 = vrot.slane %v4137_v26, 5  ;;  %v4180_v21 = vrot.slane %v4137_v26, 6 }
 0xdc6   :  { %v7057_v57 = vpop.eup %7056 }
 0xdc7   :  { %v7059_v20 = vpop.eup %7058  ;;  %v4153_v7 = vadd.f32 1.0, %v7057_v57 }
 0xdc8   :  { %v7061_v9 = vpop.eup %7060  ;;  %v4154_v10 = vadd.f32 1.0, %v7059_v20 }
 0xdc9   :  { %v7063_v19 = vpop.eup %7062  ;;  %7064 = vrcp.f32 %v4153_v7  ;;  %v4172_v15 = vadd.f32 1.0, %v7061_v9 }
 0xdca   :  { %7066 = vrcp.f32 %v4154_v10  ;;  %v4173_v17 = vadd.f32 1.0, %v7063_v19 }
 0xdcb   :  { %7068 = vrcp.f32 %v4172_v15 }
 0xdcc   :  { %7070 = vrcp.f32 %v4173_v17 }
 0xdd3   :  { %v7065_v13 = vpop.eup %7064 }
 0xdd4   :  { %v7067_v23 = vpop.eup %7066  ;;  %v4183_v24 = vmul.f32 %v7065_v13, %v4179_v18 }
 0xdd5   :  { %v7069_v32 = vpop.eup %7068  ;;  %v4184_v27 = vmul.f32 %v7067_v23, %v4180_v21 }
 0xdd6   :  { %v7071_v36 = vpop.eup %7070  ;;  %v4185_v14 = vadd.f32 %v4183_v24, %v8526_v12  ;;  %v4197_v53 = vmul.f32 %v7069_v32, %v4193_v30  ;;  %v4189_v44 = vsub.f32 1.0, %v7069_v32 }
 0xdd7   :  { %v4186_v41 = vadd.f32 %v4184_v27, %v8528_v11  ;;  %v4198_v50 = vmul.f32 %v7071_v36, %v4194_v38  ;;  %v4190_v52 = vsub.f32 1.0, %v7071_v36 }
 0xdd8   :  { %7072 = vtanh.f32 %v4185_v14 }
 0xdd9   :  { %7074 = vtanh.f32 %v4186_v41 }
 0xde2   :  { %v7073_v54 = vpop.eup %7072 }
 0xde3   :  { %v7075_v47 = vpop.eup %7074  ;;  %v4191_v51 = vmul.f32 %v7073_v54, %v4189_v44 }
 0xde4   :  { %v4192_v42 = vmul.f32 %v7075_v47, %v4190_v52 }
 0xde5   :  { %v8662_v46 = vadd.f32 %v4197_v53, %v4191_v51 }
 0xde6   :  { %v8664_v45 = vadd.f32 %v4198_v50, %v4192_v42 }
 0xde7   :  { %v4203_v37 = vrot.slane %v8662_v46, 3  ;;  %v8670_v59 = vsel %vm2803_vm6, %v8624_v56, %v8662_v46  ;;  %v4471_v14 = vrot.slane %v8662_v46, 7 }
 0xde8   :  { %v4204_v61 = vrot.slane %v8664_v45, 2  ;;  %v8676_v35 = vsel %vm2803_vm6, %v8629_v34, %v8664_v45  ;;  %v4472_v50 = vrot.slane %v8664_v45, 7 }
 0xdea   :  { %v4205_v55 = vsel %vm850_vm3, %v4204_v61, %v4203_v37 }
 0xdeb   :  { %6344 = vmatmul.mubr.msk.f32.vlgmr.msra.gmra.mrb[42].mxu0 %vm570_vm2, %v4205_v55  ;;  %6355 = vmatmul.mubr.msk.f32.vlgmr.msra.gmra.mrb[42].mxu1 %vm570_vm2, %v4205_v55 }
 0xdec   :  { %6744 = vmatpush3.bf16.msra.mxu0 %v8474_v29  ;;  %6365 = vmatprep.mubr.msk.f32.mxu0 %vm7618_vm1, %v7619_v25 }
 0xded   :  { %6745 = vmatprep.subr.bf16.mxu0 %v7617_v16  ;;  %6750 = vmatpush3.bf16.msra.mxu1 %v8444_v8 }
 0xdee   :  { %6751 = vmatprep.subr.bf16.mxu1 %v7617_v16  ;;  %6376 = vmatprep.mubr.msk.f32.mxu1 %vm7618_vm1, %v7619_v25 }
 0xdf0   :  { %6747 = vmatpush3.bf16.msra.mxu0 %v8486_v40 }
 0xdf1   :  { %6754 = vmatprep.subr.bf16.mxu0 %v7617_v16  ;;  %6753 = vmatpush3.bf16.msra.mxu1 %v8457_v1 }
 0xdf2   :  { %6760 = vmatprep.subr.bf16.mxu1 %v7617_v16 }
 0xdf3   :  { %6366 = vmatmul.mubr.msk.f32.vlgmr.msra.gmra.mrb[44].mxu0 %vm570_vm2, %v4205_v55 }
 0xdf4   :  { %6756 = vmatpush3.bf16.msra.mxu0 %v8470_v22  ;;  %6387 = vmatprep.mubr.msk.f32.mxu0 %vm7618_vm1, %v7619_v25 }
 0xdf5   :  { %6757 = vmatprep.subr.bf16.mxu0 %v7617_v16 }
 0xdf8   :  { %6759 = vmatpush3.bf16.msra.mxu0 %v8480_v33 }
 0xdf9   :  { %6766 = vmatprep.subr.bf16.mxu0 %v7617_v16 }
 0xebe   :  { %v4274_v56 = vpop.f32.mrb[42].mxu0  ;;  %v4344_v34 = vpop.f32.mrb[42].mxu1 }
 0xebf   :  { %v4419_v62 = vrot.slane %v4274_v56, 4  ;;  %v4420_v3 = vrot.slane %v4274_v56, 5  ;;  %v4438_v58 = vrot.slane %v4344_v34, 4  ;;  %v4439_v63 = vrot.slane %v4344_v34, 5  ;;  %v6345_v2 = vpop.f32.mrb[43].mxu0  ;;  %v6356_v28 = vpop.f32.mrb[43].mxu1 }
 0xec1   :  { %v4423_v60 = vadd.f32 %v4419_v62, %v8511_v48  ;;  %v4424_v31 = vadd.f32 %v4420_v3, %v8513_v39  ;;  %v4442_v5 = vadd.f32 %v4438_v58, %v8517_v49  ;;  %v4443_v43 = vadd.f32 %v4439_v63, %v8519_v0 }
 0xec3   :  { %v5581_v6 = vmul.f32 -1.442695, %v4423_v60  ;;  %v5582_v57 = vmul.f32 -1.442695, %v4424_v31  ;;  %v5583_v20 = vmul.f32 -1.442695, %v4442_v5 }
 0xec4   :  { %v5584_v7 = vmul.f32 -1.442695, %v4443_v43 }
 0xec5   :  { %7076 = vpow2.f32 %v5581_v6 }
 0xec6   :  { %7078 = vpow2.f32 %v5582_v57  ;;  %v4414_v9 = vpop.f32.mrb[44].mxu0 }
 0xec7   :  { %7080 = vpow2.f32 %v5583_v20  ;;  %v6367_v10 = vpop.f32.mrb[45].mxu0  ;;  %v4415_v24 = vadd.f32 %v8523_v4, %v4414_v9 }
 0xec8   :  { %7082 = vpow2.f32 %v5584_v7 }
 0xec9   :  { %v4457_v30 = vrot.slane %v4415_v24, 4  ;;  %v4458_v27 = vrot.slane %v4415_v24, 5 }
 0xecf   :  { %v7077_v19 = vpop.eup %7076 }
 0xed0   :  { %v7079_v15 = vpop.eup %7078  ;;  %v4431_v17 = vadd.f32 1.0, %v7077_v19 }
 0xed1   :  { %v7081_v26 = vpop.eup %7080  ;;  %v4432_v18 = vadd.f32 1.0, %v7079_v15 }
 0xed2   :  { %v7083_v13 = vpop.eup %7082  ;;  %7084 = vrcp.f32 %v4431_v17  ;;  %v4450_v21 = vadd.f32 1.0, %v7081_v26 }
 0xed3   :  { %7086 = vrcp.f32 %v4432_v18  ;;  %v4451_v23 = vadd.f32 1.0, %v7083_v13 }
 0xed4   :  { %7088 = vrcp.f32 %v4450_v21 }
 0xed5   :  { %7090 = vrcp.f32 %v4451_v23 }
 0xedc   :  { %v7085_v32 = vpop.eup %7084 }
 0xedd   :  { %v7087_v38 = vpop.eup %7086  ;;  %v4461_v36 = vmul.f32 %v7085_v32, %v4457_v30 }
 0xede   :  { %v7089_v53 = vpop.eup %7088  ;;  %v4462_v41 = vmul.f32 %v7087_v38, %v4458_v27 }
 0xedf   :  { %v7091_v44 = vpop.eup %7090  ;;  %v4463_v54 = vadd.f32 %v4461_v36, %v8526_v12  ;;  %v4475_v52 = vmul.f32 %v7089_v53, %v4471_v14  ;;  %v4467_v42 = vsub.f32 1.0, %v7089_v53 }
 0xee0   :  { %v4464_v47 = vadd.f32 %v4462_v41, %v8528_v11  ;;  %v4476_v51 = vmul.f32 %v7091_v44, %v4472_v50  ;;  %v4468_v61 = vsub.f32 1.0, %v7091_v44 }
 0xee1   :  { %7092 = vtanh.f32 %v4463_v54 }
 0xee2   :  { %7094 = vtanh.f32 %v4464_v47 }
 0xeeb   :  { %v7093_v37 = vpop.eup %7092 }
 0xeec   :  { %v7095_v55 = vpop.eup %7094  ;;  %v4469_v56 = vmul.f32 %v7093_v37, %v4467_v42 }
 0xeed   :  { %v4470_v34 = vmul.f32 %v7095_v55, %v4468_v61 }
 0xeee   :  { %v8709_v46 = vadd.f32 %v4475_v52, %v4469_v56 }
 0xeef   :  { %v8711_v62 = vadd.f32 %v4476_v51, %v4470_v34 }
 0xef0   :  { %v4481_v45 = vrot.slane %v8709_v46, 4  ;;  %v8717_v3 = vsel %vm2806_vm7, %v8670_v59, %v8709_v46  ;;  %v4749_v54 = vrot.slane %v8709_v46, 7 }
 0xef1   :  { %v4482_v58 = vrot.slane %v8711_v62, 3  ;;  %v8723_v63 = vsel %vm2806_vm7, %v8676_v35, %v8711_v62  ;;  %v4750_v51 = vrot.slane %v8711_v62, 7 }
 0xef3   :  { %v4483_v2 = vsel %vm850_vm3, %v4482_v58, %v4481_v45 }
 0xef4   :  { %6377 = vmatmul.mubr.msk.f32.vlgmr.msra.gmra.mrb[44].mxu1 %vm570_vm2, %v4483_v2  ;;  %6388 = vmatmul.mubr.msk.f32.vlgmr.msra.gmra.mrb[46].mxu0 %vm570_vm2, %v4483_v2 }
 0xef5   :  { %6762 = vmatpush3.bf16.msra.mxu1 %v8474_v29  ;;  %6398 = vmatprep.mubr.msk.f32.mxu1 %vm7618_vm1, %v7619_v25 }
 0xef6   :  { %6763 = vmatprep.subr.bf16.mxu1 %v7617_v16  ;;  %6768 = vmatpush3.bf16.msra.mxu0 %v8444_v8 }
 0xef7   :  { %6769 = vmatprep.subr.bf16.mxu0 %v7617_v16  ;;  %6409 = vmatprep.mubr.msk.f32.mxu0 %vm7618_vm1, %v7619_v25 }
 0xef9   :  { %6765 = vmatpush3.bf16.msra.mxu1 %v8486_v40 }
 0xefa   :  { %6772 = vmatprep.subr.bf16.mxu1 %v7617_v16  ;;  %6771 = vmatpush3.bf16.msra.mxu0 %v8457_v1 }
 0xefb   :  { %6778 = vmatprep.subr.bf16.mxu0 %v7617_v16 }
 0xefc   :  { %6399 = vmatmul.mubr.msk.f32.vlgmr.msra.gmra.mrb[46].mxu1 %vm570_vm2, %v4483_v2 }
 0xefd   :  { %6774 = vmatpush3.bf16.msra.mxu1 %v8470_v22  ;;  %6420 = vmatprep.mubr.msk.f32.mxu1 %vm7618_vm1, %v7619_v25 }
 0xefe   :  { %6775 = vmatprep.subr.bf16.mxu1 %v7617_v16 }
 0xf01   :  { %6777 = vmatpush3.bf16.msra.mxu1 %v8480_v33 }
 0xf02   :  { %6784 = vmatprep.subr.bf16.mxu1 %v7617_v16 }
 0xfc7   :  { %v4552_v59 = vpop.f32.mrb[44].mxu1  ;;  %v4622_v35 = vpop.f32.mrb[46].mxu0 }
 0xfc8   :  { %v4697_v28 = vrot.slane %v4552_v59, 3  ;;  %v4698_v60 = vrot.slane %v4552_v59, 4  ;;  %v4716_v31 = vrot.slane %v4622_v35, 3  ;;  %v4717_v5 = vrot.slane %v4622_v35, 4  ;;  %v6378_v43 = vpop.f32.mrb[45].mxu1  ;;  %v6389_v6 = vpop.f32.mrb[47].mxu0 }
 0xfca   :  { %v4701_v57 = vadd.f32 %v4697_v28, %v8511_v48  ;;  %v4702_v20 = vadd.f32 %v4698_v60, %v8513_v39  ;;  %v4720_v7 = vadd.f32 %v4716_v31, %v8517_v49  ;;  %v4721_v9 = vadd.f32 %v4717_v5, %v8519_v0 }
 0xfcc   :  { %v5588_v10 = vmul.f32 -1.442695, %v4701_v57  ;;  %v5589_v19 = vmul.f32 -1.442695, %v4702_v20  ;;  %v5590_v15 = vmul.f32 -1.442695, %v4720_v7 }
 0xfcd   :  { %v5591_v17 = vmul.f32 -1.442695, %v4721_v9 }
 0xfce   :  { %7096 = vpow2.f32 %v5588_v10 }
 0xfcf   :  { %7098 = vpow2.f32 %v5589_v19  ;;  %v4692_v26 = vpop.f32.mrb[46].mxu1 }
 0xfd0   :  { %7100 = vpow2.f32 %v5590_v15  ;;  %v6400_v18 = vpop.f32.mrb[47].mxu1  ;;  %v4693_v36 = vadd.f32 %v8523_v4, %v4692_v26 }
 0xfd1   :  { %7102 = vpow2.f32 %v5591_v17 }
 0xfd2   :  { %v4735_v14 = vrot.slane %v4693_v36, 3  ;;  %v4736_v41 = vrot.slane %v4693_v36, 4 }
 0xfd8   :  { %v7097_v13 = vpop.eup %7096 }
 0xfd9   :  { %v7099_v21 = vpop.eup %7098  ;;  %v4709_v23 = vadd.f32 1.0, %v7097_v13 }
 0xfda   :  { %v7101_v24 = vpop.eup %7100  ;;  %v4710_v30 = vadd.f32 1.0, %v7099_v21 }
 0xfdb   :  { %v7103_v32 = vpop.eup %7102  ;;  %7104 = vrcp.f32 %v4709_v23  ;;  %v4728_v27 = vadd.f32 1.0, %v7101_v24 }
 0xfdc   :  { %7106 = vrcp.f32 %v4710_v30  ;;  %v4729_v38 = vadd.f32 1.0, %v7103_v32 }
 0xfdd   :  { %7108 = vrcp.f32 %v4728_v27 }
 0xfde   :  { %7110 = vrcp.f32 %v4729_v38 }
 0xfe5   :  { %v7105_v53 = vpop.eup %7104 }
 0xfe6   :  { %v7107_v50 = vpop.eup %7106  ;;  %v4739_v44 = vmul.f32 %v7105_v53, %v4735_v14 }
 0xfe7   :  { %v7109_v52 = vpop.eup %7108  ;;  %v4740_v47 = vmul.f32 %v7107_v50, %v4736_v41 }
 0xfe8   :  { %v7111_v42 = vpop.eup %7110  ;;  %v4741_v37 = vadd.f32 %v4739_v44, %v8526_v12  ;;  %v4753_v61 = vmul.f32 %v7109_v52, %v4749_v54  ;;  %v4745_v34 = vsub.f32 1.0, %v7109_v52 }
 0xfe9   :  { %v4742_v55 = vadd.f32 %v4740_v47, %v8528_v11  ;;  %v4754_v56 = vmul.f32 %v7111_v42, %v4750_v51  ;;  %v4746_v58 = vsub.f32 1.0, %v7111_v42 }
 0xfea   :  { %7112 = vtanh.f32 %v4741_v37 }
 0xfeb   :  { %7114 = vtanh.f32 %v4742_v55 }
 0xff4   :  { %v7113_v45 = vpop.eup %7112 }
 0xff5   :  { %v7115_v2 = vpop.eup %7114  ;;  %v4747_v59 = vmul.f32 %v7113_v45, %v4745_v34 }
 0xff6   :  { %v4748_v35 = vmul.f32 %v7115_v2, %v4746_v58 }
 0xff7   :  { %v8756_v46 = vadd.f32 %v4753_v61, %v4747_v59 }
 0xff8   :  { %v8758_v28 = vadd.f32 %v4754_v56, %v4748_v35 }
 0xff9   :  { %v4759_v62 = vrot.slane %v8756_v46, 5  ;;  %v8764_v60 = vsel %vm2809_vm8, %v8717_v3, %v8756_v46  ;;  %v5027_v52 = vrot.slane %v8756_v46, 7 }
 0xffa   :  { %v4760_v31 = vrot.slane %v8758_v28, 4  ;;  %v8770_v5 = vsel %vm2809_vm8, %v8723_v63, %v8758_v28  ;;  %v5028_v42 = vrot.slane %v8758_v28, 7 }
 0xffc   :  { %v4761_v43 = vsel %vm850_vm3, %v4760_v31, %v4759_v62 }
 0xffd   :  { %6410 = vmatmul.mubr.msk.f32.vlgmr.msra.gmra.mrb[48].mxu0 %vm570_vm2, %v4761_v43  ;;  %6421 = vmatmul.mubr.msk.f32.vlgmr.msra.gmra.mrb[48].mxu1 %vm570_vm2, %v4761_v43 }
 0xffe   :  { %6780 = vmatpush3.bf16.msra.mxu0 %v8474_v29  ;;  %6431 = vmatprep.mubr.msk.f32.mxu0 %vm7618_vm1, %v7619_v25 }
 0xfff   :  { %6781 = vmatprep.subr.bf16.mxu0 %v7617_v16  ;;  %6786 = vmatpush3.bf16.msra.mxu1 %v8444_v8 }
0x1000   :  { %6787 = vmatprep.subr.bf16.mxu1 %v7617_v16  ;;  %6442 = vmatprep.mubr.msk.f32.mxu1 %vm7618_vm1, %v7619_v25 }
0x1002   :  { %6783 = vmatpush3.bf16.msra.mxu0 %v8486_v40 }
0x1003   :  { %6790 = vmatprep.subr.bf16.mxu0 %v7617_v16  ;;  %6789 = vmatpush3.bf16.msra.mxu1 %v8457_v1 }
0x1004   :  { %6796 = vmatprep.subr.bf16.mxu1 %v7617_v16 }
0x1005   :  { %6432 = vmatmul.mubr.msk.f32.vlgmr.msra.gmra.mrb[50].mxu0 %vm570_vm2, %v4761_v43 }
0x1006   :  { %6792 = vmatpush3.bf16.msra.mxu0 %v8470_v22  ;;  %6453 = vmatprep.mubr.msk.f32.mxu0 %vm7618_vm1, %v7619_v25 }
0x1007   :  { %6793 = vmatprep.subr.bf16.mxu0 %v7617_v16 }
0x100a   :  { %6795 = vmatpush3.bf16.msra.mxu0 %v8480_v33 }
0x10d0   :  { %v4830_v8 = vpop.f32.mrb[48].mxu0  ;;  %v4900_v3 = vpop.f32.mrb[48].mxu1 }
0x10d1   :  { %v4975_v63 = vrot.slane %v4830_v8, 2  ;;  %v4976_v6 = vrot.slane %v4830_v8, 3  ;;  %v4994_v57 = vrot.slane %v4900_v3, 2  ;;  %v4995_v20 = vrot.slane %v4900_v3, 3  ;;  %v6411_v1 = vpop.f32.mrb[49].mxu0  ;;  %v6422_v7 = vpop.f32.mrb[49].mxu1 }
0x10d3   :  { %v4979_v9 = vadd.f32 %v4975_v63, %v8511_v48  ;;  %v4980_v10 = vadd.f32 %v4976_v6, %v8513_v39  ;;  %v4998_v22 = vadd.f32 %v4994_v57, %v8517_v49  ;;  %v4999_v19 = vadd.f32 %v4995_v20, %v8519_v0 }
0x10d5   :  { %v5595_v15 = vmul.f32 -1.442695, %v4979_v9  ;;  %v5596_v17 = vmul.f32 -1.442695, %v4980_v10  ;;  %v5597_v26 = vmul.f32 -1.442695, %v4998_v22 }
0x10d6   :  { %v5598_v33 = vmul.f32 -1.442695, %v4999_v19 }
0x10d7   :  { %7116 = vpow2.f32 %v5595_v15 }
0x10d8   :  { %7118 = vpow2.f32 %v5596_v17  ;;  %v4970_v18 = vpop.f32.mrb[50].mxu0 }
0x10d9   :  { %7120 = vpow2.f32 %v5597_v26  ;;  %v6433_v13 = vpop.f32.mrb[51].mxu0  ;;  %v4971_v14 = vadd.f32 %v8523_v4, %v4970_v18 }
0x10da   :  { %7122 = vpow2.f32 %v5598_v33 }
0x10db   :  { %v5013_v53 = vrot.slane %v4971_v14, 2  ;;  %v5014_v50 = vrot.slane %v4971_v14, 3 }
0x10e1   :  { %v7117_v21 = vpop.eup %7116 }
0x10e2   :  { %v7119_v23 = vpop.eup %7118  ;;  %v4987_v24 = vadd.f32 1.0, %v7117_v21 }
0x10e3   :  { %v7121_v30 = vpop.eup %7120  ;;  %v4988_v32 = vadd.f32 1.0, %v7119_v23 }
0x10e4   :  { %v7123_v27 = vpop.eup %7122  ;;  %7124 = vrcp.f32 %v4987_v24  ;;  %v5006_v38 = vadd.f32 1.0, %v7121_v30 }
0x10e5   :  { %7126 = vrcp.f32 %v4988_v32  ;;  %v5007_v36 = vadd.f32 1.0, %v7123_v27 }
0x10e6   :  { %7128 = vrcp.f32 %v5006_v38  ;;  %v7157_v38 = vld [vmem:[#allocation28] ss:$0 sm:$0xff] }
0x10e7   :  { %7130 = vrcp.f32 %v5007_v36 }
0x10ee   :  { %v7125_v41 = vpop.eup %7124 }
0x10ef   :  { %v7127_v44 = vpop.eup %7126  ;;  %v5017_v54 = vmul.f32 %v7125_v41, %v5013_v53 }
0x10f0   :  { %v7129_v47 = vpop.eup %7128  ;;  %v5018_v51 = vmul.f32 %v7127_v44, %v5014_v50 }
0x10f1   :  { %v7131_v37 = vpop.eup %7130  ;;  %v5019_v61 = vadd.f32 %v5017_v54, %v8526_v12  ;;  %v5031_v55 = vmul.f32 %v7129_v47, %v5027_v52  ;;  %v5023_v4 = vsub.f32 1.0, %v7129_v47 }
0x10f2   :  { %v5020_v56 = vadd.f32 %v5018_v51, %v8528_v11  ;;  %v5032_v34 = vmul.f32 %v7131_v37, %v5028_v42  ;;  %v5024_v58 = vsub.f32 1.0, %v7131_v37 }
0x10f3   :  { %7132 = vtanh.f32 %v5019_v61 }
0x10f4   :  { %7134 = vtanh.f32 %v5020_v56 }
0x10fd   :  { %v7133_v45 = vpop.eup %7132 }
0x10fe   :  { %v7135_v2 = vpop.eup %7134  ;;  %v5025_v59 = vmul.f32 %v7133_v45, %v5023_v4 }
0x10ff   :  { %v5026_v35 = vmul.f32 %v7135_v2, %v5024_v58 }
0x1100   :  { %v8802_v46 = vadd.f32 %v5031_v55, %v5025_v59 }
0x1101   :  { %v8804_v62 = vadd.f32 %v5032_v34, %v5026_v35 }
0x1102   :  { %v5037_v28 = vrot.slane %v8802_v46, 6  ;;  %v8810_v31 = vsel %vm2812_vm9, %v8764_v60, %v8802_v46  ;;  %v5337_v60 = vld [vmem:[%s8907_s22] sm:$0xff]  ;;  %v5305_v54 = vrot.slane %v8802_v46, 7 }
0x1103   :  { %v5038_v43 = vrot.slane %v8804_v62, 5  ;;  %v8816_v8 = vsel %vm2812_vm9, %v8770_v5, %v8804_v62  ;;  %v5338_v5 = vld [vmem:[%s8907_s22 + $0x8] sm:$0xff]  ;;  %v5306_v47 = vrot.slane %v8804_v62, 7 }
0x1104   :  { %v6802_v63 = vpack.c.bf16 %v5338_v5, %v5337_v60 }
0x1105   :  { %v5039_v3 = vsel %vm850_vm3, %v5038_v43, %v5037_v28 }
0x1106   :  { %6443 = vmatmul.mubr.msk.f32.vlgmr.msra.gmra.mrb[50].mxu1 %vm570_vm2, %v5039_v3  ;;  %6454 = vmatmul.mubr.msk.f32.vlgmr.msra.gmra.mrb[52].mxu0 %vm570_vm2, %v5039_v3 }
0x1107   :  { %6798 = vmatpush3.bf16.msra.mxu1 %v8474_v29  ;;  %6464 = vmatprep.mubr.msk.f32.mxu1 %vm7618_vm1, %v7619_v25  ;;  %v5339_v29 = vld [vmem:[%s8907_s22 + $0x10] sm:$0xff] }
0x1108   :  { %6799 = vmatprep.subr.bf16.mxu1 %v7617_v16  ;;  %v5340_v16 = vld [vmem:[%s8907_s22 + $0x18] sm:$0xff]  ;;  %6803 = vmatprep.subr.bf16.mxu0 %v6802_v63  ;;  %s7620_s22 = smov [#allocation30]  }
0x1109   :  { %v6806_v25 = vpack.c.bf16 %v5340_v16, %v5339_v29  ;;  %6805 = vmatpush3.bf16.msra.mxu0 %v6802_v63  ;;  %s5449_s25 = sshll.u32 %s7620_s22, 4  ;;  %s5450_s25 = int_to_ptr.vmem [resolvable:$true] %s5449_s25 }
0x110a   :  { %s7532_s9 = scalar_lea.vmem %s5450_s25, 64  ;;  %p7537_p11 = scmp.lt.s32.totalorder %s5450_s25, %s5450_s25 }
0x110b   :  { %6801 = vmatpush3.bf16.msra.mxu1 %v8486_v40  ;;  %6807 = vmatprep.subr.bf16.mxu0 %v6806_v25  ;;  %p7533_p10 = scmp.ne.s32.totalorder %s5450_s25, %s7532_s9  ;;  %p7538_p12 = scmp.lt.s32.totalorder %s7532_s9, %s7532_s9 }
0x110d   :  { %6809 = vmatpush3.bf16.msra.mxu0 %v6806_v25  ;;  %p7539_p13 = por %p7538_p12, %p7537_p11 }
0x110e   :  { %6465 = vmatmul.mubr.msk.f32.vlgmr.msra.gmra.mrb[52].mxu1 %vm570_vm2, %v5039_v3 }
0x110f   :  { %p7540_p0 = pnand %p7539_p13, %p7533_p10 }
0x11d9   :  { %v5108_v40 = vpop.f32.mrb[50].mxu1  ;;  %v5178_v6 = vpop.f32.mrb[52].mxu0 }
0x11da   :  { %v5253_v57 = vrot.slane %v5108_v40, 1  ;;  %v5254_v20 = vrot.slane %v5108_v40, 2  ;;  %v5272_v1 = vrot.slane %v5178_v6, 1  ;;  %v5273_v7 = vrot.slane %v5178_v6, 2  ;;  %v6444_v9 = vpop.f32.mrb[51].mxu1  ;;  %v6455_v10 = vpop.f32.mrb[53].mxu0 }
0x11dc   :  { %v5257_v22 = vadd.f32 %v5253_v57, %v8511_v48  ;;  %v5258_v19 = vadd.f32 %v5254_v20, %v8513_v39  ;;  %v5276_v15 = vadd.f32 %v5272_v1, %v8517_v49  ;;  %v5277_v17 = vadd.f32 %v5273_v7, %v8519_v0 }
0x11de   :  { %v5602_v26 = vmul.f32 -1.442695, %v5257_v22  ;;  %v5603_v33 = vmul.f32 -1.442695, %v5258_v19  ;;  %v5604_v18 = vmul.f32 -1.442695, %v5276_v15 }
0x11df   :  { %v5605_v13 = vmul.f32 -1.442695, %v5277_v17 }
0x11e0   :  { %7136 = vpow2.f32 %v5602_v26 }
0x11e1   :  { %7138 = vpow2.f32 %v5603_v33  ;;  %v5248_v21 = vpop.f32.mrb[52].mxu1 }
0x11e2   :  { %7140 = vpow2.f32 %v5604_v18  ;;  %v6466_v23 = vpop.f32.mrb[53].mxu1  ;;  %v5249_v36 = vadd.f32 %v7157_v38, %v5248_v21 }
0x11e3   :  { %7142 = vpow2.f32 %v5605_v13 }
0x11e4   :  { %v5291_v14 = vrot.slane %v5249_v36, 1  ;;  %v5292_v41 = vrot.slane %v5249_v36, 2 }
0x11ea   :  { %v7137_v24 = vpop.eup %7136 }
0x11eb   :  { %v7139_v30 = vpop.eup %7138  ;;  %v5265_v32 = vadd.f32 1.0, %v7137_v24 }
0x11ec   :  { %v7141_v48 = vpop.eup %7140  ;;  %v5266_v27 = vadd.f32 1.0, %v7139_v30 }
0x11ed   :  { %v7143_v39 = vpop.eup %7142  ;;  %7144 = vrcp.f32 %v5265_v32  ;;  %v5284_v49 = vadd.f32 1.0, %v7141_v48 }
0x11ee   :  { %7146 = vrcp.f32 %v5266_v27  ;;  %v5285_v0 = vadd.f32 1.0, %v7143_v39 }
0x11ef   :  { %7148 = vrcp.f32 %v5284_v49 }
0x11f0   :  { %7150 = vrcp.f32 %v5285_v0 }
0x11f7   :  { %v7145_v53 = vpop.eup %7144 }
0x11f8   :  { %v7147_v50 = vpop.eup %7146  ;;  %v5295_v44 = vmul.f32 %v7145_v53, %v5291_v14 }
0x11f9   :  { %v7149_v52 = vpop.eup %7148  ;;  %v5296_v51 = vmul.f32 %v7147_v50, %v5292_v41 }
0x11fa   :  { %v7151_v42 = vpop.eup %7150  ;;  %v5297_v37 = vadd.f32 %v5295_v44, %v8526_v12  ;;  %v5309_v61 = vmul.f32 %v7149_v52, %v5305_v54  ;;  %v5301_v34 = vsub.f32 1.0, %v7149_v52 }
0x11fb   :  { %v5298_v55 = vadd.f32 %v5296_v51, %v8528_v11  ;;  %v5310_v56 = vmul.f32 %v7151_v42, %v5306_v47  ;;  %v5302_v45 = vsub.f32 1.0, %v7151_v42 }
0x11fc   :  { %7152 = vtanh.f32 %v5297_v37 }
0x11fd   :  { %7154 = vtanh.f32 %v5298_v55 }
0x1206   :  { %v7153_v4 = vpop.eup %7152 }
0x1207   :  { %v7155_v58 = vpop.eup %7154  ;;  %v5303_v2 = vmul.f32 %v7153_v4, %v5301_v34 }
0x1208   :  { %v5304_v59 = vmul.f32 %v7155_v58, %v5302_v45 }
0x1209   :  { %v5311_v35 = vadd.f32 %v5309_v61, %v5303_v2 }
0x120a   :  { %v5312_v46 = vadd.f32 %v5310_v56, %v5304_v59 }
0x120b   :  { %v5333_v62 = vsel %vm2815_vm11, %v8810_v31, %v5311_v35  ;;  %5319 = vst.msk [vmem:[#allocation30 - $0x5] sm:$0x80] %vm2793_vm10, %v5311_v35 }
0x120c   :  { %v5335_v12 = vmax.f32 %v5333_v62, 0.0  ;;  %v5315_v28 = vrot.slane %v5312_v46, 7  ;;  %v5334_v11 = vsel %vm2815_vm11, %v8816_v8, %v5312_v46 }
0x120d   :  { %v5336_v43 = vmax.f32 %v5334_v11, 0.0 }
0x120e   :  { %6475 = vmatprep.mubr.msk.f32.mxu0 %vm570_vm2, %v5335_v12  ;;  %5320 = vst.msk [vmem:[#allocation30 + $0x3] sm:$0x1] %vm2795_vm12, %v5315_v28 }
0x120f   :  { %6476 = vmatmul.mubr.msk.f32.vlgmr.msra.gmra.mrb[54].mxu0 %vm570_vm2, %v5336_v43 }
0x1210   :  { %7543 = shalt.err (!%p7540_p0)
}
0x1211   :  { %s8946_s24 = sld [smem:[#allocation55_spill]] }
0x1217   :  { %s7544_s6 = scalar_lea.hbm %s8946_s24, 64 }
0x1218   :  { %p7545_p1 = scmp.ne.s32.totalorder %s8946_s24, %s7544_s6  ;;  %p7548_p2 = scmp.lt.u32.totalorder %s7544_s6, %s8946_s24 }
0x121a   :  { %p7550_p3 = pnand %p7548_p2, %p7545_p1 }
0x121c   :  { %7553 = shalt.err (!%p7550_p3)
}
0x121d   :  { %s7621_s10 = smov 32   ;;  %s7622_s21 = smov 2   ;;  %vm5429_vm13 = vcmask 64512  }
0x121e   :  { %5455 = dma.vmem_to_hbm [thread:$0]  %s5450_s25, 64, %s8946_s24, [#allocation31], %s7621_s10, %s7621_s10, %s7622_s21  }
0x121f   :  { %s8947_s29 = sld [smem:[#allocation53_spill]]  ;;  %s7623_s20 = smov [#allocation29]  }
0x1220   :  { %s5437_s12 = sshll.u32 %s7623_s20, 4  ;;  %s5438_s12 = int_to_ptr.vmem [resolvable:$true] %s5437_s12 }
0x1221   :  { %s7554_s13 = scalar_lea.vmem %s5438_s12, 256  ;;  %p7559_p5 = scmp.lt.s32.totalorder %s5438_s12, %s5438_s12 }
0x1222   :  { %p7555_p4 = scmp.ne.s32.totalorder %s5438_s12, %s7554_s13  ;;  %p7560_p6 = scmp.lt.s32.totalorder %s7554_s13, %s7554_s13 }
0x1224   :  { %p7561_p7 = por %p7560_p6, %p7559_p5 }
0x1225   :  { %v5606_v31 = vld [vmem:[%s8947_s29] ss:$0 sm:$0xff] }
0x1226   :  { %p7562_p8 = pnand %p7561_p7, %p7555_p4 }
0x12e2   :  { %v6477_v8 = vpop.f32.mrb[54].mxu0 }
0x12e3   :  { %v5426_v3 = vadd.f32 %v6477_v8, %v5606_v31  ;;  %v5420_v60 = vpop.f32.mrb[55].mxu0 }
0x12e4   :  { %v5421_v5 = vadd.f32 %v5606_v31, %v5420_v60 }
0x12e5   :  { %5431 = vst.msk [vmem:[#allocation29 + $0x8] sm:$0xff] %vm5429_vm13, %v5426_v3 }
0x12e6   :  { %5430 = vst.msk [vmem:[#allocation29] sm:$0xff] %vm5429_vm13, %v5421_v5 }
0x12e7   :  { %7565 = shalt.err (!%p7562_p8)
}
0x12e8   :  { %s8948_s11 = sld [smem:[#allocation54_spill]] }
0x12ee   :  { %s7566_s23 = scalar_lea.hbm %s8948_s11, 256 }
0x12ef   :  { %p7567_p9 = scmp.ne.s32.totalorder %s8948_s11, %s7566_s23  ;;  %p7570_p10 = scmp.lt.u32.totalorder %s7566_s23, %s8948_s11 }
0x12f1   :  { %p7572_p11 = pnand %p7570_p10, %p7567_p9 }
0x12f3   :  { %7575 = shalt.err (!%p7572_p11)
}
0x12f4   :  { %5443 = dma.vmem_to_hbm [thread:$0]  %s5438_s12, 256, %s8948_s11, [#allocation4], %s7600_s5, %s7600_s5, %s7601_s0  }
0x12f5   :  { %7594 = dma.done.wait [#allocation4], 256  }
0x12f6   :  { %7595 = vsyncadd [#allocation4], 4294967040 }
0x12f7   :  { %7596 = dma.done.wait [#allocation31], 64  }
0x12f8   :  { %7597 = vsyncadd [#allocation31], 4294967232 }
0x12f9   :  { %5462 = vsyncpa [#allocation3], 1 }
0x12fa   :  { %5463 = vsyncpa [#allocation6], 1 }
0x12fb   :  { %5464 = vsyncpa [#allocation9], 1 }
0x12fc   :  { %5465 = vsyncpa [#allocation12], 1 }
0x12fd   :  { %5466 = vsyncpa [#allocation15], 1 }
0x12fe   :  { %5467 = vsyncpa [#allocation18], 1 }
0x12ff   :  { %5468 = vsyncpa [#allocation21], 1 }
0x1300   :  { %5469 = vsyncpa [#allocation24], 1 }
0x1301   :  { %5470 = vsyncpa [#allocation27], 1 }
0x1302   :  { %5471 = vsyncpa [#allocation4], 1 }
0x1303   :  { %5472 = vsyncpa [#allocation31], 1 }

</bundles_post_ra>
